<compile_context>
chip_gen: v6e
topology: v6e:2x2x1
jax: 0.10.0
libtpu: 0.0.40
codegen_flags: <defaults>
</compile_context>

<pallas_src>
import functools

import jax
import jax.numpy as jnp
from jax import lax
from jax.experimental import pallas as pl
from jax.experimental.pallas import tpu as pltpu

AA_EMBEDDING_SIZE = 27          # peptdeep building_block.aa_embedding_size
MOD_FEATURE_SIZE = 109          # mod feature vector length (synthetic config)
MOD_HIDDEN = 8                  # Mod_Embedding_FixFirstK(8)
MOD_FIX_K = 6                   # first k mod features passed through unchanged
CNN_IN = AA_EMBEDDING_SIZE + MOD_HIDDEN       # 35
CNN_OUT = 4 * CNN_IN                          # 140 = [x | conv3 | conv5 | conv7]
LSTM_IN = CNN_OUT


# ------------------------------------------------------------------ fused encoder
def _encoder_kernel(*refs, nlayers, s, bt, hdim):
    """Whole encoder + head Linear(hidden,64) for one batch tile, time-major.

    refs = [aa (s,bt,1) i32, mod (s,bt,8) f32, wc (245,140), bc (1,140),
            (wih, whh, b, hc0) * nlayers,
            attn_w (1,1,hdim), w1 (hdim,64), b1 (1,64),     # inputs
            o (bt,64),                                      # output
            gx (s*bt, 4*hdim), y (s*bt, hdim)]              # VMEM scratch
    """
    half = hdim // 2                  # per-direction hidden H
    g8 = 4 * hdim                     # fwd+bwd combined gate width (8H)
    aa_ref, mod_ref, wc_ref, bc_ref = refs[0:4]
    lstm_refs = refs[4:4 + 4 * nlayers]
    aw_ref, w1_ref, b1_ref = refs[4 + 4 * nlayers:7 + 4 * nlayers]
    o_ref = refs[7 + 4 * nlayers]
    gx_ref, y_ref = refs[8 + 4 * nlayers:10 + 4 * nlayers]

    # ---- Embedding preamble (stays in VMEM; the (S,Bt,35) tensor never hits HBM).
    cls = lax.broadcasted_iota(jnp.int32, (s, bt, AA_EMBEDDING_SIZE), 2)
    aa_oh = (aa_ref[...] == cls).astype(jnp.float32)          # one-hot via lane bcast
    x35 = jnp.concatenate([aa_oh, mod_ref[...]], axis=-1)     # (s, bt, 35)

    # ---- SeqCNN: identity + conv(k=3,5,7) folded into ONE K=245 matmul (im2col of
    #      7 time-shifted windows); single lane-dense (s*bt, 140) result.
    halo = jnp.zeros((3, bt, CNN_IN), jnp.float32)
    xpad = jnp.concatenate([halo, x35, halo], axis=0)         # (s+6, bt, 35)
    cols = jnp.concatenate([xpad[dk:dk + s] for dk in range(7)], axis=-1)
    x = jnp.dot(cols.reshape(s * bt, 7 * CNN_IN), wc_ref[...],
                preferred_element_type=jnp.float32) + bc_ref[...]      # (s*bt, 140)

    # Lane mask picking forward-direction columns of the interleaved gate layout
    # [i_f i_b | f_f f_b | g_f g_b | o_f o_b] (each sub-block `half` lanes wide).
    lane = lax.broadcasted_iota(jnp.int32, (1, g8), 1)
    fwd_lanes = (lane % hdim) < half

    # ---- Stacked bidirectional LSTM layers (both directions fused, one pass).
    for l in range(nlayers):
        wih_ref, whh_ref, b_ref, hc0_ref = lstm_refs[4 * l:4 * l + 4]

        # Hoisted input->gate projection for BOTH directions: one bf16 MXU matmul
        # (f32 accumulate), written to per-tile VMEM scratch.
        gx_ref[...] = (jnp.dot(x.astype(jnp.bfloat16), wih_ref[...],
                               preferred_element_type=jnp.float32) + b_ref[...])
        whh = whh_ref[...]                                    # (2H, 8H) block-diagonal
        h0 = jnp.broadcast_to(hc0_ref[0:1, :], (bt, hdim))    # [h0_f | h0_b]
        c0 = jnp.broadcast_to(hc0_ref[1:2, :], (bt, hdim))    # [c0_f | c0_b]

        def step(t, carry, whh=whh):
            h, c = carry                                      # h = [h_f | h_b]
            rf = pl.multiple_of(t * bt, 8)                    # forward reads time t
            rb = pl.multiple_of((s - 1 - t) * bt, 8)          # backward reads S-1-t
            gx_t = jnp.where(fwd_lanes, gx_ref[pl.ds(rf, bt), :],
                             gx_ref[pl.ds(rb, bt), :])
            g = gx_t + jnp.dot(h, whh, preferred_element_type=jnp.float32)
            sg = jax.nn.sigmoid(g)                            # one full-width EUP pass
            th = jnp.tanh(g)                                  # one full-width EUP pass
            c_new = (sg[:, hdim:2 * hdim] * c
                     + sg[:, 0:hdim] * th[:, 2 * hdim:3 * hdim])
            h_new = sg[:, 3 * hdim:4 * hdim] * jnp.tanh(c_new)
            y_ref[pl.ds(rf, bt), 0:half] = h_new[:, 0:half]           # fwd half
            y_ref[pl.ds(rb, bt), half:hdim] = h_new[:, half:hdim]     # bwd half
            return h_new, c_new

        lax.fori_loop(0, s, step, (h0, c0), unroll=min(8, s))
        x = y_ref[...]                                        # (s*bt, hdim) next input

    # ---- SeqAttentionSum (softmax over seq) + head Linear(hidden, 64).
    y = x.reshape(s, bt, hdim)                                # aligned split (bt%8==0)
    logits = jnp.sum(y * aw_ref[...], axis=-1, keepdims=True)          # (s, bt, 1)
    e = jnp.exp(logits - jnp.max(logits, axis=0, keepdims=True))
    attn = e / jnp.sum(e, axis=0, keepdims=True)
    pooled = jnp.sum(y * attn, axis=0)                                  # (bt, hdim)
    o_ref[...] = (jnp.dot(pooled, w1_ref[...], preferred_element_type=jnp.float32)
                  + b1_ref[...])


def _full_spec(arr):
    nd = arr.ndim
    return pl.BlockSpec(arr.shape, lambda i, _n=nd: (0,) * _n)


def _batch_tiling(b):
    bp = -(-b // 8) * 8                                       # sublane-aligned batch
    bt = 8
    while bt * 2 <= min(bp, 128) and bp % (bt * 2) == 0:      # bigger tiles amortize
        bt *= 2                                               # per-grid-step overhead
    return bp, bt


def encoder_head1(prepped, aa_t, mod_t, bt):
    """aa_t: (S, Bp, 1) int32, mod_t: (S, Bp, 8) f32 -> (Bp, 64) f32."""
    s, bp, _ = aa_t.shape
    hdim = prepped["attn_w"].shape[-1]
    nlayers = len(prepped["lstm"])

    args = [aa_t, mod_t, prepped["wc"], prepped["bc"]]
    in_specs = [
        pl.BlockSpec((s, bt, 1), lambda i: (0, i, 0)),
        pl.BlockSpec((s, bt, MOD_HIDDEN), lambda i: (0, i, 0)),
        _full_spec(prepped["wc"]),
        _full_spec(prepped["bc"]),
    ]
    for layer in prepped["lstm"]:
        for name in ("wih", "whh", "b", "hc0"):
            args.append(layer[name])
            in_specs.append(_full_spec(layer[name]))
    for name in ("attn_w", "head_w1", "head_b1"):
        args.append(prepped[name])
        in_specs.append(_full_spec(prepped[name]))

    kernel = functools.partial(_encoder_kernel, nlayers=nlayers, s=s, bt=bt, hdim=hdim)
    return pl.pallas_call(
        kernel,
        out_shape=jax.ShapeDtypeStruct((bp, 64), jnp.float32),
        grid=(bp // bt,),
        in_specs=in_specs,
        out_specs=pl.BlockSpec((bt, 64), lambda i: (i, 0)),
        scratch_shapes=[pltpu.VMEM((s * bt, 4 * hdim), jnp.float32),   # gx
                        pltpu.VMEM((s * bt, hdim), jnp.float32)],      # y
        compiler_params=pltpu.CompilerParams(dimension_semantics=("parallel",)),
    )(*args)


# -------------------------------------------------------------------------- model
def forward(prepped, aa_x, mod_x):
    B, S = aa_x.shape
    bp, bt = _batch_tiling(B)

    # XLA preamble kept tiny: mod feature compression 109 -> 8.  The 27-wide one-hot
    # and all 35/140/... activations are built inside the kernel (never hit HBM).
    mod_emb = jnp.concatenate(
        [mod_x[:, :, :MOD_FIX_K], mod_x[:, :, MOD_FIX_K:] @ prepped["mod_w"]], axis=-1)

    # Time-major inputs + sublane-aligned batch padding (Bp multiple of 8).
    aa_t = jnp.transpose(aa_x, (1, 0))[:, :, None]            # (S, B, 1) int32
    mod_t = jnp.transpose(mod_emb, (1, 0, 2))                 # (S, B, 8)
    if bp != B:
        aa_t = jnp.pad(aa_t, ((0, 0), (0, bp - B), (0, 0)))
        mod_t = jnp.pad(mod_t, ((0, 0), (0, bp - B), (0, 0)))

    h1 = encoder_head1(prepped, aa_t, mod_t, bt)[:B]          # (B, 64)

    # TODO(synk): exact-erf GELU has no Mosaic lowering; the tiny (B,64) epilogue stays
    # in XLA to match torch.nn.GELU numerics exactly (Dropout is identity at eval).
    out = jax.nn.gelu(h1, approximate=False) @ prepped["head_w2"] + prepped["head_b2"]
    return jnp.squeeze(out, axis=-1)                          # (B,)


# ---------------------------------------------------------------- weight packing
def prepare_params(params):
    """One-time packing of weights into kernel-friendly layouts (review item 12)."""
    cin = CNN_IN
    # Combined SeqCNN weight: im2col taps stacked on K, identity branch folded in.
    wc = jnp.zeros((7 * cin, 4 * cin), jnp.float32)
    wc = wc.at[3 * cin:4 * cin, 0:cin].set(jnp.eye(cin, dtype=jnp.float32))
    for j in range(3):
        wc = wc.at[(j + 2) * cin:(j + 3) * cin, cin:2 * cin].set(params["w3"][j])
    for j in range(5):
        wc = wc.at[(j + 1) * cin:(j + 2) * cin, 2 * cin:3 * cin].set(params["w5"][j])
    for j in range(7):
        wc = wc.at[j * cin:(j + 1) * cin, 3 * cin:4 * cin].set(params["w7"][j])
    bc = jnp.concatenate([jnp.zeros((1, cin), jnp.float32),
                          params["b3"], params["b5"], params["b7"]], axis=1)

    lstm = []
    for layer in params["lstm"]:
        H = layer["h0_f"].shape[-1]
        hdim = 2 * H

        def interleave(wf, wb):
            # gate-major, direction-interleaved columns.
            blocks = []
            for k in range(4):
                blocks.append(wf[:, k * H:(k + 1) * H])
                blocks.append(wb[:, k * H:(k + 1) * H])
            return jnp.concatenate(blocks, axis=1)

        wih = interleave(layer["wih_f"], layer["wih_b"]).astype(jnp.bfloat16)
        bias = interleave(layer["b_f"], layer["b_b"])                   # (1, 8H) f32
        whh = jnp.zeros((hdim, 4 * hdim), jnp.float32)                  # block-diag
        for k in range(4):
            whh = whh.at[0:H, k * hdim:k * hdim + H].set(
                layer["whh_f"][:, k * H:(k + 1) * H])
            whh = whh.at[H:hdim, k * hdim + H:(k + 1) * hdim].set(
                layer["whh_b"][:, k * H:(k + 1) * H])
        hc0 = jnp.concatenate(
            [jnp.concatenate([layer["h0_f"], layer["h0_b"]], axis=1),
             jnp.concatenate([layer["c0_f"], layer["c0_b"]], axis=1)], axis=0)
        lstm.append({"wih": wih, "whh": whh, "b": bias, "hc0": hc0})

    return {
        "mod_w": params["mod_w"], "wc": wc, "bc": bc, "lstm": lstm,
        "attn_w": params["attn_w"].reshape(1, 1, -1),
        "head_w1": params["head_w1"], "head_b1": params["head_b1"],
        "head_w2": params["head_w2"], "head_b2": params["head_b2"],
    }


def init_params(key, hidden_dim=32, nlayers=2, output_dim=1):
    assert hidden_dim % 2 == 0
    H = hidden_dim // 2  # per-direction hidden (bidirectional)

    key_holder = [key]

    def unif(shape, fan):
        key_holder[0], sub = jax.random.split(key_holder[0])
        s = 1.0 / float(fan) ** 0.5
        return jax.random.uniform(sub, shape, jnp.float32, -s, s)

    params = {
        "mod_w": unif((MOD_FEATURE_SIZE - MOD_FIX_K, MOD_HIDDEN - MOD_FIX_K),
                      MOD_FEATURE_SIZE - MOD_FIX_K),
        "w3": unif((3, CNN_IN, CNN_IN), CNN_IN * 3), "b3": unif((1, CNN_IN), CNN_IN * 3),
        "w5": unif((5, CNN_IN, CNN_IN), CNN_IN * 5), "b5": unif((1, CNN_IN), CNN_IN * 5),
        "w7": unif((7, CNN_IN, CNN_IN), CNN_IN * 7), "b7": unif((1, CNN_IN), CNN_IN * 7),
        "attn_w": unif((1, hidden_dim), hidden_dim),
        "head_w1": unif((hidden_dim, 64), hidden_dim), "head_b1": unif((1, 64), hidden_dim),
        "head_w2": unif((64, output_dim), 64), "head_b2": unif((output_dim,), 64),
        "lstm": [],
    }
    in_dim = LSTM_IN
    for _ in range(nlayers):
        layer = {}
        for d in ("f", "b"):
            layer[f"wih_{d}"] = unif((in_dim, 4 * H), H)   # transposed torch weight_ih
            layer[f"whh_{d}"] = unif((H, 4 * H), H)        # transposed torch weight_hh
            layer[f"b_{d}"] = unif((1, 4 * H), H)          # b_ih + b_hh pre-summed
            layer[f"h0_{d}"] = unif((1, H), H)             # SeqLSTM learnable h0
            layer[f"c0_{d}"] = unif((1, H), H)             # SeqLSTM learnable c0
        params["lstm"].append(layer)
        in_dim = hidden_dim
    return params


if __name__ == "__main__":
    B, S = 2, 8
    hidden_dim, nlayers, output_dim = 32, 2, 1

    key = jax.random.PRNGKey(0)
    k_aa, k_mod, k_par = jax.random.split(key, 3)
    aa_x = jax.random.randint(k_aa, (B, S), 1, AA_EMBEDDING_SIZE, dtype=jnp.int32)
    mod_x = 0.1 * jax.random.normal(k_mod, (B, S, MOD_FEATURE_SIZE), dtype=jnp.float32)

    params = init_params(k_par, hidden_dim=hidden_dim, nlayers=nlayers,
                         output_dim=output_dim)
    prepped = prepare_params(params)          # one-time weight packing (not per call)

    fwd = jax.jit(forward)
    out = fwd(prepped, aa_x, mod_x)
    out = jax.block_until_ready(out)
    assert out.shape == (B,), out.shape
    assert bool(jnp.all(jnp.isfinite(out)))
    print("KERNEL_OK")
</pallas_src>

<mosaic_0001>
module attributes {stable_mosaic.version = 11 : i64} {
  func.func @_encoder_kernel(%arg0: i32, %arg1: memref<8x8x1xi32, #tpu.memory_space<vmem>>, %arg2: memref<8x8x8xf32, #tpu.memory_space<vmem>>, %arg3: memref<245x140xf32, #tpu.memory_space<vmem>>, %arg4: memref<1x140xf32, #tpu.memory_space<vmem>>, %arg5: memref<140x128xbf16, #tpu.memory_space<vmem>>, %arg6: memref<32x128xf32, #tpu.memory_space<vmem>>, %arg7: memref<1x128xf32, #tpu.memory_space<vmem>>, %arg8: memref<2x32xf32, #tpu.memory_space<vmem>>, %arg9: memref<32x128xbf16, #tpu.memory_space<vmem>>, %arg10: memref<32x128xf32, #tpu.memory_space<vmem>>, %arg11: memref<1x128xf32, #tpu.memory_space<vmem>>, %arg12: memref<2x32xf32, #tpu.memory_space<vmem>>, %arg13: memref<1x1x32xf32, #tpu.memory_space<vmem>>, %arg14: memref<32x64xf32, #tpu.memory_space<vmem>>, %arg15: memref<1x64xf32, #tpu.memory_space<vmem>>, %arg16: memref<8x64xf32, #tpu.memory_space<vmem>>, %arg17: memref<64x128xf32, #tpu.memory_space<vmem>>, %arg18: memref<64x32xf32, #tpu.memory_space<vmem>>) attributes {dimension_semantics = [#tpu.dimension_semantics<parallel>], iteration_bounds = array<i64: 1>, scalar_prefetch = 0 : i64, scratch_operands = 2 : i64, tpu.core_type = #tpu.core_type<tc>, window_params = [{transform_indices = @transform_0, window_bounds = array<i64: 8, 8, 1>}, {transform_indices = @transform_1, window_bounds = array<i64: 8, 8, 8>}, {pipeline_mode = #tpu.pipeline_mode<synchronous>, transform_indices = @transform_2, window_bounds = array<i64: 245, 140>}, {pipeline_mode = #tpu.pipeline_mode<synchronous>, transform_indices = @transform_3, window_bounds = array<i64: 1, 140>}, {pipeline_mode = #tpu.pipeline_mode<synchronous>, transform_indices = @transform_4, window_bounds = array<i64: 140, 128>}, {pipeline_mode = #tpu.pipeline_mode<synchronous>, transform_indices = @transform_5, window_bounds = array<i64: 32, 128>}, {pipeline_mode = #tpu.pipeline_mode<synchronous>, transform_indices = @transform_6, window_bounds = array<i64: 1, 128>}, {pipeline_mode = #tpu.pipeline_mode<synchronous>, transform_indices = @transform_7, window_bounds = array<i64: 2, 32>}, {pipeline_mode = #tpu.pipeline_mode<synchronous>, transform_indices = @transform_8, window_bounds = array<i64: 32, 128>}, {pipeline_mode = #tpu.pipeline_mode<synchronous>, transform_indices = @transform_9, window_bounds = array<i64: 32, 128>}, {pipeline_mode = #tpu.pipeline_mode<synchronous>, transform_indices = @transform_10, window_bounds = array<i64: 1, 128>}, {pipeline_mode = #tpu.pipeline_mode<synchronous>, transform_indices = @transform_11, window_bounds = array<i64: 2, 32>}, {pipeline_mode = #tpu.pipeline_mode<synchronous>, transform_indices = @transform_12, window_bounds = array<i64: 1, 1, 32>}, {pipeline_mode = #tpu.pipeline_mode<synchronous>, transform_indices = @transform_13, window_bounds = array<i64: 32, 64>}, {pipeline_mode = #tpu.pipeline_mode<synchronous>, transform_indices = @transform_14, window_bounds = array<i64: 1, 64>}, {transform_indices = @transform_15, window_bounds = array<i64: 8, 64>}]} {
    %0 = tpu.iota {dimensions = array<i32: 2>} : vector<8x8x27xi32>
    %c0 = arith.constant 0 : index
    %c0_0 = arith.constant 0 : index
    %c0_1 = arith.constant 0 : index
    %1 = vector.load %arg1[%c0, %c0_0, %c0_1] : memref<8x8x1xi32, #tpu.memory_space<vmem>>, vector<8x8x1xi32>
    %2 = vector.broadcast %1 : vector<8x8x1xi32> to vector<8x8x27xi32>
    %3 = arith.cmpi eq, %2, %0 : vector<8x8x27xi32>
    %4 = arith.extui %3 : vector<8x8x27xi1> to vector<8x8x27xi32>
    %5 = arith.sitofp %4 : vector<8x8x27xi32> to vector<8x8x27xf32>
    %c0_2 = arith.constant 0 : index
    %c0_3 = arith.constant 0 : index
    %c0_4 = arith.constant 0 : index
    %6 = vector.load %arg2[%c0_2, %c0_3, %c0_4] : memref<8x8x8xf32, #tpu.memory_space<vmem>>, vector<8x8x8xf32>
    %7 = tpu.concatenate %5, %6 in 2 : vector<8x8x27xf32>, vector<8x8x8xf32> -> vector<8x8x35xf32>
    %cst = arith.constant 0.000000e+00 : f32
    %8 = vector.broadcast %cst : f32 to vector<3x8x35xf32>
    %9 = tpu.concatenate %8, %7, %8 in 0 : vector<3x8x35xf32>, vector<8x8x35xf32>, vector<3x8x35xf32> -> vector<14x8x35xf32>
    %10 = vector.extract_strided_slice %9 {offsets = [0, 0, 0], sizes = [8, 8, 35], strides = [1, 1, 1]} : vector<14x8x35xf32> to vector<8x8x35xf32>
    %11 = vector.extract_strided_slice %9 {offsets = [1, 0, 0], sizes = [8, 8, 35], strides = [1, 1, 1]} : vector<14x8x35xf32> to vector<8x8x35xf32>
    %12 = vector.extract_strided_slice %9 {offsets = [2, 0, 0], sizes = [8, 8, 35], strides = [1, 1, 1]} : vector<14x8x35xf32> to vector<8x8x35xf32>
    %13 = vector.extract_strided_slice %9 {offsets = [3, 0, 0], sizes = [8, 8, 35], strides = [1, 1, 1]} : vector<14x8x35xf32> to vector<8x8x35xf32>
    %14 = vector.extract_strided_slice %9 {offsets = [4, 0, 0], sizes = [8, 8, 35], strides = [1, 1, 1]} : vector<14x8x35xf32> to vector<8x8x35xf32>
    %15 = vector.extract_strided_slice %9 {offsets = [5, 0, 0], sizes = [8, 8, 35], strides = [1, 1, 1]} : vector<14x8x35xf32> to vector<8x8x35xf32>
    %16 = vector.extract_strided_slice %9 {offsets = [6, 0, 0], sizes = [8, 8, 35], strides = [1, 1, 1]} : vector<14x8x35xf32> to vector<8x8x35xf32>
    %17 = tpu.concatenate %10, %11, %12, %13, %14, %15, %16 in 2 : vector<8x8x35xf32>, vector<8x8x35xf32>, vector<8x8x35xf32>, vector<8x8x35xf32>, vector<8x8x35xf32>, vector<8x8x35xf32>, vector<8x8x35xf32> -> vector<8x8x245xf32>
    %18 = vector.shape_cast %17 : vector<8x8x245xf32> to vector<64x245xf32>
    %c0_5 = arith.constant 0 : index
    %c0_6 = arith.constant 0 : index
    %19 = vector.load %arg3[%c0_5, %c0_6] : memref<245x140xf32, #tpu.memory_space<vmem>>, vector<245x140xf32>
    %cst_7 = arith.constant dense<0.000000e+00> : vector<64x140xf32>
    %20 = tpu.matmul %18, %19, %cst_7 {dimension_numbers = #tpu.dot_dimension_numbers<[1], [0], [0], [1], [0, 0, 1, 1], [], []>} : vector<64x245xf32>, vector<245x140xf32>, vector<64x140xf32> -> vector<64x140xf32>
    %c0_8 = arith.constant 0 : index
    %c0_9 = arith.constant 0 : index
    %21 = vector.load %arg4[%c0_8, %c0_9] : memref<1x140xf32, #tpu.memory_space<vmem>>, vector<1x140xf32>
    %22 = vector.broadcast %21 : vector<1x140xf32> to vector<64x140xf32>
    %23 = arith.addf %20, %22 : vector<64x140xf32>
    %24 = tpu.iota {dimensions = array<i32: 1>} : vector<1x128xi32>
    %c32_i32 = arith.constant 32 : i32
    %c0_i32 = arith.constant 0 : i32
    %25 = arith.cmpi eq, %c32_i32, %c0_i32 : i32
    %c1_i32 = arith.constant 1 : i32
    %26 = arith.select %25, %c1_i32, %c32_i32 : i32
    %27 = vector.broadcast %26 : i32 to vector<1x128xi32>
    %28 = arith.remsi %24, %27 : vector<1x128xi32>
    %c0_i32_10 = arith.constant 0 : i32
    %29 = vector.broadcast %c0_i32_10 : i32 to vector<1x128xi32>
    %30 = arith.cmpi ne, %28, %29 : vector<1x128xi32>
    %c0_i32_11 = arith.constant 0 : i32
    %31 = vector.broadcast %c0_i32_11 : i32 to vector<1x128xi32>
    %32 = arith.cmpi slt, %28, %31 : vector<1x128xi32>
    %c0_i32_12 = arith.constant 0 : i32
    %33 = arith.cmpi slt, %26, %c0_i32_12 : i32
    %34 = vector.broadcast %33 : i1 to vector<1x128xi1>
    %35 = vector.broadcast %34 : vector<1x128xi1> to vector<1x128xi1>
    %36 = arith.xori %32, %35 : vector<1x128xi1>
    %37 = arith.andi %36, %30 : vector<1x128xi1>
    %38 = vector.broadcast %26 : i32 to vector<1x128xi32>
    %39 = arith.addi %28, %38 : vector<1x128xi32>
    %40 = arith.select %37, %39, %28 : vector<1x128xi1>, vector<1x128xi32>
    %c16_i32 = arith.constant 16 : i32
    %41 = vector.broadcast %c16_i32 : i32 to vector<1x128xi32>
    %42 = arith.cmpi slt, %40, %41 : vector<1x128xi32>
    %43 = arith.truncf %23 : vector<64x140xf32> to vector<64x140xbf16>
    %c0_13 = arith.constant 0 : index
    %c0_14 = arith.constant 0 : index
    %44 = vector.load %arg5[%c0_13, %c0_14] : memref<140x128xbf16, #tpu.memory_space<vmem>>, vector<140x128xbf16>
    %cst_15 = arith.constant dense<0.000000e+00> : vector<64x128xf32>
    %45 = tpu.matmul %43, %44, %cst_15 {dimension_numbers = #tpu.dot_dimension_numbers<[1], [0], [0], [1], [0, 0, 1, 1], [], []>} : vector<64x140xbf16>, vector<140x128xbf16>, vector<64x128xf32> -> vector<64x128xf32>
    %c0_16 = arith.constant 0 : index
    %c0_17 = arith.constant 0 : index
    %46 = vector.load %arg7[%c0_16, %c0_17] : memref<1x128xf32, #tpu.memory_space<vmem>>, vector<1x128xf32>
    %47 = vector.broadcast %46 : vector<1x128xf32> to vector<64x128xf32>
    %48 = arith.addf %45, %47 : vector<64x128xf32>
    %c0_18 = arith.constant 0 : index
    %c0_19 = arith.constant 0 : index
    %49 = vector.load %arg17[%c0_18, %c0_19] : memref<64x128xf32, #tpu.memory_space<vmem>>, vector<64x128xf32>
    tpu.vector_store %arg17[%c0_18, %c0_19], %48 {strides = array<i32>} : memref<64x128xf32, #tpu.memory_space<vmem>>, vector<64x128xf32>,
    %c0_20 = arith.constant 0 : index
    %c0_21 = arith.constant 0 : index
    %50 = vector.load %arg6[%c0_20, %c0_21] : memref<32x128xf32, #tpu.memory_space<vmem>>, vector<32x128xf32>
    %c0_22 = arith.constant 0 : index
    %c0_23 = arith.constant 0 : index
    %51 = vector.load %arg8[%c0_22, %c0_23] : memref<2x32xf32, #tpu.memory_space<vmem>>, vector<1x32xf32>
    %52 = vector.shape_cast %51 : vector<1x32xf32> to vector<1x32xf32>
    %53 = vector.broadcast %52 : vector<1x32xf32> to vector<8x32xf32>
    %c1 = arith.constant 1 : index
    %c0_24 = arith.constant 0 : index
    %54 = vector.load %arg8[%c1, %c0_24] : memref<2x32xf32, #tpu.memory_space<vmem>>, vector<1x32xf32>
    %55 = vector.shape_cast %54 : vector<1x32xf32> to vector<1x32xf32>
    %56 = vector.broadcast %55 : vector<1x32xf32> to vector<8x32xf32>
    %c0_i32_25 = arith.constant 0 : i32
    %c8_i32 = arith.constant 8 : i32
    %57 = arith.muli %c0_i32_25, %c8_i32 : i32
    %58 = tpu.assume_multiple %57, 8 : i32
    %c7_i32 = arith.constant 7 : i32
    %59 = arith.subi %c7_i32, %c0_i32_25 : i32
    %c8_i32_26 = arith.constant 8 : i32
    %60 = arith.muli %59, %c8_i32_26 : i32
    %61 = tpu.assume_multiple %60, 8 : i32
    %62 = arith.index_cast %58 : i32 to index
    %c0_27 = arith.constant 0 : index
    %63 = vector.load %arg17[%62, %c0_27] : memref<64x128xf32, #tpu.memory_space<vmem>>, vector<8x128xf32>
    %64 = arith.index_cast %61 : i32 to index
    %c0_28 = arith.constant 0 : index
    %65 = vector.load %arg17[%64, %c0_28] : memref<64x128xf32, #tpu.memory_space<vmem>>, vector<8x128xf32>
    %66 = vector.shape_cast %42 : vector<1x128xi1> to vector<1x128xi1>
    %67 = vector.broadcast %66 : vector<1x128xi1> to vector<8x128xi1>
    %68 = arith.select %67, %63, %65 : vector<8x128xi1>, vector<8x128xf32>
    %cst_29 = arith.constant dense<0.000000e+00> : vector<8x128xf32>
    %69 = tpu.matmul %53, %50, %cst_29 {dimension_numbers = #tpu.dot_dimension_numbers<[1], [0], [0], [1], [0, 0, 1, 1], [], []>} : vector<8x32xf32>, vector<32x128xf32>, vector<8x128xf32> -> vector<8x128xf32>
    %70 = arith.addf %68, %69 : vector<8x128xf32>
    %71 = arith.negf %70 : vector<8x128xf32>
    %72 = math.exp %71 : vector<8x128xf32>
    %cst_30 = arith.constant 1.000000e+00 : f32
    %73 = vector.broadcast %cst_30 : f32 to vector<8x128xf32>
    %74 = arith.addf %73, %72 : vector<8x128xf32>
    %75 = arith.divf %73, %74 : vector<8x128xf32>
    %76 = math.tanh %70 : vector<8x128xf32>
    %77 = vector.extract_strided_slice %75 {offsets = [0, 32], sizes = [8, 32], strides = [1, 1]} : vector<8x128xf32> to vector<8x32xf32>
    %78 = arith.mulf %77, %56 : vector<8x32xf32>
    %79 = vector.extract_strided_slice %75 {offsets = [0, 0], sizes = [8, 32], strides = [1, 1]} : vector<8x128xf32> to vector<8x32xf32>
    %80 = vector.extract_strided_slice %76 {offsets = [0, 64], sizes = [8, 32], strides = [1, 1]} : vector<8x128xf32> to vector<8x32xf32>
    %81 = arith.mulf %79, %80 : vector<8x32xf32>
    %82 = arith.addf %78, %81 : vector<8x32xf32>
    %83 = vector.extract_strided_slice %75 {offsets = [0, 96], sizes = [8, 32], strides = [1, 1]} : vector<8x128xf32> to vector<8x32xf32>
    %84 = math.tanh %82 : vector<8x32xf32>
    %85 = arith.mulf %83, %84 : vector<8x32xf32>
    %86 = vector.extract_strided_slice %85 {offsets = [0, 0], sizes = [8, 16], strides = [1, 1]} : vector<8x32xf32> to vector<8x16xf32>
    %87 = arith.index_cast %58 : i32 to index
    %c0_31 = arith.constant 0 : index
    %88 = vector.load %arg18[%87, %c0_31] : memref<64x32xf32, #tpu.memory_space<vmem>>, vector<8x16xf32>
    tpu.vector_store %arg18[%87, %c0_31], %86 {strides = array<i32>} : memref<64x32xf32, #tpu.memory_space<vmem>>, vector<8x16xf32>,
    %89 = vector.extract_strided_slice %85 {offsets = [0, 16], sizes = [8, 16], strides = [1, 1]} : vector<8x32xf32> to vector<8x16xf32>
    %90 = arith.index_cast %61 : i32 to index
    %c16 = arith.constant 16 : index
    %91 = vector.load %arg18[%90, %c16] : memref<64x32xf32, #tpu.memory_space<vmem>>, vector<8x16xf32>
    tpu.vector_store %arg18[%90, %c16], %89 {strides = array<i32>} : memref<64x32xf32, #tpu.memory_space<vmem>>, vector<8x16xf32>,
    %c1_i32_32 = arith.constant 1 : i32
    %c8_i32_33 = arith.constant 8 : i32
    %92 = arith.muli %c1_i32_32, %c8_i32_33 : i32
    %93 = tpu.assume_multiple %92, 8 : i32
    %c7_i32_34 = arith.constant 7 : i32
    %94 = arith.subi %c7_i32_34, %c1_i32_32 : i32
    %c8_i32_35 = arith.constant 8 : i32
    %95 = arith.muli %94, %c8_i32_35 : i32
    %96 = tpu.assume_multiple %95, 8 : i32
    %97 = arith.index_cast %93 : i32 to index
    %c0_36 = arith.constant 0 : index
    %98 = vector.load %arg17[%97, %c0_36] : memref<64x128xf32, #tpu.memory_space<vmem>>, vector<8x128xf32>
    %99 = arith.index_cast %96 : i32 to index
    %c0_37 = arith.constant 0 : index
    %100 = vector.load %arg17[%99, %c0_37] : memref<64x128xf32, #tpu.memory_space<vmem>>, vector<8x128xf32>
    %101 = vector.shape_cast %42 : vector<1x128xi1> to vector<1x128xi1>
    %102 = vector.broadcast %101 : vector<1x128xi1> to vector<8x128xi1>
    %103 = arith.select %102, %98, %100 : vector<8x128xi1>, vector<8x128xf32>
    %cst_38 = arith.constant dense<0.000000e+00> : vector<8x128xf32>
    %104 = tpu.matmul %85, %50, %cst_38 {dimension_numbers = #tpu.dot_dimension_numbers<[1], [0], [0], [1], [0, 0, 1, 1], [], []>} : vector<8x32xf32>, vector<32x128xf32>, vector<8x128xf32> -> vector<8x128xf32>
    %105 = arith.addf %103, %104 : vector<8x128xf32>
    %106 = arith.negf %105 : vector<8x128xf32>
    %107 = math.exp %106 : vector<8x128xf32>
    %cst_39 = arith.constant 1.000000e+00 : f32
    %108 = vector.broadcast %cst_39 : f32 to vector<8x128xf32>
    %109 = arith.addf %108, %107 : vector<8x128xf32>
    %110 = arith.divf %108, %109 : vector<8x128xf32>
    %111 = math.tanh %105 : vector<8x128xf32>
    %112 = vector.extract_strided_slice %110 {offsets = [0, 32], sizes = [8, 32], strides = [1, 1]} : vector<8x128xf32> to vector<8x32xf32>
    %113 = arith.mulf %112, %82 : vector<8x32xf32>
    %114 = vector.extract_strided_slice %110 {offsets = [0, 0], sizes = [8, 32], strides = [1, 1]} : vector<8x128xf32> to vector<8x32xf32>
    %115 = vector.extract_strided_slice %111 {offsets = [0, 64], sizes = [8, 32], strides = [1, 1]} : vector<8x128xf32> to vector<8x32xf32>
    %116 = arith.mulf %114, %115 : vector<8x32xf32>
    %117 = arith.addf %113, %116 : vector<8x32xf32>
    %118 = vector.extract_strided_slice %110 {offsets = [0, 96], sizes = [8, 32], strides = [1, 1]} : vector<8x128xf32> to vector<8x32xf32>
    %119 = math.tanh %117 : vector<8x32xf32>
    %120 = arith.mulf %118, %119 : vector<8x32xf32>
    %121 = vector.extract_strided_slice %120 {offsets = [0, 0], sizes = [8, 16], strides = [1, 1]} : vector<8x32xf32> to vector<8x16xf32>
    %122 = arith.index_cast %93 : i32 to index
    %c0_40 = arith.constant 0 : index
    %123 = vector.load %arg18[%122, %c0_40] : memref<64x32xf32, #tpu.memory_space<vmem>>, vector<8x16xf32>
    tpu.vector_store %arg18[%122, %c0_40], %121 {strides = array<i32>} : memref<64x32xf32, #tpu.memory_space<vmem>>, vector<8x16xf32>,
    %124 = vector.extract_strided_slice %120 {offsets = [0, 16], sizes = [8, 16], strides = [1, 1]} : vector<8x32xf32> to vector<8x16xf32>
    %125 = arith.index_cast %96 : i32 to index
    %c16_41 = arith.constant 16 : index
    %126 = vector.load %arg18[%125, %c16_41] : memref<64x32xf32, #tpu.memory_space<vmem>>, vector<8x16xf32>
    tpu.vector_store %arg18[%125, %c16_41], %124 {strides = array<i32>} : memref<64x32xf32, #tpu.memory_space<vmem>>, vector<8x16xf32>,
    %c2_i32 = arith.constant 2 : i32
    %c8_i32_42 = arith.constant 8 : i32
    %127 = arith.muli %c2_i32, %c8_i32_42 : i32
    %128 = tpu.assume_multiple %127, 8 : i32
    %c7_i32_43 = arith.constant 7 : i32
    %129 = arith.subi %c7_i32_43, %c2_i32 : i32
    %c8_i32_44 = arith.constant 8 : i32
    %130 = arith.muli %129, %c8_i32_44 : i32
    %131 = tpu.assume_multiple %130, 8 : i32
    %132 = arith.index_cast %128 : i32 to index
    %c0_45 = arith.constant 0 : index
    %133 = vector.load %arg17[%132, %c0_45] : memref<64x128xf32, #tpu.memory_space<vmem>>, vector<8x128xf32>
    %134 = arith.index_cast %131 : i32 to index
    %c0_46 = arith.constant 0 : index
    %135 = vector.load %arg17[%134, %c0_46] : memref<64x128xf32, #tpu.memory_space<vmem>>, vector<8x128xf32>
    %136 = vector.shape_cast %42 : vector<1x128xi1> to vector<1x128xi1>
    %137 = vector.broadcast %136 : vector<1x128xi1> to vector<8x128xi1>
    %138 = arith.select %137, %133, %135 : vector<8x128xi1>, vector<8x128xf32>
    %cst_47 = arith.constant dense<0.000000e+00> : vector<8x128xf32>
    %139 = tpu.matmul %120, %50, %cst_47 {dimension_numbers = #tpu.dot_dimension_numbers<[1], [0], [0], [1], [0, 0, 1, 1], [], []>} : vector<8x32xf32>, vector<32x128xf32>, vector<8x128xf32> -> vector<8x128xf32>
    %140 = arith.addf %138, %139 : vector<8x128xf32>
    %141 = arith.negf %140 : vector<8x128xf32>
    %142 = math.exp %141 : vector<8x128xf32>
    %cst_48 = arith.constant 1.000000e+00 : f32
    %143 = vector.broadcast %cst_48 : f32 to vector<8x128xf32>
    %144 = arith.addf %143, %142 : vector<8x128xf32>
    %145 = arith.divf %143, %144 : vector<8x128xf32>
    %146 = math.tanh %140 : vector<8x128xf32>
    %147 = vector.extract_strided_slice %145 {offsets = [0, 32], sizes = [8, 32], strides = [1, 1]} : vector<8x128xf32> to vector<8x32xf32>
    %148 = arith.mulf %147, %117 : vector<8x32xf32>
    %149 = vector.extract_strided_slice %145 {offsets = [0, 0], sizes = [8, 32], strides = [1, 1]} : vector<8x128xf32> to vector<8x32xf32>
    %150 = vector.extract_strided_slice %146 {offsets = [0, 64], sizes = [8, 32], strides = [1, 1]} : vector<8x128xf32> to vector<8x32xf32>
    %151 = arith.mulf %149, %150 : vector<8x32xf32>
    %152 = arith.addf %148, %151 : vector<8x32xf32>
    %153 = vector.extract_strided_slice %145 {offsets = [0, 96], sizes = [8, 32], strides = [1, 1]} : vector<8x128xf32> to vector<8x32xf32>
    %154 = math.tanh %152 : vector<8x32xf32>
    %155 = arith.mulf %153, %154 : vector<8x32xf32>
    %156 = vector.extract_strided_slice %155 {offsets = [0, 0], sizes = [8, 16], strides = [1, 1]} : vector<8x32xf32> to vector<8x16xf32>
    %157 = arith.index_cast %128 : i32 to index
    %c0_49 = arith.constant 0 : index
    %158 = vector.load %arg18[%157, %c0_49] : memref<64x32xf32, #tpu.memory_space<vmem>>, vector<8x16xf32>
    tpu.vector_store %arg18[%157, %c0_49], %156 {strides = array<i32>} : memref<64x32xf32, #tpu.memory_space<vmem>>, vector<8x16xf32>,
    %159 = vector.extract_strided_slice %155 {offsets = [0, 16], sizes = [8, 16], strides = [1, 1]} : vector<8x32xf32> to vector<8x16xf32>
    %160 = arith.index_cast %131 : i32 to index
    %c16_50 = arith.constant 16 : index
    %161 = vector.load %arg18[%160, %c16_50] : memref<64x32xf32, #tpu.memory_space<vmem>>, vector<8x16xf32>
    tpu.vector_store %arg18[%160, %c16_50], %159 {strides = array<i32>} : memref<64x32xf32, #tpu.memory_space<vmem>>, vector<8x16xf32>,
    %c3_i32 = arith.constant 3 : i32
    %c8_i32_51 = arith.constant 8 : i32
    %162 = arith.muli %c3_i32, %c8_i32_51 : i32
    %163 = tpu.assume_multiple %162, 8 : i32
    %c7_i32_52 = arith.constant 7 : i32
    %164 = arith.subi %c7_i32_52, %c3_i32 : i32
    %c8_i32_53 = arith.constant 8 : i32
    %165 = arith.muli %164, %c8_i32_53 : i32
    %166 = tpu.assume_multiple %165, 8 : i32
    %167 = arith.index_cast %163 : i32 to index
    %c0_54 = arith.constant 0 : index
    %168 = vector.load %arg17[%167, %c0_54] : memref<64x128xf32, #tpu.memory_space<vmem>>, vector<8x128xf32>
    %169 = arith.index_cast %166 : i32 to index
    %c0_55 = arith.constant 0 : index
    %170 = vector.load %arg17[%169, %c0_55] : memref<64x128xf32, #tpu.memory_space<vmem>>, vector<8x128xf32>
    %171 = vector.shape_cast %42 : vector<1x128xi1> to vector<1x128xi1>
    %172 = vector.broadcast %171 : vector<1x128xi1> to vector<8x128xi1>
    %173 = arith.select %172, %168, %170 : vector<8x128xi1>, vector<8x128xf32>
    %cst_56 = arith.constant dense<0.000000e+00> : vector<8x128xf32>
    %174 = tpu.matmul %155, %50, %cst_56 {dimension_numbers = #tpu.dot_dimension_numbers<[1], [0], [0], [1], [0, 0, 1, 1], [], []>} : vector<8x32xf32>, vector<32x128xf32>, vector<8x128xf32> -> vector<8x128xf32>
    %175 = arith.addf %173, %174 : vector<8x128xf32>
    %176 = arith.negf %175 : vector<8x128xf32>
    %177 = math.exp %176 : vector<8x128xf32>
    %cst_57 = arith.constant 1.000000e+00 : f32
    %178 = vector.broadcast %cst_57 : f32 to vector<8x128xf32>
    %179 = arith.addf %178, %177 : vector<8x128xf32>
    %180 = arith.divf %178, %179 : vector<8x128xf32>
    %181 = math.tanh %175 : vector<8x128xf32>
    %182 = vector.extract_strided_slice %180 {offsets = [0, 32], sizes = [8, 32], strides = [1, 1]} : vector<8x128xf32> to vector<8x32xf32>
    %183 = arith.mulf %182, %152 : vector<8x32xf32>
    %184 = vector.extract_strided_slice %180 {offsets = [0, 0], sizes = [8, 32], strides = [1, 1]} : vector<8x128xf32> to vector<8x32xf32>
    %185 = vector.extract_strided_slice %181 {offsets = [0, 64], sizes = [8, 32], strides = [1, 1]} : vector<8x128xf32> to vector<8x32xf32>
    %186 = arith.mulf %184, %185 : vector<8x32xf32>
    %187 = arith.addf %183, %186 : vector<8x32xf32>
    %188 = vector.extract_strided_slice %180 {offsets = [0, 96], sizes = [8, 32], strides = [1, 1]} : vector<8x128xf32> to vector<8x32xf32>
    %189 = math.tanh %187 : vector<8x32xf32>
    %190 = arith.mulf %188, %189 : vector<8x32xf32>
    %191 = vector.extract_strided_slice %190 {offsets = [0, 0], sizes = [8, 16], strides = [1, 1]} : vector<8x32xf32> to vector<8x16xf32>
    %192 = arith.index_cast %163 : i32 to index
    %c0_58 = arith.constant 0 : index
    %193 = vector.load %arg18[%192, %c0_58] : memref<64x32xf32, #tpu.memory_space<vmem>>, vector<8x16xf32>
    tpu.vector_store %arg18[%192, %c0_58], %191 {strides = array<i32>} : memref<64x32xf32, #tpu.memory_space<vmem>>, vector<8x16xf32>,
    %194 = vector.extract_strided_slice %190 {offsets = [0, 16], sizes = [8, 16], strides = [1, 1]} : vector<8x32xf32> to vector<8x16xf32>
    %195 = arith.index_cast %166 : i32 to index
    %c16_59 = arith.constant 16 : index
    %196 = vector.load %arg18[%195, %c16_59] : memref<64x32xf32, #tpu.memory_space<vmem>>, vector<8x16xf32>
    tpu.vector_store %arg18[%195, %c16_59], %194 {strides = array<i32>} : memref<64x32xf32, #tpu.memory_space<vmem>>, vector<8x16xf32>,
    %c4_i32 = arith.constant 4 : i32
    %c8_i32_60 = arith.constant 8 : i32
    %197 = arith.muli %c4_i32, %c8_i32_60 : i32
    %198 = tpu.assume_multiple %197, 8 : i32
    %c7_i32_61 = arith.constant 7 : i32
    %199 = arith.subi %c7_i32_61, %c4_i32 : i32
    %c8_i32_62 = arith.constant 8 : i32
    %200 = arith.muli %199, %c8_i32_62 : i32
    %201 = tpu.assume_multiple %200, 8 : i32
    %202 = arith.index_cast %198 : i32 to index
    %c0_63 = arith.constant 0 : index
    %203 = vector.load %arg17[%202, %c0_63] : memref<64x128xf32, #tpu.memory_space<vmem>>, vector<8x128xf32>
    %204 = arith.index_cast %201 : i32 to index
    %c0_64 = arith.constant 0 : index
    %205 = vector.load %arg17[%204, %c0_64] : memref<64x128xf32, #tpu.memory_space<vmem>>, vector<8x128xf32>
    %206 = vector.shape_cast %42 : vector<1x128xi1> to vector<1x128xi1>
    %207 = vector.broadcast %206 : vector<1x128xi1> to vector<8x128xi1>
    %208 = arith.select %207, %203, %205 : vector<8x128xi1>, vector<8x128xf32>
    %cst_65 = arith.constant dense<0.000000e+00> : vector<8x128xf32>
    %209 = tpu.matmul %190, %50, %cst_65 {dimension_numbers = #tpu.dot_dimension_numbers<[1], [0], [0], [1], [0, 0, 1, 1], [], []>} : vector<8x32xf32>, vector<32x128xf32>, vector<8x128xf32> -> vector<8x128xf32>
    %210 = arith.addf %208, %209 : vector<8x128xf32>
    %211 = arith.negf %210 : vector<8x128xf32>
    %212 = math.exp %211 : vector<8x128xf32>
    %cst_66 = arith.constant 1.000000e+00 : f32
    %213 = vector.broadcast %cst_66 : f32 to vector<8x128xf32>
    %214 = arith.addf %213, %212 : vector<8x128xf32>
    %215 = arith.divf %213, %214 : vector<8x128xf32>
    %216 = math.tanh %210 : vector<8x128xf32>
    %217 = vector.extract_strided_slice %215 {offsets = [0, 32], sizes = [8, 32], strides = [1, 1]} : vector<8x128xf32> to vector<8x32xf32>
    %218 = arith.mulf %217, %187 : vector<8x32xf32>
    %219 = vector.extract_strided_slice %215 {offsets = [0, 0], sizes = [8, 32], strides = [1, 1]} : vector<8x128xf32> to vector<8x32xf32>
    %220 = vector.extract_strided_slice %216 {offsets = [0, 64], sizes = [8, 32], strides = [1, 1]} : vector<8x128xf32> to vector<8x32xf32>
    %221 = arith.mulf %219, %220 : vector<8x32xf32>
    %222 = arith.addf %218, %221 : vector<8x32xf32>
    %223 = vector.extract_strided_slice %215 {offsets = [0, 96], sizes = [8, 32], strides = [1, 1]} : vector<8x128xf32> to vector<8x32xf32>
    %224 = math.tanh %222 : vector<8x32xf32>
    %225 = arith.mulf %223, %224 : vector<8x32xf32>
    %226 = vector.extract_strided_slice %225 {offsets = [0, 0], sizes = [8, 16], strides = [1, 1]} : vector<8x32xf32> to vector<8x16xf32>
    %227 = arith.index_cast %198 : i32 to index
    %c0_67 = arith.constant 0 : index
    %228 = vector.load %arg18[%227, %c0_67] : memref<64x32xf32, #tpu.memory_space<vmem>>, vector<8x16xf32>
    tpu.vector_store %arg18[%227, %c0_67], %226 {strides = array<i32>} : memref<64x32xf32, #tpu.memory_space<vmem>>, vector<8x16xf32>,
    %229 = vector.extract_strided_slice %225 {offsets = [0, 16], sizes = [8, 16], strides = [1, 1]} : vector<8x32xf32> to vector<8x16xf32>
    %230 = arith.index_cast %201 : i32 to index
    %c16_68 = arith.constant 16 : index
    %231 = vector.load %arg18[%230, %c16_68] : memref<64x32xf32, #tpu.memory_space<vmem>>, vector<8x16xf32>
    tpu.vector_store %arg18[%230, %c16_68], %229 {strides = array<i32>} : memref<64x32xf32, #tpu.memory_space<vmem>>, vector<8x16xf32>,
    %c5_i32 = arith.constant 5 : i32
    %c8_i32_69 = arith.constant 8 : i32
    %232 = arith.muli %c5_i32, %c8_i32_69 : i32
    %233 = tpu.assume_multiple %232, 8 : i32
    %c7_i32_70 = arith.constant 7 : i32
    %234 = arith.subi %c7_i32_70, %c5_i32 : i32
    %c8_i32_71 = arith.constant 8 : i32
    %235 = arith.muli %234, %c8_i32_71 : i32
    %236 = tpu.assume_multiple %235, 8 : i32
    %237 = arith.index_cast %233 : i32 to index
    %c0_72 = arith.constant 0 : index
    %238 = vector.load %arg17[%237, %c0_72] : memref<64x128xf32, #tpu.memory_space<vmem>>, vector<8x128xf32>
    %239 = arith.index_cast %236 : i32 to index
    %c0_73 = arith.constant 0 : index
    %240 = vector.load %arg17[%239, %c0_73] : memref<64x128xf32, #tpu.memory_space<vmem>>, vector<8x128xf32>
    %241 = vector.shape_cast %42 : vector<1x128xi1> to vector<1x128xi1>
    %242 = vector.broadcast %241 : vector<1x128xi1> to vector<8x128xi1>
    %243 = arith.select %242, %238, %240 : vector<8x128xi1>, vector<8x128xf32>
    %cst_74 = arith.constant dense<0.000000e+00> : vector<8x128xf32>
    %244 = tpu.matmul %225, %50, %cst_74 {dimension_numbers = #tpu.dot_dimension_numbers<[1], [0], [0], [1], [0, 0, 1, 1], [], []>} : vector<8x32xf32>, vector<32x128xf32>, vector<8x128xf32> -> vector<8x128xf32>
    %245 = arith.addf %243, %244 : vector<8x128xf32>
    %246 = arith.negf %245 : vector<8x128xf32>
    %247 = math.exp %246 : vector<8x128xf32>
    %cst_75 = arith.constant 1.000000e+00 : f32
    %248 = vector.broadcast %cst_75 : f32 to vector<8x128xf32>
    %249 = arith.addf %248, %247 : vector<8x128xf32>
    %250 = arith.divf %248, %249 : vector<8x128xf32>
    %251 = math.tanh %245 : vector<8x128xf32>
    %252 = vector.extract_strided_slice %250 {offsets = [0, 32], sizes = [8, 32], strides = [1, 1]} : vector<8x128xf32> to vector<8x32xf32>
    %253 = arith.mulf %252, %222 : vector<8x32xf32>
    %254 = vector.extract_strided_slice %250 {offsets = [0, 0], sizes = [8, 32], strides = [1, 1]} : vector<8x128xf32> to vector<8x32xf32>
    %255 = vector.extract_strided_slice %251 {offsets = [0, 64], sizes = [8, 32], strides = [1, 1]} : vector<8x128xf32> to vector<8x32xf32>
    %256 = arith.mulf %254, %255 : vector<8x32xf32>
    %257 = arith.addf %253, %256 : vector<8x32xf32>
    %258 = vector.extract_strided_slice %250 {offsets = [0, 96], sizes = [8, 32], strides = [1, 1]} : vector<8x128xf32> to vector<8x32xf32>
    %259 = math.tanh %257 : vector<8x32xf32>
    %260 = arith.mulf %258, %259 : vector<8x32xf32>
    %261 = vector.extract_strided_slice %260 {offsets = [0, 0], sizes = [8, 16], strides = [1, 1]} : vector<8x32xf32> to vector<8x16xf32>
    %262 = arith.index_cast %233 : i32 to index
    %c0_76 = arith.constant 0 : index
    %263 = vector.load %arg18[%262, %c0_76] : memref<64x32xf32, #tpu.memory_space<vmem>>, vector<8x16xf32>
    tpu.vector_store %arg18[%262, %c0_76], %261 {strides = array<i32>} : memref<64x32xf32, #tpu.memory_space<vmem>>, vector<8x16xf32>,
    %264 = vector.extract_strided_slice %260 {offsets = [0, 16], sizes = [8, 16], strides = [1, 1]} : vector<8x32xf32> to vector<8x16xf32>
    %265 = arith.index_cast %236 : i32 to index
    %c16_77 = arith.constant 16 : index
    %266 = vector.load %arg18[%265, %c16_77] : memref<64x32xf32, #tpu.memory_space<vmem>>, vector<8x16xf32>
    tpu.vector_store %arg18[%265, %c16_77], %264 {strides = array<i32>} : memref<64x32xf32, #tpu.memory_space<vmem>>, vector<8x16xf32>,
    %c6_i32 = arith.constant 6 : i32
    %c8_i32_78 = arith.constant 8 : i32
    %267 = arith.muli %c6_i32, %c8_i32_78 : i32
    %268 = tpu.assume_multiple %267, 8 : i32
    %c7_i32_79 = arith.constant 7 : i32
    %269 = arith.subi %c7_i32_79, %c6_i32 : i32
    %c8_i32_80 = arith.constant 8 : i32
    %270 = arith.muli %269, %c8_i32_80 : i32
    %271 = tpu.assume_multiple %270, 8 : i32
    %272 = arith.index_cast %268 : i32 to index
    %c0_81 = arith.constant 0 : index
    %273 = vector.load %arg17[%272, %c0_81] : memref<64x128xf32, #tpu.memory_space<vmem>>, vector<8x128xf32>
    %274 = arith.index_cast %271 : i32 to index
    %c0_82 = arith.constant 0 : index
    %275 = vector.load %arg17[%274, %c0_82] : memref<64x128xf32, #tpu.memory_space<vmem>>, vector<8x128xf32>
    %276 = vector.shape_cast %42 : vector<1x128xi1> to vector<1x128xi1>
    %277 = vector.broadcast %276 : vector<1x128xi1> to vector<8x128xi1>
    %278 = arith.select %277, %273, %275 : vector<8x128xi1>, vector<8x128xf32>
    %cst_83 = arith.constant dense<0.000000e+00> : vector<8x128xf32>
    %279 = tpu.matmul %260, %50, %cst_83 {dimension_numbers = #tpu.dot_dimension_numbers<[1], [0], [0], [1], [0, 0, 1, 1], [], []>} : vector<8x32xf32>, vector<32x128xf32>, vector<8x128xf32> -> vector<8x128xf32>
    %280 = arith.addf %278, %279 : vector<8x128xf32>
    %281 = arith.negf %280 : vector<8x128xf32>
    %282 = math.exp %281 : vector<8x128xf32>
    %cst_84 = arith.constant 1.000000e+00 : f32
    %283 = vector.broadcast %cst_84 : f32 to vector<8x128xf32>
    %284 = arith.addf %283, %282 : vector<8x128xf32>
    %285 = arith.divf %283, %284 : vector<8x128xf32>
    %286 = math.tanh %280 : vector<8x128xf32>
    %287 = vector.extract_strided_slice %285 {offsets = [0, 32], sizes = [8, 32], strides = [1, 1]} : vector<8x128xf32> to vector<8x32xf32>
    %288 = arith.mulf %287, %257 : vector<8x32xf32>
    %289 = vector.extract_strided_slice %285 {offsets = [0, 0], sizes = [8, 32], strides = [1, 1]} : vector<8x128xf32> to vector<8x32xf32>
    %290 = vector.extract_strided_slice %286 {offsets = [0, 64], sizes = [8, 32], strides = [1, 1]} : vector<8x128xf32> to vector<8x32xf32>
    %291 = arith.mulf %289, %290 : vector<8x32xf32>
    %292 = arith.addf %288, %291 : vector<8x32xf32>
    %293 = vector.extract_strided_slice %285 {offsets = [0, 96], sizes = [8, 32], strides = [1, 1]} : vector<8x128xf32> to vector<8x32xf32>
    %294 = math.tanh %292 : vector<8x32xf32>
    %295 = arith.mulf %293, %294 : vector<8x32xf32>
    %296 = vector.extract_strided_slice %295 {offsets = [0, 0], sizes = [8, 16], strides = [1, 1]} : vector<8x32xf32> to vector<8x16xf32>
    %297 = arith.index_cast %268 : i32 to index
    %c0_85 = arith.constant 0 : index
    %298 = vector.load %arg18[%297, %c0_85] : memref<64x32xf32, #tpu.memory_space<vmem>>, vector<8x16xf32>
    tpu.vector_store %arg18[%297, %c0_85], %296 {strides = array<i32>} : memref<64x32xf32, #tpu.memory_space<vmem>>, vector<8x16xf32>,
    %299 = vector.extract_strided_slice %295 {offsets = [0, 16], sizes = [8, 16], strides = [1, 1]} : vector<8x32xf32> to vector<8x16xf32>
    %300 = arith.index_cast %271 : i32 to index
    %c16_86 = arith.constant 16 : index
    %301 = vector.load %arg18[%300, %c16_86] : memref<64x32xf32, #tpu.memory_space<vmem>>, vector<8x16xf32>
    tpu.vector_store %arg18[%300, %c16_86], %299 {strides = array<i32>} : memref<64x32xf32, #tpu.memory_space<vmem>>, vector<8x16xf32>,
    %c7_i32_87 = arith.constant 7 : i32
    %c8_i32_88 = arith.constant 8 : i32
    %302 = arith.muli %c7_i32_87, %c8_i32_88 : i32
    %303 = tpu.assume_multiple %302, 8 : i32
    %c7_i32_89 = arith.constant 7 : i32
    %304 = arith.subi %c7_i32_89, %c7_i32_87 : i32
    %c8_i32_90 = arith.constant 8 : i32
    %305 = arith.muli %304, %c8_i32_90 : i32
    %306 = tpu.assume_multiple %305, 8 : i32
    %307 = arith.index_cast %303 : i32 to index
    %c0_91 = arith.constant 0 : index
    %308 = vector.load %arg17[%307, %c0_91] : memref<64x128xf32, #tpu.memory_space<vmem>>, vector<8x128xf32>
    %309 = arith.index_cast %306 : i32 to index
    %c0_92 = arith.constant 0 : index
    %310 = vector.load %arg17[%309, %c0_92] : memref<64x128xf32, #tpu.memory_space<vmem>>, vector<8x128xf32>
    %311 = vector.shape_cast %42 : vector<1x128xi1> to vector<1x128xi1>
    %312 = vector.broadcast %311 : vector<1x128xi1> to vector<8x128xi1>
    %313 = arith.select %312, %308, %310 : vector<8x128xi1>, vector<8x128xf32>
    %cst_93 = arith.constant dense<0.000000e+00> : vector<8x128xf32>
    %314 = tpu.matmul %295, %50, %cst_93 {dimension_numbers = #tpu.dot_dimension_numbers<[1], [0], [0], [1], [0, 0, 1, 1], [], []>} : vector<8x32xf32>, vector<32x128xf32>, vector<8x128xf32> -> vector<8x128xf32>
    %315 = arith.addf %313, %314 : vector<8x128xf32>
    %316 = arith.negf %315 : vector<8x128xf32>
    %317 = math.exp %316 : vector<8x128xf32>
    %cst_94 = arith.constant 1.000000e+00 : f32
    %318 = vector.broadcast %cst_94 : f32 to vector<8x128xf32>
    %319 = arith.addf %318, %317 : vector<8x128xf32>
    %320 = arith.divf %318, %319 : vector<8x128xf32>
    %321 = math.tanh %315 : vector<8x128xf32>
    %322 = vector.extract_strided_slice %320 {offsets = [0, 32], sizes = [8, 32], strides = [1, 1]} : vector<8x128xf32> to vector<8x32xf32>
    %323 = arith.mulf %322, %292 : vector<8x32xf32>
    %324 = vector.extract_strided_slice %320 {offsets = [0, 0], sizes = [8, 32], strides = [1, 1]} : vector<8x128xf32> to vector<8x32xf32>
    %325 = vector.extract_strided_slice %321 {offsets = [0, 64], sizes = [8, 32], strides = [1, 1]} : vector<8x128xf32> to vector<8x32xf32>
    %326 = arith.mulf %324, %325 : vector<8x32xf32>
    %327 = arith.addf %323, %326 : vector<8x32xf32>
    %328 = vector.extract_strided_slice %320 {offsets = [0, 96], sizes = [8, 32], strides = [1, 1]} : vector<8x128xf32> to vector<8x32xf32>
    %329 = math.tanh %327 : vector<8x32xf32>
    %330 = arith.mulf %328, %329 : vector<8x32xf32>
    %331 = vector.extract_strided_slice %330 {offsets = [0, 0], sizes = [8, 16], strides = [1, 1]} : vector<8x32xf32> to vector<8x16xf32>
    %332 = arith.index_cast %303 : i32 to index
    %c0_95 = arith.constant 0 : index
    %333 = vector.load %arg18[%332, %c0_95] : memref<64x32xf32, #tpu.memory_space<vmem>>, vector<8x16xf32>
    tpu.vector_store %arg18[%332, %c0_95], %331 {strides = array<i32>} : memref<64x32xf32, #tpu.memory_space<vmem>>, vector<8x16xf32>,
    %334 = vector.extract_strided_slice %330 {offsets = [0, 16], sizes = [8, 16], strides = [1, 1]} : vector<8x32xf32> to vector<8x16xf32>
    %335 = arith.index_cast %306 : i32 to index
    %c16_96 = arith.constant 16 : index
    %336 = vector.load %arg18[%335, %c16_96] : memref<64x32xf32, #tpu.memory_space<vmem>>, vector<8x16xf32>
    tpu.vector_store %arg18[%335, %c16_96], %334 {strides = array<i32>} : memref<64x32xf32, #tpu.memory_space<vmem>>, vector<8x16xf32>,
    %c8_i32_97 = arith.constant 8 : i32
    %c0_98 = arith.constant 0 : index
    %c0_99 = arith.constant 0 : index
    %337 = vector.load %arg18[%c0_98, %c0_99] : memref<64x32xf32, #tpu.memory_space<vmem>>, vector<64x32xf32>
    %338 = arith.truncf %337 : vector<64x32xf32> to vector<64x32xbf16>
    %c0_100 = arith.constant 0 : index
    %c0_101 = arith.constant 0 : index
    %339 = vector.load %arg9[%c0_100, %c0_101] : memref<32x128xbf16, #tpu.memory_space<vmem>>, vector<32x128xbf16>
    %cst_102 = arith.constant dense<0.000000e+00> : vector<64x128xf32>
    %340 = tpu.matmul %338, %339, %cst_102 {dimension_numbers = #tpu.dot_dimension_numbers<[1], [0], [0], [1], [0, 0, 1, 1], [], []>} : vector<64x32xbf16>, vector<32x128xbf16>, vector<64x128xf32> -> vector<64x128xf32>
    %c0_103 = arith.constant 0 : index
    %c0_104 = arith.constant 0 : index
    %341 = vector.load %arg11[%c0_103, %c0_104] : memref<1x128xf32, #tpu.memory_space<vmem>>, vector<1x128xf32>
    %342 = vector.broadcast %341 : vector<1x128xf32> to vector<64x128xf32>
    %343 = arith.addf %340, %342 : vector<64x128xf32>
    %c0_105 = arith.constant 0 : index
    %c0_106 = arith.constant 0 : index
    %344 = vector.load %arg17[%c0_105, %c0_106] : memref<64x128xf32, #tpu.memory_space<vmem>>, vector<64x128xf32>
    tpu.vector_store %arg17[%c0_105, %c0_106], %343 {strides = array<i32>} : memref<64x128xf32, #tpu.memory_space<vmem>>, vector<64x128xf32>,
    %c0_107 = arith.constant 0 : index
    %c0_108 = arith.constant 0 : index
    %345 = vector.load %arg10[%c0_107, %c0_108] : memref<32x128xf32, #tpu.memory_space<vmem>>, vector<32x128xf32>
    %c0_109 = arith.constant 0 : index
    %c0_110 = arith.constant 0 : index
    %346 = vector.load %arg12[%c0_109, %c0_110] : memref<2x32xf32, #tpu.memory_space<vmem>>, vector<1x32xf32>
    %347 = vector.shape_cast %346 : vector<1x32xf32> to vector<1x32xf32>
    %348 = vector.broadcast %347 : vector<1x32xf32> to vector<8x32xf32>
    %c1_111 = arith.constant 1 : index
    %c0_112 = arith.constant 0 : index
    %349 = vector.load %arg12[%c1_111, %c0_112] : memref<2x32xf32, #tpu.memory_space<vmem>>, vector<1x32xf32>
    %350 = vector.shape_cast %349 : vector<1x32xf32> to vector<1x32xf32>
    %351 = vector.broadcast %350 : vector<1x32xf32> to vector<8x32xf32>
    %c0_i32_113 = arith.constant 0 : i32
    %c8_i32_114 = arith.constant 8 : i32
    %352 = arith.muli %c0_i32_113, %c8_i32_114 : i32
    %353 = tpu.assume_multiple %352, 8 : i32
    %c7_i32_115 = arith.constant 7 : i32
    %354 = arith.subi %c7_i32_115, %c0_i32_113 : i32
    %c8_i32_116 = arith.constant 8 : i32
    %355 = arith.muli %354, %c8_i32_116 : i32
    %356 = tpu.assume_multiple %355, 8 : i32
    %357 = arith.index_cast %353 : i32 to index
    %c0_117 = arith.constant 0 : index
    %358 = vector.load %arg17[%357, %c0_117] : memref<64x128xf32, #tpu.memory_space<vmem>>, vector<8x128xf32>
    %359 = arith.index_cast %356 : i32 to index
    %c0_118 = arith.constant 0 : index
    %360 = vector.load %arg17[%359, %c0_118] : memref<64x128xf32, #tpu.memory_space<vmem>>, vector<8x128xf32>
    %361 = vector.shape_cast %42 : vector<1x128xi1> to vector<1x128xi1>
    %362 = vector.broadcast %361 : vector<1x128xi1> to vector<8x128xi1>
    %363 = arith.select %362, %358, %360 : vector<8x128xi1>, vector<8x128xf32>
    %cst_119 = arith.constant dense<0.000000e+00> : vector<8x128xf32>
    %364 = tpu.matmul %348, %345, %cst_119 {dimension_numbers = #tpu.dot_dimension_numbers<[1], [0], [0], [1], [0, 0, 1, 1], [], []>} : vector<8x32xf32>, vector<32x128xf32>, vector<8x128xf32> -> vector<8x128xf32>
    %365 = arith.addf %363, %364 : vector<8x128xf32>
    %366 = arith.negf %365 : vector<8x128xf32>
    %367 = math.exp %366 : vector<8x128xf32>
    %cst_120 = arith.constant 1.000000e+00 : f32
    %368 = vector.broadcast %cst_120 : f32 to vector<8x128xf32>
    %369 = arith.addf %368, %367 : vector<8x128xf32>
    %370 = arith.divf %368, %369 : vector<8x128xf32>
    %371 = math.tanh %365 : vector<8x128xf32>
    %372 = vector.extract_strided_slice %370 {offsets = [0, 32], sizes = [8, 32], strides = [1, 1]} : vector<8x128xf32> to vector<8x32xf32>
    %373 = arith.mulf %372, %351 : vector<8x32xf32>
    %374 = vector.extract_strided_slice %370 {offsets = [0, 0], sizes = [8, 32], strides = [1, 1]} : vector<8x128xf32> to vector<8x32xf32>
    %375 = vector.extract_strided_slice %371 {offsets = [0, 64], sizes = [8, 32], strides = [1, 1]} : vector<8x128xf32> to vector<8x32xf32>
    %376 = arith.mulf %374, %375 : vector<8x32xf32>
    %377 = arith.addf %373, %376 : vector<8x32xf32>
    %378 = vector.extract_strided_slice %370 {offsets = [0, 96], sizes = [8, 32], strides = [1, 1]} : vector<8x128xf32> to vector<8x32xf32>
    %379 = math.tanh %377 : vector<8x32xf32>
    %380 = arith.mulf %378, %379 : vector<8x32xf32>
    %381 = vector.extract_strided_slice %380 {offsets = [0, 0], sizes = [8, 16], strides = [1, 1]} : vector<8x32xf32> to vector<8x16xf32>
    %382 = arith.index_cast %353 : i32 to index
    %c0_121 = arith.constant 0 : index
    %383 = vector.load %arg18[%382, %c0_121] : memref<64x32xf32, #tpu.memory_space<vmem>>, vector<8x16xf32>
    tpu.vector_store %arg18[%382, %c0_121], %381 {strides = array<i32>} : memref<64x32xf32, #tpu.memory_space<vmem>>, vector<8x16xf32>,
    %384 = vector.extract_strided_slice %380 {offsets = [0, 16], sizes = [8, 16], strides = [1, 1]} : vector<8x32xf32> to vector<8x16xf32>
    %385 = arith.index_cast %356 : i32 to index
    %c16_122 = arith.constant 16 : index
    %386 = vector.load %arg18[%385, %c16_122] : memref<64x32xf32, #tpu.memory_space<vmem>>, vector<8x16xf32>
    tpu.vector_store %arg18[%385, %c16_122], %384 {strides = array<i32>} : memref<64x32xf32, #tpu.memory_space<vmem>>, vector<8x16xf32>,
    %c1_i32_123 = arith.constant 1 : i32
    %c8_i32_124 = arith.constant 8 : i32
    %387 = arith.muli %c1_i32_123, %c8_i32_124 : i32
    %388 = tpu.assume_multiple %387, 8 : i32
    %c7_i32_125 = arith.constant 7 : i32
    %389 = arith.subi %c7_i32_125, %c1_i32_123 : i32
    %c8_i32_126 = arith.constant 8 : i32
    %390 = arith.muli %389, %c8_i32_126 : i32
    %391 = tpu.assume_multiple %390, 8 : i32
    %392 = arith.index_cast %388 : i32 to index
    %c0_127 = arith.constant 0 : index
    %393 = vector.load %arg17[%392, %c0_127] : memref<64x128xf32, #tpu.memory_space<vmem>>, vector<8x128xf32>
    %394 = arith.index_cast %391 : i32 to index
    %c0_128 = arith.constant 0 : index
    %395 = vector.load %arg17[%394, %c0_128] : memref<64x128xf32, #tpu.memory_space<vmem>>, vector<8x128xf32>
    %396 = vector.shape_cast %42 : vector<1x128xi1> to vector<1x128xi1>
    %397 = vector.broadcast %396 : vector<1x128xi1> to vector<8x128xi1>
    %398 = arith.select %397, %393, %395 : vector<8x128xi1>, vector<8x128xf32>
    %cst_129 = arith.constant dense<0.000000e+00> : vector<8x128xf32>
    %399 = tpu.matmul %380, %345, %cst_129 {dimension_numbers = #tpu.dot_dimension_numbers<[1], [0], [0], [1], [0, 0, 1, 1], [], []>} : vector<8x32xf32>, vector<32x128xf32>, vector<8x128xf32> -> vector<8x128xf32>
    %400 = arith.addf %398, %399 : vector<8x128xf32>
    %401 = arith.negf %400 : vector<8x128xf32>
    %402 = math.exp %401 : vector<8x128xf32>
    %cst_130 = arith.constant 1.000000e+00 : f32
    %403 = vector.broadcast %cst_130 : f32 to vector<8x128xf32>
    %404 = arith.addf %403, %402 : vector<8x128xf32>
    %405 = arith.divf %403, %404 : vector<8x128xf32>
    %406 = math.tanh %400 : vector<8x128xf32>
    %407 = vector.extract_strided_slice %405 {offsets = [0, 32], sizes = [8, 32], strides = [1, 1]} : vector<8x128xf32> to vector<8x32xf32>
    %408 = arith.mulf %407, %377 : vector<8x32xf32>
    %409 = vector.extract_strided_slice %405 {offsets = [0, 0], sizes = [8, 32], strides = [1, 1]} : vector<8x128xf32> to vector<8x32xf32>
    %410 = vector.extract_strided_slice %406 {offsets = [0, 64], sizes = [8, 32], strides = [1, 1]} : vector<8x128xf32> to vector<8x32xf32>
    %411 = arith.mulf %409, %410 : vector<8x32xf32>
    %412 = arith.addf %408, %411 : vector<8x32xf32>
    %413 = vector.extract_strided_slice %405 {offsets = [0, 96], sizes = [8, 32], strides = [1, 1]} : vector<8x128xf32> to vector<8x32xf32>
    %414 = math.tanh %412 : vector<8x32xf32>
    %415 = arith.mulf %413, %414 : vector<8x32xf32>
    %416 = vector.extract_strided_slice %415 {offsets = [0, 0], sizes = [8, 16], strides = [1, 1]} : vector<8x32xf32> to vector<8x16xf32>
    %417 = arith.index_cast %388 : i32 to index
    %c0_131 = arith.constant 0 : index
    %418 = vector.load %arg18[%417, %c0_131] : memref<64x32xf32, #tpu.memory_space<vmem>>, vector<8x16xf32>
    tpu.vector_store %arg18[%417, %c0_131], %416 {strides = array<i32>} : memref<64x32xf32, #tpu.memory_space<vmem>>, vector<8x16xf32>,
    %419 = vector.extract_strided_slice %415 {offsets = [0, 16], sizes = [8, 16], strides = [1, 1]} : vector<8x32xf32> to vector<8x16xf32>
    %420 = arith.index_cast %391 : i32 to index
    %c16_132 = arith.constant 16 : index
    %421 = vector.load %arg18[%420, %c16_132] : memref<64x32xf32, #tpu.memory_space<vmem>>, vector<8x16xf32>
    tpu.vector_store %arg18[%420, %c16_132], %419 {strides = array<i32>} : memref<64x32xf32, #tpu.memory_space<vmem>>, vector<8x16xf32>,
    %c2_i32_133 = arith.constant 2 : i32
    %c8_i32_134 = arith.constant 8 : i32
    %422 = arith.muli %c2_i32_133, %c8_i32_134 : i32
    %423 = tpu.assume_multiple %422, 8 : i32
    %c7_i32_135 = arith.constant 7 : i32
    %424 = arith.subi %c7_i32_135, %c2_i32_133 : i32
    %c8_i32_136 = arith.constant 8 : i32
    %425 = arith.muli %424, %c8_i32_136 : i32
    %426 = tpu.assume_multiple %425, 8 : i32
    %427 = arith.index_cast %423 : i32 to index
    %c0_137 = arith.constant 0 : index
    %428 = vector.load %arg17[%427, %c0_137] : memref<64x128xf32, #tpu.memory_space<vmem>>, vector<8x128xf32>
    %429 = arith.index_cast %426 : i32 to index
    %c0_138 = arith.constant 0 : index
    %430 = vector.load %arg17[%429, %c0_138] : memref<64x128xf32, #tpu.memory_space<vmem>>, vector<8x128xf32>
    %431 = vector.shape_cast %42 : vector<1x128xi1> to vector<1x128xi1>
    %432 = vector.broadcast %431 : vector<1x128xi1> to vector<8x128xi1>
    %433 = arith.select %432, %428, %430 : vector<8x128xi1>, vector<8x128xf32>
    %cst_139 = arith.constant dense<0.000000e+00> : vector<8x128xf32>
    %434 = tpu.matmul %415, %345, %cst_139 {dimension_numbers = #tpu.dot_dimension_numbers<[1], [0], [0], [1], [0, 0, 1, 1], [], []>} : vector<8x32xf32>, vector<32x128xf32>, vector<8x128xf32> -> vector<8x128xf32>
    %435 = arith.addf %433, %434 : vector<8x128xf32>
    %436 = arith.negf %435 : vector<8x128xf32>
    %437 = math.exp %436 : vector<8x128xf32>
    %cst_140 = arith.constant 1.000000e+00 : f32
    %438 = vector.broadcast %cst_140 : f32 to vector<8x128xf32>
    %439 = arith.addf %438, %437 : vector<8x128xf32>
    %440 = arith.divf %438, %439 : vector<8x128xf32>
    %441 = math.tanh %435 : vector<8x128xf32>
    %442 = vector.extract_strided_slice %440 {offsets = [0, 32], sizes = [8, 32], strides = [1, 1]} : vector<8x128xf32> to vector<8x32xf32>
    %443 = arith.mulf %442, %412 : vector<8x32xf32>
    %444 = vector.extract_strided_slice %440 {offsets = [0, 0], sizes = [8, 32], strides = [1, 1]} : vector<8x128xf32> to vector<8x32xf32>
    %445 = vector.extract_strided_slice %441 {offsets = [0, 64], sizes = [8, 32], strides = [1, 1]} : vector<8x128xf32> to vector<8x32xf32>
    %446 = arith.mulf %444, %445 : vector<8x32xf32>
    %447 = arith.addf %443, %446 : vector<8x32xf32>
    %448 = vector.extract_strided_slice %440 {offsets = [0, 96], sizes = [8, 32], strides = [1, 1]} : vector<8x128xf32> to vector<8x32xf32>
    %449 = math.tanh %447 : vector<8x32xf32>
    %450 = arith.mulf %448, %449 : vector<8x32xf32>
    %451 = vector.extract_strided_slice %450 {offsets = [0, 0], sizes = [8, 16], strides = [1, 1]} : vector<8x32xf32> to vector<8x16xf32>
    %452 = arith.index_cast %423 : i32 to index
    %c0_141 = arith.constant 0 : index
    %453 = vector.load %arg18[%452, %c0_141] : memref<64x32xf32, #tpu.memory_space<vmem>>, vector<8x16xf32>
    tpu.vector_store %arg18[%452, %c0_141], %451 {strides = array<i32>} : memref<64x32xf32, #tpu.memory_space<vmem>>, vector<8x16xf32>,
    %454 = vector.extract_strided_slice %450 {offsets = [0, 16], sizes = [8, 16], strides = [1, 1]} : vector<8x32xf32> to vector<8x16xf32>
    %455 = arith.index_cast %426 : i32 to index
    %c16_142 = arith.constant 16 : index
    %456 = vector.load %arg18[%455, %c16_142] : memref<64x32xf32, #tpu.memory_space<vmem>>, vector<8x16xf32>
    tpu.vector_store %arg18[%455, %c16_142], %454 {strides = array<i32>} : memref<64x32xf32, #tpu.memory_space<vmem>>, vector<8x16xf32>,
    %c3_i32_143 = arith.constant 3 : i32
    %c8_i32_144 = arith.constant 8 : i32
    %457 = arith.muli %c3_i32_143, %c8_i32_144 : i32
    %458 = tpu.assume_multiple %457, 8 : i32
    %c7_i32_145 = arith.constant 7 : i32
    %459 = arith.subi %c7_i32_145, %c3_i32_143 : i32
    %c8_i32_146 = arith.constant 8 : i32
    %460 = arith.muli %459, %c8_i32_146 : i32
    %461 = tpu.assume_multiple %460, 8 : i32
    %462 = arith.index_cast %458 : i32 to index
    %c0_147 = arith.constant 0 : index
    %463 = vector.load %arg17[%462, %c0_147] : memref<64x128xf32, #tpu.memory_space<vmem>>, vector<8x128xf32>
    %464 = arith.index_cast %461 : i32 to index
    %c0_148 = arith.constant 0 : index
    %465 = vector.load %arg17[%464, %c0_148] : memref<64x128xf32, #tpu.memory_space<vmem>>, vector<8x128xf32>
    %466 = vector.shape_cast %42 : vector<1x128xi1> to vector<1x128xi1>
    %467 = vector.broadcast %466 : vector<1x128xi1> to vector<8x128xi1>
    %468 = arith.select %467, %463, %465 : vector<8x128xi1>, vector<8x128xf32>
    %cst_149 = arith.constant dense<0.000000e+00> : vector<8x128xf32>
    %469 = tpu.matmul %450, %345, %cst_149 {dimension_numbers = #tpu.dot_dimension_numbers<[1], [0], [0], [1], [0, 0, 1, 1], [], []>} : vector<8x32xf32>, vector<32x128xf32>, vector<8x128xf32> -> vector<8x128xf32>
    %470 = arith.addf %468, %469 : vector<8x128xf32>
    %471 = arith.negf %470 : vector<8x128xf32>
    %472 = math.exp %471 : vector<8x128xf32>
    %cst_150 = arith.constant 1.000000e+00 : f32
    %473 = vector.broadcast %cst_150 : f32 to vector<8x128xf32>
    %474 = arith.addf %473, %472 : vector<8x128xf32>
    %475 = arith.divf %473, %474 : vector<8x128xf32>
    %476 = math.tanh %470 : vector<8x128xf32>
    %477 = vector.extract_strided_slice %475 {offsets = [0, 32], sizes = [8, 32], strides = [1, 1]} : vector<8x128xf32> to vector<8x32xf32>
    %478 = arith.mulf %477, %447 : vector<8x32xf32>
    %479 = vector.extract_strided_slice %475 {offsets = [0, 0], sizes = [8, 32], strides = [1, 1]} : vector<8x128xf32> to vector<8x32xf32>
    %480 = vector.extract_strided_slice %476 {offsets = [0, 64], sizes = [8, 32], strides = [1, 1]} : vector<8x128xf32> to vector<8x32xf32>
    %481 = arith.mulf %479, %480 : vector<8x32xf32>
    %482 = arith.addf %478, %481 : vector<8x32xf32>
    %483 = vector.extract_strided_slice %475 {offsets = [0, 96], sizes = [8, 32], strides = [1, 1]} : vector<8x128xf32> to vector<8x32xf32>
    %484 = math.tanh %482 : vector<8x32xf32>
    %485 = arith.mulf %483, %484 : vector<8x32xf32>
    %486 = vector.extract_strided_slice %485 {offsets = [0, 0], sizes = [8, 16], strides = [1, 1]} : vector<8x32xf32> to vector<8x16xf32>
    %487 = arith.index_cast %458 : i32 to index
    %c0_151 = arith.constant 0 : index
    %488 = vector.load %arg18[%487, %c0_151] : memref<64x32xf32, #tpu.memory_space<vmem>>, vector<8x16xf32>
    tpu.vector_store %arg18[%487, %c0_151], %486 {strides = array<i32>} : memref<64x32xf32, #tpu.memory_space<vmem>>, vector<8x16xf32>,
    %489 = vector.extract_strided_slice %485 {offsets = [0, 16], sizes = [8, 16], strides = [1, 1]} : vector<8x32xf32> to vector<8x16xf32>
    %490 = arith.index_cast %461 : i32 to index
    %c16_152 = arith.constant 16 : index
    %491 = vector.load %arg18[%490, %c16_152] : memref<64x32xf32, #tpu.memory_space<vmem>>, vector<8x16xf32>
    tpu.vector_store %arg18[%490, %c16_152], %489 {strides = array<i32>} : memref<64x32xf32, #tpu.memory_space<vmem>>, vector<8x16xf32>,
    %c4_i32_153 = arith.constant 4 : i32
    %c8_i32_154 = arith.constant 8 : i32
    %492 = arith.muli %c4_i32_153, %c8_i32_154 : i32
    %493 = tpu.assume_multiple %492, 8 : i32
    %c7_i32_155 = arith.constant 7 : i32
    %494 = arith.subi %c7_i32_155, %c4_i32_153 : i32
    %c8_i32_156 = arith.constant 8 : i32
    %495 = arith.muli %494, %c8_i32_156 : i32
    %496 = tpu.assume_multiple %495, 8 : i32
    %497 = arith.index_cast %493 : i32 to index
    %c0_157 = arith.constant 0 : index
    %498 = vector.load %arg17[%497, %c0_157] : memref<64x128xf32, #tpu.memory_space<vmem>>, vector<8x128xf32>
    %499 = arith.index_cast %496 : i32 to index
    %c0_158 = arith.constant 0 : index
    %500 = vector.load %arg17[%499, %c0_158] : memref<64x128xf32, #tpu.memory_space<vmem>>, vector<8x128xf32>
    %501 = vector.shape_cast %42 : vector<1x128xi1> to vector<1x128xi1>
    %502 = vector.broadcast %501 : vector<1x128xi1> to vector<8x128xi1>
    %503 = arith.select %502, %498, %500 : vector<8x128xi1>, vector<8x128xf32>
    %cst_159 = arith.constant dense<0.000000e+00> : vector<8x128xf32>
    %504 = tpu.matmul %485, %345, %cst_159 {dimension_numbers = #tpu.dot_dimension_numbers<[1], [0], [0], [1], [0, 0, 1, 1], [], []>} : vector<8x32xf32>, vector<32x128xf32>, vector<8x128xf32> -> vector<8x128xf32>
    %505 = arith.addf %503, %504 : vector<8x128xf32>
    %506 = arith.negf %505 : vector<8x128xf32>
    %507 = math.exp %506 : vector<8x128xf32>
    %cst_160 = arith.constant 1.000000e+00 : f32
    %508 = vector.broadcast %cst_160 : f32 to vector<8x128xf32>
    %509 = arith.addf %508, %507 : vector<8x128xf32>
    %510 = arith.divf %508, %509 : vector<8x128xf32>
    %511 = math.tanh %505 : vector<8x128xf32>
    %512 = vector.extract_strided_slice %510 {offsets = [0, 32], sizes = [8, 32], strides = [1, 1]} : vector<8x128xf32> to vector<8x32xf32>
    %513 = arith.mulf %512, %482 : vector<8x32xf32>
    %514 = vector.extract_strided_slice %510 {offsets = [0, 0], sizes = [8, 32], strides = [1, 1]} : vector<8x128xf32> to vector<8x32xf32>
    %515 = vector.extract_strided_slice %511 {offsets = [0, 64], sizes = [8, 32], strides = [1, 1]} : vector<8x128xf32> to vector<8x32xf32>
    %516 = arith.mulf %514, %515 : vector<8x32xf32>
    %517 = arith.addf %513, %516 : vector<8x32xf32>
    %518 = vector.extract_strided_slice %510 {offsets = [0, 96], sizes = [8, 32], strides = [1, 1]} : vector<8x128xf32> to vector<8x32xf32>
    %519 = math.tanh %517 : vector<8x32xf32>
    %520 = arith.mulf %518, %519 : vector<8x32xf32>
    %521 = vector.extract_strided_slice %520 {offsets = [0, 0], sizes = [8, 16], strides = [1, 1]} : vector<8x32xf32> to vector<8x16xf32>
    %522 = arith.index_cast %493 : i32 to index
    %c0_161 = arith.constant 0 : index
    %523 = vector.load %arg18[%522, %c0_161] : memref<64x32xf32, #tpu.memory_space<vmem>>, vector<8x16xf32>
    tpu.vector_store %arg18[%522, %c0_161], %521 {strides = array<i32>} : memref<64x32xf32, #tpu.memory_space<vmem>>, vector<8x16xf32>,
    %524 = vector.extract_strided_slice %520 {offsets = [0, 16], sizes = [8, 16], strides = [1, 1]} : vector<8x32xf32> to vector<8x16xf32>
    %525 = arith.index_cast %496 : i32 to index
    %c16_162 = arith.constant 16 : index
    %526 = vector.load %arg18[%525, %c16_162] : memref<64x32xf32, #tpu.memory_space<vmem>>, vector<8x16xf32>
    tpu.vector_store %arg18[%525, %c16_162], %524 {strides = array<i32>} : memref<64x32xf32, #tpu.memory_space<vmem>>, vector<8x16xf32>,
    %c5_i32_163 = arith.constant 5 : i32
    %c8_i32_164 = arith.constant 8 : i32
    %527 = arith.muli %c5_i32_163, %c8_i32_164 : i32
    %528 = tpu.assume_multiple %527, 8 : i32
    %c7_i32_165 = arith.constant 7 : i32
    %529 = arith.subi %c7_i32_165, %c5_i32_163 : i32
    %c8_i32_166 = arith.constant 8 : i32
    %530 = arith.muli %529, %c8_i32_166 : i32
    %531 = tpu.assume_multiple %530, 8 : i32
    %532 = arith.index_cast %528 : i32 to index
    %c0_167 = arith.constant 0 : index
    %533 = vector.load %arg17[%532, %c0_167] : memref<64x128xf32, #tpu.memory_space<vmem>>, vector<8x128xf32>
    %534 = arith.index_cast %531 : i32 to index
    %c0_168 = arith.constant 0 : index
    %535 = vector.load %arg17[%534, %c0_168] : memref<64x128xf32, #tpu.memory_space<vmem>>, vector<8x128xf32>
    %536 = vector.shape_cast %42 : vector<1x128xi1> to vector<1x128xi1>
    %537 = vector.broadcast %536 : vector<1x128xi1> to vector<8x128xi1>
    %538 = arith.select %537, %533, %535 : vector<8x128xi1>, vector<8x128xf32>
    %cst_169 = arith.constant dense<0.000000e+00> : vector<8x128xf32>
    %539 = tpu.matmul %520, %345, %cst_169 {dimension_numbers = #tpu.dot_dimension_numbers<[1], [0], [0], [1], [0, 0, 1, 1], [], []>} : vector<8x32xf32>, vector<32x128xf32>, vector<8x128xf32> -> vector<8x128xf32>
    %540 = arith.addf %538, %539 : vector<8x128xf32>
    %541 = arith.negf %540 : vector<8x128xf32>
    %542 = math.exp %541 : vector<8x128xf32>
    %cst_170 = arith.constant 1.000000e+00 : f32
    %543 = vector.broadcast %cst_170 : f32 to vector<8x128xf32>
    %544 = arith.addf %543, %542 : vector<8x128xf32>
    %545 = arith.divf %543, %544 : vector<8x128xf32>
    %546 = math.tanh %540 : vector<8x128xf32>
    %547 = vector.extract_strided_slice %545 {offsets = [0, 32], sizes = [8, 32], strides = [1, 1]} : vector<8x128xf32> to vector<8x32xf32>
    %548 = arith.mulf %547, %517 : vector<8x32xf32>
    %549 = vector.extract_strided_slice %545 {offsets = [0, 0], sizes = [8, 32], strides = [1, 1]} : vector<8x128xf32> to vector<8x32xf32>
    %550 = vector.extract_strided_slice %546 {offsets = [0, 64], sizes = [8, 32], strides = [1, 1]} : vector<8x128xf32> to vector<8x32xf32>
    %551 = arith.mulf %549, %550 : vector<8x32xf32>
    %552 = arith.addf %548, %551 : vector<8x32xf32>
    %553 = vector.extract_strided_slice %545 {offsets = [0, 96], sizes = [8, 32], strides = [1, 1]} : vector<8x128xf32> to vector<8x32xf32>
    %554 = math.tanh %552 : vector<8x32xf32>
    %555 = arith.mulf %553, %554 : vector<8x32xf32>
    %556 = vector.extract_strided_slice %555 {offsets = [0, 0], sizes = [8, 16], strides = [1, 1]} : vector<8x32xf32> to vector<8x16xf32>
    %557 = arith.index_cast %528 : i32 to index
    %c0_171 = arith.constant 0 : index
    %558 = vector.load %arg18[%557, %c0_171] : memref<64x32xf32, #tpu.memory_space<vmem>>, vector<8x16xf32>
    tpu.vector_store %arg18[%557, %c0_171], %556 {strides = array<i32>} : memref<64x32xf32, #tpu.memory_space<vmem>>, vector<8x16xf32>,
    %559 = vector.extract_strided_slice %555 {offsets = [0, 16], sizes = [8, 16], strides = [1, 1]} : vector<8x32xf32> to vector<8x16xf32>
    %560 = arith.index_cast %531 : i32 to index
    %c16_172 = arith.constant 16 : index
    %561 = vector.load %arg18[%560, %c16_172] : memref<64x32xf32, #tpu.memory_space<vmem>>, vector<8x16xf32>
    tpu.vector_store %arg18[%560, %c16_172], %559 {strides = array<i32>} : memref<64x32xf32, #tpu.memory_space<vmem>>, vector<8x16xf32>,
    %c6_i32_173 = arith.constant 6 : i32
    %c8_i32_174 = arith.constant 8 : i32
    %562 = arith.muli %c6_i32_173, %c8_i32_174 : i32
    %563 = tpu.assume_multiple %562, 8 : i32
    %c7_i32_175 = arith.constant 7 : i32
    %564 = arith.subi %c7_i32_175, %c6_i32_173 : i32
    %c8_i32_176 = arith.constant 8 : i32
    %565 = arith.muli %564, %c8_i32_176 : i32
    %566 = tpu.assume_multiple %565, 8 : i32
    %567 = arith.index_cast %563 : i32 to index
    %c0_177 = arith.constant 0 : index
    %568 = vector.load %arg17[%567, %c0_177] : memref<64x128xf32, #tpu.memory_space<vmem>>, vector<8x128xf32>
    %569 = arith.index_cast %566 : i32 to index
    %c0_178 = arith.constant 0 : index
    %570 = vector.load %arg17[%569, %c0_178] : memref<64x128xf32, #tpu.memory_space<vmem>>, vector<8x128xf32>
    %571 = vector.shape_cast %42 : vector<1x128xi1> to vector<1x128xi1>
    %572 = vector.broadcast %571 : vector<1x128xi1> to vector<8x128xi1>
    %573 = arith.select %572, %568, %570 : vector<8x128xi1>, vector<8x128xf32>
    %cst_179 = arith.constant dense<0.000000e+00> : vector<8x128xf32>
    %574 = tpu.matmul %555, %345, %cst_179 {dimension_numbers = #tpu.dot_dimension_numbers<[1], [0], [0], [1], [0, 0, 1, 1], [], []>} : vector<8x32xf32>, vector<32x128xf32>, vector<8x128xf32> -> vector<8x128xf32>
    %575 = arith.addf %573, %574 : vector<8x128xf32>
    %576 = arith.negf %575 : vector<8x128xf32>
    %577 = math.exp %576 : vector<8x128xf32>
    %cst_180 = arith.constant 1.000000e+00 : f32
    %578 = vector.broadcast %cst_180 : f32 to vector<8x128xf32>
    %579 = arith.addf %578, %577 : vector<8x128xf32>
    %580 = arith.divf %578, %579 : vector<8x128xf32>
    %581 = math.tanh %575 : vector<8x128xf32>
    %582 = vector.extract_strided_slice %580 {offsets = [0, 32], sizes = [8, 32], strides = [1, 1]} : vector<8x128xf32> to vector<8x32xf32>
    %583 = arith.mulf %582, %552 : vector<8x32xf32>
    %584 = vector.extract_strided_slice %580 {offsets = [0, 0], sizes = [8, 32], strides = [1, 1]} : vector<8x128xf32> to vector<8x32xf32>
    %585 = vector.extract_strided_slice %581 {offsets = [0, 64], sizes = [8, 32], strides = [1, 1]} : vector<8x128xf32> to vector<8x32xf32>
    %586 = arith.mulf %584, %585 : vector<8x32xf32>
    %587 = arith.addf %583, %586 : vector<8x32xf32>
    %588 = vector.extract_strided_slice %580 {offsets = [0, 96], sizes = [8, 32], strides = [1, 1]} : vector<8x128xf32> to vector<8x32xf32>
    %589 = math.tanh %587 : vector<8x32xf32>
    %590 = arith.mulf %588, %589 : vector<8x32xf32>
    %591 = vector.extract_strided_slice %590 {offsets = [0, 0], sizes = [8, 16], strides = [1, 1]} : vector<8x32xf32> to vector<8x16xf32>
    %592 = arith.index_cast %563 : i32 to index
    %c0_181 = arith.constant 0 : index
    %593 = vector.load %arg18[%592, %c0_181] : memref<64x32xf32, #tpu.memory_space<vmem>>, vector<8x16xf32>
    tpu.vector_store %arg18[%592, %c0_181], %591 {strides = array<i32>} : memref<64x32xf32, #tpu.memory_space<vmem>>, vector<8x16xf32>,
    %594 = vector.extract_strided_slice %590 {offsets = [0, 16], sizes = [8, 16], strides = [1, 1]} : vector<8x32xf32> to vector<8x16xf32>
    %595 = arith.index_cast %566 : i32 to index
    %c16_182 = arith.constant 16 : index
    %596 = vector.load %arg18[%595, %c16_182] : memref<64x32xf32, #tpu.memory_space<vmem>>, vector<8x16xf32>
    tpu.vector_store %arg18[%595, %c16_182], %594 {strides = array<i32>} : memref<64x32xf32, #tpu.memory_space<vmem>>, vector<8x16xf32>,
    %c7_i32_183 = arith.constant 7 : i32
    %c8_i32_184 = arith.constant 8 : i32
    %597 = arith.muli %c7_i32_183, %c8_i32_184 : i32
    %598 = tpu.assume_multiple %597, 8 : i32
    %c7_i32_185 = arith.constant 7 : i32
    %599 = arith.subi %c7_i32_185, %c7_i32_183 : i32
    %c8_i32_186 = arith.constant 8 : i32
    %600 = arith.muli %599, %c8_i32_186 : i32
    %601 = tpu.assume_multiple %600, 8 : i32
    %602 = arith.index_cast %598 : i32 to index
    %c0_187 = arith.constant 0 : index
    %603 = vector.load %arg17[%602, %c0_187] : memref<64x128xf32, #tpu.memory_space<vmem>>, vector<8x128xf32>
    %604 = arith.index_cast %601 : i32 to index
    %c0_188 = arith.constant 0 : index
    %605 = vector.load %arg17[%604, %c0_188] : memref<64x128xf32, #tpu.memory_space<vmem>>, vector<8x128xf32>
    %606 = vector.shape_cast %42 : vector<1x128xi1> to vector<1x128xi1>
    %607 = vector.broadcast %606 : vector<1x128xi1> to vector<8x128xi1>
    %608 = arith.select %607, %603, %605 : vector<8x128xi1>, vector<8x128xf32>
    %cst_189 = arith.constant dense<0.000000e+00> : vector<8x128xf32>
    %609 = tpu.matmul %590, %345, %cst_189 {dimension_numbers = #tpu.dot_dimension_numbers<[1], [0], [0], [1], [0, 0, 1, 1], [], []>} : vector<8x32xf32>, vector<32x128xf32>, vector<8x128xf32> -> vector<8x128xf32>
    %610 = arith.addf %608, %609 : vector<8x128xf32>
    %611 = arith.negf %610 : vector<8x128xf32>
    %612 = math.exp %611 : vector<8x128xf32>
    %cst_190 = arith.constant 1.000000e+00 : f32
    %613 = vector.broadcast %cst_190 : f32 to vector<8x128xf32>
    %614 = arith.addf %613, %612 : vector<8x128xf32>
    %615 = arith.divf %613, %614 : vector<8x128xf32>
    %616 = math.tanh %610 : vector<8x128xf32>
    %617 = vector.extract_strided_slice %615 {offsets = [0, 32], sizes = [8, 32], strides = [1, 1]} : vector<8x128xf32> to vector<8x32xf32>
    %618 = arith.mulf %617, %587 : vector<8x32xf32>
    %619 = vector.extract_strided_slice %615 {offsets = [0, 0], sizes = [8, 32], strides = [1, 1]} : vector<8x128xf32> to vector<8x32xf32>
    %620 = vector.extract_strided_slice %616 {offsets = [0, 64], sizes = [8, 32], strides = [1, 1]} : vector<8x128xf32> to vector<8x32xf32>
    %621 = arith.mulf %619, %620 : vector<8x32xf32>
    %622 = arith.addf %618, %621 : vector<8x32xf32>
    %623 = vector.extract_strided_slice %615 {offsets = [0, 96], sizes = [8, 32], strides = [1, 1]} : vector<8x128xf32> to vector<8x32xf32>
    %624 = math.tanh %622 : vector<8x32xf32>
    %625 = arith.mulf %623, %624 : vector<8x32xf32>
    %626 = vector.extract_strided_slice %625 {offsets = [0, 0], sizes = [8, 16], strides = [1, 1]} : vector<8x32xf32> to vector<8x16xf32>
    %627 = arith.index_cast %598 : i32 to index
    %c0_191 = arith.constant 0 : index
    %628 = vector.load %arg18[%627, %c0_191] : memref<64x32xf32, #tpu.memory_space<vmem>>, vector<8x16xf32>
    tpu.vector_store %arg18[%627, %c0_191], %626 {strides = array<i32>} : memref<64x32xf32, #tpu.memory_space<vmem>>, vector<8x16xf32>,
    %629 = vector.extract_strided_slice %625 {offsets = [0, 16], sizes = [8, 16], strides = [1, 1]} : vector<8x32xf32> to vector<8x16xf32>
    %630 = arith.index_cast %601 : i32 to index
    %c16_192 = arith.constant 16 : index
    %631 = vector.load %arg18[%630, %c16_192] : memref<64x32xf32, #tpu.memory_space<vmem>>, vector<8x16xf32>
    tpu.vector_store %arg18[%630, %c16_192], %629 {strides = array<i32>} : memref<64x32xf32, #tpu.memory_space<vmem>>, vector<8x16xf32>,
    %c8_i32_193 = arith.constant 8 : i32
    %c0_194 = arith.constant 0 : index
    %c0_195 = arith.constant 0 : index
    %632 = vector.load %arg18[%c0_194, %c0_195] : memref<64x32xf32, #tpu.memory_space<vmem>>, vector<64x32xf32>
    %633 = vector.shape_cast %632 : vector<64x32xf32> to vector<8x8x32xf32>
    %c0_196 = arith.constant 0 : index
    %c0_197 = arith.constant 0 : index
    %c0_198 = arith.constant 0 : index
    %634 = vector.load %arg13[%c0_196, %c0_197, %c0_198] : memref<1x1x32xf32, #tpu.memory_space<vmem>>, vector<1x1x32xf32>
    %635 = vector.broadcast %634 : vector<1x1x32xf32> to vector<8x8x32xf32>
    %636 = arith.mulf %633, %635 : vector<8x8x32xf32>
    %cst_199 = arith.constant dense<0.000000e+00> : vector<8x8xf32>
    %637 = vector.multi_reduction <add>, %636, %cst_199 [2] : vector<8x8x32xf32> to vector<8x8xf32>
    %638 = vector.shape_cast %637 : vector<8x8xf32> to vector<8x8x1xf32>
    %cst_200 = arith.constant dense<0xFF800000> : vector<8x1xf32>
    %639 = vector.multi_reduction <maximumf>, %638, %cst_200 [0] : vector<8x8x1xf32> to vector<8x1xf32>
    %640 = vector.shape_cast %639 : vector<8x1xf32> to vector<1x8x1xf32>
    %641 = vector.broadcast %640 : vector<1x8x1xf32> to vector<8x8x1xf32>
    %642 = arith.subf %638, %641 : vector<8x8x1xf32>
    %643 = math.exp %642 : vector<8x8x1xf32>
    %cst_201 = arith.constant dense<0.000000e+00> : vector<8x1xf32>
    %644 = vector.multi_reduction <add>, %643, %cst_201 [0] : vector<8x8x1xf32> to vector<8x1xf32>
    %645 = vector.shape_cast %644 : vector<8x1xf32> to vector<1x8x1xf32>
    %646 = vector.broadcast %645 : vector<1x8x1xf32> to vector<8x8x1xf32>
    %647 = arith.divf %643, %646 : vector<8x8x1xf32>
    %648 = vector.broadcast %647 : vector<8x8x1xf32> to vector<8x8x32xf32>
    %649 = arith.mulf %633, %648 : vector<8x8x32xf32>
    %cst_202 = arith.constant dense<0.000000e+00> : vector<8x32xf32>
    %650 = vector.multi_reduction <add>, %649, %cst_202 [0] : vector<8x8x32xf32> to vector<8x32xf32>
    %c0_203 = arith.constant 0 : index
    %c0_204 = arith.constant 0 : index
    %651 = vector.load %arg14[%c0_203, %c0_204] : memref<32x64xf32, #tpu.memory_space<vmem>>, vector<32x64xf32>
    %cst_205 = arith.constant dense<0.000000e+00> : vector<8x64xf32>
    %652 = tpu.matmul %650, %651, %cst_205 {dimension_numbers = #tpu.dot_dimension_numbers<[1], [0], [0], [1], [0, 0, 1, 1], [], []>} : vector<8x32xf32>, vector<32x64xf32>, vector<8x64xf32> -> vector<8x64xf32>
    %c0_206 = arith.constant 0 : index
    %c0_207 = arith.constant 0 : index
    %653 = vector.load %arg15[%c0_206, %c0_207] : memref<1x64xf32, #tpu.memory_space<vmem>>, vector<1x64xf32>
    %654 = vector.broadcast %653 : vector<1x64xf32> to vector<8x64xf32>
    %655 = arith.addf %652, %654 : vector<8x64xf32>
    %c0_208 = arith.constant 0 : index
    %c0_209 = arith.constant 0 : index
    %656 = vector.load %arg16[%c0_208, %c0_209] : memref<8x64xf32, #tpu.memory_space<vmem>>, vector<8x64xf32>
    tpu.vector_store %arg16[%c0_208, %c0_209], %655 {strides = array<i32>} : memref<8x64xf32, #tpu.memory_space<vmem>>, vector<8x64xf32>,
    return
  }
  func.func @transform_0(%arg0: i32) -> (i32, i32, i32) {
    %c0_i32 = arith.constant 0 : i32
    %c0_i32_0 = arith.constant 0 : i32
    %c0_i32_1 = arith.constant 0 : i32
    return %c0_i32, %arg0, %c0_i32_0 : i32, i32, i32
  }
  func.func @transform_1(%arg0: i32) -> (i32, i32, i32) {
    %c0_i32 = arith.constant 0 : i32
    %c0_i32_0 = arith.constant 0 : i32
    %c0_i32_1 = arith.constant 0 : i32
    return %c0_i32, %arg0, %c0_i32_0 : i32, i32, i32
  }
  func.func @transform_2(%arg0: i32) -> (i32, i32) {
    %c0_i32 = arith.constant 0 : i32
    %c0_i32_0 = arith.constant 0 : i32
    %c0_i32_1 = arith.constant 0 : i32
    return %c0_i32, %c0_i32_0 : i32, i32
  }
  func.func @transform_3(%arg0: i32) -> (i32, i32) {
    %c0_i32 = arith.constant 0 : i32
    %c0_i32_0 = arith.constant 0 : i32
    %c0_i32_1 = arith.constant 0 : i32
    return %c0_i32, %c0_i32_0 : i32, i32
  }
  func.func @transform_4(%arg0: i32) -> (i32, i32) {
    %c0_i32 = arith.constant 0 : i32
    %c0_i32_0 = arith.constant 0 : i32
    %c0_i32_1 = arith.constant 0 : i32
    return %c0_i32, %c0_i32_0 : i32, i32
  }
  func.func @transform_5(%arg0: i32) -> (i32, i32) {
    %c0_i32 = arith.constant 0 : i32
    %c0_i32_0 = arith.constant 0 : i32
    %c0_i32_1 = arith.constant 0 : i32
    return %c0_i32, %c0_i32_0 : i32, i32
  }
  func.func @transform_6(%arg0: i32) -> (i32, i32) {
    %c0_i32 = arith.constant 0 : i32
    %c0_i32_0 = arith.constant 0 : i32
    %c0_i32_1 = arith.constant 0 : i32
    return %c0_i32, %c0_i32_0 : i32, i32
  }
  func.func @transform_7(%arg0: i32) -> (i32, i32) {
    %c0_i32 = arith.constant 0 : i32
    %c0_i32_0 = arith.constant 0 : i32
    %c0_i32_1 = arith.constant 0 : i32
    return %c0_i32, %c0_i32_0 : i32, i32
  }
  func.func @transform_8(%arg0: i32) -> (i32, i32) {
    %c0_i32 = arith.constant 0 : i32
    %c0_i32_0 = arith.constant 0 : i32
    %c0_i32_1 = arith.constant 0 : i32
    return %c0_i32, %c0_i32_0 : i32, i32
  }
  func.func @transform_9(%arg0: i32) -> (i32, i32) {
    %c0_i32 = arith.constant 0 : i32
    %c0_i32_0 = arith.constant 0 : i32
    %c0_i32_1 = arith.constant 0 : i32
    return %c0_i32, %c0_i32_0 : i32, i32
  }
  func.func @transform_10(%arg0: i32) -> (i32, i32) {
    %c0_i32 = arith.constant 0 : i32
    %c0_i32_0 = arith.constant 0 : i32
    %c0_i32_1 = arith.constant 0 : i32
    return %c0_i32, %c0_i32_0 : i32, i32
  }
  func.func @transform_11(%arg0: i32) -> (i32, i32) {
    %c0_i32 = arith.constant 0 : i32
    %c0_i32_0 = arith.constant 0 : i32
    %c0_i32_1 = arith.constant 0 : i32
    return %c0_i32, %c0_i32_0 : i32, i32
  }
  func.func @transform_12(%arg0: i32) -> (i32, i32, i32) {
    %c0_i32 = arith.constant 0 : i32
    %c0_i32_0 = arith.constant 0 : i32
    %c0_i32_1 = arith.constant 0 : i32
    %c0_i32_2 = arith.constant 0 : i32
    return %c0_i32, %c0_i32_0, %c0_i32_1 : i32, i32, i32
  }
  func.func @transform_13(%arg0: i32) -> (i32, i32) {
    %c0_i32 = arith.constant 0 : i32
    %c0_i32_0 = arith.constant 0 : i32
    %c0_i32_1 = arith.constant 0 : i32
    return %c0_i32, %c0_i32_0 : i32, i32
  }
  func.func @transform_14(%arg0: i32) -> (i32, i32) {
    %c0_i32 = arith.constant 0 : i32
    %c0_i32_0 = arith.constant 0 : i32
    %c0_i32_1 = arith.constant 0 : i32
    return %c0_i32, %c0_i32_0 : i32, i32
  }
  func.func @transform_15(%arg0: i32) -> (i32, i32) {
    %c0_i32 = arith.constant 0 : i32
    %c0_i32_0 = arith.constant 0 : i32
    return %arg0, %c0_i32 : i32, i32
  }
}

</mosaic_0001>

<bundles_post_ra>
// kernel: forward.1
= control target key start
LH: loop header
LB: loop body
LE: loop exit
PB: predicated region body
PF: predicated region fallthrough
CT: control target
= control target key end

     0   :  { %v3408_v0 = vmov 0   ;;  %s3409_s30 = smov 27   ;;  %v3410_v17 = vmov 0.0   ;;  %s3411_s22 = smov 82   ;;  %vm451_vm0 = vcmask 1044480   ;;  %vm149_vm2 = vcmask 220160   ;;  %s4529_s0 = inlined_call_operand.vmem [shape: s32[8,8,1], index: 0, kind: input, shape index: {}]   ;;  %s4530_s1 = inlined_call_operand.vmem [shape: f32[8,8,8], index: 1, kind: input, shape index: {}]   ;;  %s4531_s2 = inlined_call_operand.vmem [shape: f32[245,140], index: 2, kind: input, shape index: {}]   ;;  %s4532_s4 = inlined_call_operand.vmem [shape: bf16[140,128], index: 4, kind: input, shape index: {}]   ;;  %s4533_s5 = inlined_call_operand.vmem [shape: f32[32,128], index: 5, kind: input, shape index: {}]   ;;  %s4534_s7 = inlined_call_operand.vmem [shape: f32[2,32], index: 7, kind: input, shape index: {}]   ;;  %s4535_s3 = inlined_call_operand.vmem [shape: f32[1,140], index: 3, kind: input, shape index: {}]   ;;  %s4536_s6 = inlined_call_operand.vmem [shape: f32[1,128], index: 6, kind: input, shape index: {}]   ;;  %s4537_s8 = inlined_call_operand.vmem [shape: bf16[32,128], index: 8, kind: input, shape index: {}]   ;;  %s4538_s9 = inlined_call_operand.vmem [shape: f32[32,128], index: 9, kind: input, shape index: {}]   ;;  %s4539_s11 = inlined_call_operand.vmem [shape: f32[2,32], index: 11, kind: input, shape index: {}]   ;;  %s4540_s10 = inlined_call_operand.vmem [shape: f32[1,128], index: 10, kind: input, shape index: {}]   ;;  %s4541_s12 = inlined_call_operand.vmem [shape: f32[1,1,32], index: 12, kind: input, shape index: {}]   ;;  %s4542_s13 = inlined_call_operand.vmem [shape: f32[32,64], index: 13, kind: input, shape index: {}]   ;;  %s4543_s14 = inlined_call_operand.vmem [shape: f32[1,64], index: 14, kind: input, shape index: {}]   ;;  %s4544_s15 = inlined_call_operand.vmem [shape: f32[8,64], index: 15, kind: output, shape index: {}]  }
   0x1   :  { %3220 = vset.pattern.permute.xlu1 %v3408_v0  ;;  %3219 = vset.pattern.permute.xlu0 %v3408_v0  ;;  %v55_v1 = vld [vmem:[%s4529_s0 + $0x10] sm:$0xff]  ;;  %v53_v2 = vld [vmem:[%s4529_s0] sm:$0xff]  ;;  %v56_v3 = vld [vmem:[%s4529_s0 + $0x18] sm:$0xff]  ;;  %s3413_s23 = smov 12   ;;  %s3414_s20 = smov 105   ;;  %vm299_vm10 = vcmask 285696  }
   0x2   :  { %68 = vperm.xlu1 %3220, %v55_v1   ;;  %62 = vperm.xlu0 %3219, %v53_v2   ;;  %v54_v4 = vld [vmem:[%s4529_s0 + $0x8] sm:$0xff]  ;;  %v109_v5 = vld [vmem:[%s4530_s1] sm:$0xff]  ;;  %v111_v7 = vld [vmem:[%s4530_s1 + $0x10] sm:$0xff]  ;;  %s3416_s21 = smov 70   ;;  %vm325_vm11 = vcmask 97280   ;;  %vm307_vm12 = vcmask 572416  }
   0x3   :  { %686 = vmatprep.subr.bf16.mxu1 %v3408_v0  ;;  %v57_v6 = vld [vmem:[%s4529_s0 + $0x20] sm:$0xff]  ;;  %v110_v8 = vld [vmem:[%s4530_s1 + $0x8] sm:$0xff]  ;;  %v112_v10 = vld [vmem:[%s4530_s1 + $0x18] sm:$0xff]  ;;  %vm334_vm13 = vcmask 384000   ;;  %vm343_vm14 = vcmask 670720   ;;  %vm426_vm15 = vcmask 957440  }
   0x4   :  { %v58_v9 = vld [vmem:[%s4529_s0 + $0x28] sm:$0xff]  ;;  %v59_v11 = vld [vmem:[%s4529_s0 + $0x30] sm:$0xff]  ;;  %v113_v12 = vld [vmem:[%s4530_s1 + $0x20] sm:$0xff]  ;;  %s3418_s28 = smov 32  }
   0x5   :  { %v60_v13 = vld [vmem:[%s4529_s0 + $0x38] sm:$0xff]  ;;  %v114_v14 = vld [vmem:[%s4530_s1 + $0x28] sm:$0xff]  ;;  %v115_v16 = vld [vmem:[%s4530_s1 + $0x30] sm:$0xff]  ;;  %s3412_s0 = smov 47  }
   0x6   :  { %71 = vperm.xlu1 %3220, %v56_v3   ;;  %65 = vperm.xlu0 %3219, %v54_v4   ;;  %v116_v15 = vld [vmem:[%s4530_s1 + $0x38] sm:$0xff]  ;;  %v382_v19 = vld [vmem:[%s4531_s2 + $0xf0] sm:$0xff]  ;;  %v381_v20 = vld [vmem:[%s4531_s2 + $0xe8] sm:$0xff] }
   0x7   :  { %v383_v18 = vld [vmem:[%s4531_s2 + $0xf8] sm:$0xff]  ;;  %v380_v21 = vld [vmem:[%s4531_s2 + $0xe0] sm:$0xff]  ;;  %v378_v23 = vld [vmem:[%s4531_s2 + $0xd0] sm:$0xff] }
   0x8   :  { %458 = vmatprep.subr.mxu0 %v383_v18  ;;  %v379_v22 = vld [vmem:[%s4531_s2 + $0xd8] sm:$0xff]  ;;  %v377_v24 = vld [vmem:[%s4531_s2 + $0xc8] sm:$0xff]  ;;  %v376_v25 = vld [vmem:[%s4531_s2 + $0xc0] sm:$0xff] }
   0x9   :  { %459 = vmatpush1.msra.mxu0 %v382_v19  ;;  %v375_v26 = vld [vmem:[%s4531_s2 + $0xb8] sm:$0xff]  ;;  %v374_v27 = vld [vmem:[%s4531_s2 + $0xb0] sm:$0xff]  ;;  %v373_v28 = vld [vmem:[%s4531_s2 + $0xa8] sm:$0xff] }
   0xa   :  { %125 = vrot.lane.b32.xlu1 %v109_v5, %s3409_s30  ;;  %74 = vperm.xlu0 %3219, %v57_v6   ;;  %v372_v29 = vld [vmem:[%s4531_s2 + $0xa0] sm:$0xff]  ;;  %v371_v30 = vld [vmem:[%s4531_s2 + $0x98] sm:$0xff]  ;;  %v370_v31 = vld [vmem:[%s4531_s2 + $0x90] sm:$0xff]  ;;  %v51_v6 = vlaneseq }
   0xb   :  { %460 = vmatprep.subr.mxu0 %v381_v20  ;;  %v369_v32 = vld [vmem:[%s4531_s2 + $0x88] sm:$0xff]  ;;  %v368_v33 = vld [vmem:[%s4531_s2 + $0x80] sm:$0xff]  ;;  %v367_v34 = vld [vmem:[%s4531_s2 + $0x78] sm:$0xff] }
   0xc   :  { %461 = vmatpush1.msra.mxu0 %v380_v21  ;;  %v366_v35 = vld [vmem:[%s4531_s2 + $0x70] sm:$0xff]  ;;  %v365_v36 = vld [vmem:[%s4531_s2 + $0x68] sm:$0xff]  ;;  %v364_v37 = vld [vmem:[%s4531_s2 + $0x60] sm:$0xff] }
   0xd   :  { %462 = vmatprep.subr.mxu0 %v379_v22  ;;  %v363_v38 = vld [vmem:[%s4531_s2 + $0x58] sm:$0xff]  ;;  %v362_v39 = vld [vmem:[%s4531_s2 + $0x50] sm:$0xff]  ;;  %v361_v40 = vld [vmem:[%s4531_s2 + $0x48] sm:$0xff] }
   0xe   :  { %129 = vrot.lane.b32.xlu1 %v111_v7, %s3409_s30  ;;  %127 = vrot.lane.b32.xlu0 %v110_v8, %s3409_s30  ;;  %v360_v41 = vld [vmem:[%s4531_s2 + $0x40] sm:$0xff]  ;;  %v359_v42 = vld [vmem:[%s4531_s2 + $0x38] sm:$0xff] }
   0xf   :  { %463 = vmatpush1.msra.mxu0 %v378_v23  ;;  %v358_v43 = vld [vmem:[%s4531_s2 + $0x30] sm:$0xff]  ;;  %v357_v44 = vld [vmem:[%s4531_s2 + $0x28] sm:$0xff]  ;;  %v356_v45 = vld [vmem:[%s4531_s2 + $0x20] sm:$0xff] }
  0x10   :  { %464 = vmatprep.subr.mxu0 %v377_v24  ;;  %v355_v46 = vld [vmem:[%s4531_s2 + $0x18] sm:$0xff]  ;;  %v354_v47 = vld [vmem:[%s4531_s2 + $0x10] sm:$0xff]  ;;  %v353_v48 = vld [vmem:[%s4531_s2 + $0x8] sm:$0xff] }
  0x11   :  { %465 = vmatpush1.msra.mxu0 %v376_v25  ;;  %v352_v49 = vld [vmem:[%s4531_s2] sm:$0xff]  ;;  %v413_v50 = vld [vmem:[%s4531_s2 + $0x1e8] sm:$0x1f]  ;;  %v411_v52 = vld [vmem:[%s4531_s2 + $0x1d8] sm:$0xff] }
  0x12   :  { %77 = vperm.xlu1 %3220, %v58_v9   ;;  %131 = vrot.lane.b32.xlu0 %v112_v10, %s3409_s30  ;;  %v412_v51 = vld [vmem:[%s4531_s2 + $0x1e0] sm:$0x1f]  ;;  %v410_v53 = vld [vmem:[%s4531_s2 + $0x1d0] sm:$0xff]  ;;  %v409_v54 = vld [vmem:[%s4531_s2 + $0x1c8] sm:$0xff] }
  0x13   :  { %466 = vmatprep.subr.mxu0 %v375_v26  ;;  %v408_v55 = vld [vmem:[%s4531_s2 + $0x1c0] sm:$0xff]  ;;  %v407_v56 = vld [vmem:[%s4531_s2 + $0x1b8] sm:$0xff]  ;;  %v406_v57 = vld [vmem:[%s4531_s2 + $0x1b0] sm:$0xff] }
  0x14   :  { %467 = vmatpush1.msra.mxu0 %v374_v27  ;;  %v405_v58 = vld [vmem:[%s4531_s2 + $0x1a8] sm:$0xff]  ;;  %v404_v59 = vld [vmem:[%s4531_s2 + $0x1a0] sm:$0xff]  ;;  %v403_v60 = vld [vmem:[%s4531_s2 + $0x198] sm:$0xff] }
  0x15   :  { %468 = vmatprep.subr.mxu0 %v373_v28  ;;  %v402_v61 = vld [vmem:[%s4531_s2 + $0x190] sm:$0xff]  ;;  %v401_v62 = vld [vmem:[%s4531_s2 + $0x188] sm:$0xff]  ;;  %v400_v63 = vld [vmem:[%s4531_s2 + $0x180] sm:$0xff] }
  0x16   :  { %80 = vperm.xlu1 %3220, %v59_v11   ;;  %133 = vrot.lane.b32.xlu0 %v113_v12, %s3409_s30  ;;  %v399_v1 = vld [vmem:[%s4531_s2 + $0x178] sm:$0xff]  ;;  %v398_v2 = vld [vmem:[%s4531_s2 + $0x170] sm:$0xff]  ;;  %v397_v3 = vld [vmem:[%s4531_s2 + $0x168] sm:$0xff]  ;;  %v3717_v11 = vand.u32 127, %v51_v6 }
  0x17   :  { %469 = vmatpush1.msra.mxu0 %v372_v29  ;;  %v396_v4 = vld [vmem:[%s4531_s2 + $0x160] sm:$0xff]  ;;  %v395_v5 = vld [vmem:[%s4531_s2 + $0x158] sm:$0xff]  ;;  %v394_v7 = vld [vmem:[%s4531_s2 + $0x150] sm:$0xff] }
  0x18   :  { %470 = vmatprep.subr.mxu0 %v371_v30  ;;  %v393_v10 = vld [vmem:[%s4531_s2 + $0x148] sm:$0xff]  ;;  %v392_v12 = vld [vmem:[%s4531_s2 + $0x140] sm:$0xff]  ;;  %v387_v20 = vld [vmem:[%s4531_s2 + $0x118] sm:$0xff] }
  0x19   :  { %471 = vmatpush1.msra.mxu0 %v370_v31  ;;  %v389_v18 = vld [vmem:[%s4531_s2 + $0x128] sm:$0xff]  ;;  %v388_v19 = vld [vmem:[%s4531_s2 + $0x120] sm:$0xff]  ;;  %v386_v21 = vld [vmem:[%s4531_s2 + $0x110] sm:$0xff] }
  0x1a   :  { %83 = vperm.xlu1 %3220, %v60_v13   ;;  %135 = vrot.lane.b32.xlu0 %v114_v14, %s3409_s30  ;;  %v391_v13 = vld [vmem:[%s4531_s2 + $0x138] sm:$0xff]  ;;  %v390_v14 = vld [vmem:[%s4531_s2 + $0x130] sm:$0xff]  ;;  %v385_v25 = vld [vmem:[%s4531_s2 + $0x108] sm:$0xff] }
  0x1b   :  { %472 = vmatprep.subr.mxu0 %v369_v32  ;;  %v384_v26 = vld [vmem:[%s4531_s2 + $0x100] sm:$0xff]  ;;  %s3415_s2 = smov 35  }
  0x1c   :  { %473 = vmatpush1.msra.mxu0 %v368_v33 }
  0x1d   :  { %474 = vmatprep.subr.mxu0 %v367_v34 }
  0x1e   :  { %139 = vrot.lane.b32.xlu1 %v116_v15, %s3409_s30  ;;  %137 = vrot.lane.b32.xlu0 %v115_v16, %s3409_s30 }
  0x1f   :  { %475 = vmatpush1.msra.mxu0 %v366_v35 }
  0x20   :  { %476 = vmatprep.subr.mxu0 %v365_v36 }
  0x21   :  { %477 = vmatpush1.msra.mxu0 %v364_v37 }
  0x22   :  { %291 = vrot.lane.b32.xlu1 %v3410_v17, %s3411_s22  ;;  %272 = vrot.lane.b32.xlu0 %v3410_v17, %s3412_s0 }
  0x23   :  { %478 = vmatprep.subr.mxu0 %v363_v38 }
  0x24   :  { %479 = vmatpush1.msra.mxu0 %v362_v39 }
  0x25   :  { %480 = vmatprep.subr.mxu0 %v361_v40 }
  0x26   :  { %250 = vrot.lane.b32.xlu1 %v3410_v17, %s3413_s23  ;;  %481 = vmatpush1.msra.mxu0 %v360_v41 }
  0x27   :  { %482 = vmatprep.subr.mxu0 %v359_v42 }
  0x28   :  { %483 = vmatpush1.msra.mxu0 %v358_v43 }
  0x29   :  { %484 = vmatprep.subr.mxu0 %v357_v44 }
  0x2a   :  { %485 = vmatpush1.msra.mxu0 %v356_v45 }
  0x2b   :  { %486 = vmatprep.subr.mxu0 %v355_v46 }
  0x2c   :  { %487 = vmatpush1.msra.mxu0 %v354_v47 }
  0x2d   :  { %488 = vmatprep.subr.mxu0 %v353_v48 }
  0x2e   :  { %489 = vmatpush1.msra.mxu0 %v352_v49 }
  0x2f   :  { %2847 = vmatprep.subr.msk.mxu0 %vm451_vm0, %v413_v50 }
  0x30   :  { %2848 = vmatpush2.msk.msra.mxu0 %vm451_vm0, %v412_v51  ;;  %vm316_vm0 = vcmask 859136  }
  0x31   :  { %494 = vmatprep.subr.mxu0 %v411_v52 }
  0x32   :  { %495 = vmatpush2.msra.mxu0 %v410_v53 }
  0x33   :  { %496 = vmatprep.subr.mxu0 %v409_v54 }
  0x34   :  { %497 = vmatpush2.msra.mxu0 %v408_v55  ;;  %v3251_v55 = vld [vmem:[%s4532_s4 + $0x38] sm:$0xff]  }
  0x35   :  { %498 = vmatprep.subr.mxu0 %v407_v56  ;;  %687 = vmatpush1.bf16.msra.mxu1 %v3251_v55  ;;  %v3252_v56 = vld [vmem:[%s4532_s4 + $0x30] sm:$0xff]  }
  0x36   :  { %499 = vmatpush2.msra.mxu0 %v406_v57  ;;  %688 = vmatprep.subr.bf16.mxu1 %v3408_v0  ;;  %v3253_v57 = vld [vmem:[%s4532_s4 + $0x28] sm:$0xff]  }
  0x37   :  { %500 = vmatprep.subr.mxu0 %v405_v58  ;;  %v3254_v58 = vld [vmem:[%s4532_s4 + $0x20] sm:$0xff]  }
  0x38   :  { %501 = vmatpush2.msra.mxu0 %v404_v59  ;;  %v3255_v59 = vld [vmem:[%s4532_s4 + $0x18] sm:$0xff]  }
  0x39   :  { %502 = vmatprep.subr.mxu0 %v403_v60  ;;  %689 = vmatpush1.bf16.msra.mxu1 %v3252_v56 }
  0x3a   :  { %503 = vmatpush2.msra.mxu0 %v402_v61  ;;  %690 = vmatprep.subr.bf16.mxu1 %v3408_v0 }
  0x3b   :  { %504 = vmatprep.subr.mxu0 %v401_v62 }
  0x3c   :  { %505 = vmatpush2.msra.mxu0 %v400_v63 }
  0x3d   :  { %506 = vmatprep.subr.mxu0 %v399_v1  ;;  %691 = vmatpush1.bf16.msra.mxu1 %v3253_v57 }
  0x3e   :  { %507 = vmatpush2.msra.mxu0 %v398_v2  ;;  %692 = vmatprep.subr.bf16.mxu1 %v3408_v0 }
  0x3f   :  { %508 = vmatprep.subr.mxu0 %v397_v3 }
  0x40   :  { %509 = vmatpush2.msra.mxu0 %v396_v4 }
  0x41   :  { %510 = vmatprep.subr.mxu0 %v395_v5  ;;  %693 = vmatpush1.bf16.msra.mxu1 %v3254_v58 }
  0x42   :  { %511 = vmatpush2.msra.mxu0 %v394_v7  ;;  %694 = vmatprep.subr.bf16.mxu1 %v3408_v0 }
  0x43   :  { %512 = vmatprep.subr.mxu0 %v393_v10 }
  0x44   :  { %513 = vmatpush2.msra.mxu0 %v392_v12 }
  0x45   :  { %514 = vmatprep.subr.mxu0 %v391_v13  ;;  %695 = vmatpush1.bf16.msra.mxu1 %v3255_v59 }
  0x46   :  { %515 = vmatpush2.msra.mxu0 %v390_v14  ;;  %696 = vmatprep.subr.bf16.mxu1 %v3408_v0 }
  0x47   :  { %516 = vmatprep.subr.mxu0 %v389_v18 }
  0x48   :  { %517 = vmatpush2.msra.mxu0 %v388_v19 }
  0x49   :  { %518 = vmatprep.subr.mxu0 %v387_v20 }
  0x4a   :  { %519 = vmatpush2.msra.mxu0 %v386_v21 }
  0x4b   :  { %520 = vmatprep.subr.mxu0 %v385_v25 }
  0x4c   :  { %521 = vmatpush2.msra.mxu0 %v384_v26 }
  0x4d   :  { %3052 = vmatprep.subr.mxu0 %v3410_v17 }
  0x7d   :  { %v69_v8 = vpop.permute.xlu1 %68  ;;  %v63_v9 = vpop.permute.xlu0 %62 }
  0x7e   :  { %vm85_vm1 = vcmp.eq.s32.totalorder %v63_v9, %v3717_v11  ;;  %vm87_vm4 = vcmp.eq.s32.totalorder %v69_v8, %v3717_v11 }
  0x7f   :  { %v2839_v22 = vsel %vm85_vm1, 1.0, %v3410_v17  ;;  %v2841_v33 = vsel %vm87_vm4, 1.0, %v3410_v17  ;;  %vm682_vm1 = vcmask 1045504  }
  0x81   :  { %v72_v15 = vpop.permute.xlu1 %71  ;;  %v66_v16 = vpop.permute.xlu0 %65 }
  0x82   :  { %vm86_vm3 = vcmp.eq.s32.totalorder %v66_v16, %v3717_v11  ;;  %vm88_vm5 = vcmp.eq.s32.totalorder %v72_v15, %v3717_v11 }
  0x83   :  { %v2840_v28 = vsel %vm86_vm3, 1.0, %v3410_v17  ;;  %v2842_v36 = vsel %vm88_vm5, 1.0, %v3410_v17  ;;  %vm779_vm3 = vcmask 261120   ;;  %vm886_vm5 = vcmask 130048  }
  0x85   :  { %v126_v23 = vpop.permute.xlu1 %125  ;;  %v75_v24 = vpop.permute.xlu0 %74 }
  0x86   :  { %v3750_v27 = vsel %vm149_vm2, %v2839_v22, %v126_v23  ;;  %vm89_vm6 = vcmp.eq.s32.totalorder %v75_v24, %v3717_v11 }
  0x87   :  { %212 = vrot.lane.b32.xlu0 %v3750_v27, %s3414_s20  ;;  %v3221_v30 = vpack.i.bf16 %v3750_v27, %v3410_v17  ;;  %v2843_v39 = vsel %vm89_vm6, 1.0, %v3410_v17  ;;  %vm889_vm6 = vcmask 261248  }
  0x89   :  { %v128_v29 = vpop.permute.xlu0 %127  ;;  %v130_v32 = vpop.permute.xlu1 %129 }
  0x8a   :  { %v3760_v31 = vsel %vm149_vm2, %v2840_v28, %v128_v29  ;;  %v3768_v34 = vsel %vm149_vm2, %v2841_v33, %v130_v32 }
  0x8b   :  { %3222 = vrot.lane.b32.xlu0 %v3221_v30, %s3415_s2  ;;  %236 = vrot.lane.b32.xlu1 %v3760_v31, %s3413_s23  ;;  %v3231_v44 = vpack.i.bf16 %v3768_v34, %v3760_v31 }
  0x8d   :  { %v132_v35 = vpop.permute.xlu0 %131  ;;  %v78_v41 = vpop.permute.xlu1 %77 }
  0x8e   :  { %v3775_v37 = vsel %vm149_vm2, %v2842_v36, %v132_v35  ;;  %vm90_vm7 = vcmp.eq.s32.totalorder %v78_v41, %v3717_v11 }
  0x8f   :  { %3227 = vrot.lane.b32.xlu0 %v3221_v30, %s3416_s21  ;;  %260 = vrot.lane.b32.xlu1 %v3768_v34, %s3412_s0  ;;  %v2844_v43 = vsel %vm90_vm7, 1.0, %v3410_v17  ;;  %vm2833_vm7 = vcmask 523264  }
  0x91   :  { %v134_v38 = vpop.permute.xlu0 %133  ;;  %v81_v46 = vpop.permute.xlu1 %80 }
  0x92   :  { %v3788_v40 = vsel %vm149_vm2, %v2843_v39, %v134_v38  ;;  %vm91_vm8 = vcmp.eq.s32.totalorder %v81_v46, %v3717_v11 }
  0x93   :  { %214 = vrot.lane.b32.xlu0 %v3760_v31, %s3414_s20  ;;  %281 = vrot.lane.b32.xlu1 %v3775_v37, %s3411_s22  ;;  %v2845_v48 = vsel %vm91_vm8, 1.0, %v3410_v17  ;;  %v3241_v53 = vpack.i.bf16 %v3788_v40, %v3775_v37 }
  0x95   :  { %v136_v42 = vpop.permute.xlu0 %135  ;;  %v84_v49 = vpop.permute.xlu1 %83 }
  0x96   :  { %v155_v45 = vsel %vm149_vm2, %v2844_v43, %v136_v42  ;;  %vm92_vm9 = vcmp.eq.s32.totalorder %v84_v49, %v3717_v11 }
  0x97   :  { %262 = vrot.lane.b32.xlu0 %v3775_v37, %s3412_s0  ;;  %238 = vrot.lane.b32.xlu1 %v3768_v34, %s3413_s23  ;;  %v2846_v52 = vsel %vm92_vm9, 1.0, %v3410_v17 }
  0x99   :  { %v138_v47 = vpop.permute.xlu0 %137  ;;  %v140_v51 = vpop.permute.xlu1 %139 }
  0x9a   :  { %v156_v50 = vsel %vm149_vm2, %v2845_v48, %v138_v47  ;;  %v157_v54 = vsel %vm149_vm2, %v2846_v52, %v140_v51  ;;  %vm3417_vm2 = vmmov 0  }
  0x9b   :  { %216 = vrot.lane.b32.xlu0 %v3768_v34, %s3414_s20  ;;  %283 = vrot.lane.b32.xlu1 %v3788_v40, %s3411_s22 }
  0x9d   :  { %v3856_v60 = vpop.permute.xlu1 %291  ;;  %v3858_v61 = vpop.permute.xlu0 %272 }
  0x9f   :  { %264 = vrot.lane.b32.xlu0 %v3788_v40, %s3412_s0  ;;  %240 = vrot.lane.b32.xlu1 %v3775_v37, %s3413_s23 }
  0xa1   :  { %v3860_v62 = vpop.permute.xlu1 %250 }
  0xa3   :  { %3232 = vrot.lane.b32.xlu1 %v3231_v44, %s3416_s21  ;;  %285 = vrot.lane.b32.xlu0 %v155_v45, %s3411_s22 }
  0xa7   :  { %218 = vrot.lane.b32.xlu1 %v3775_v37, %s3414_s20  ;;  %242 = vrot.lane.b32.xlu0 %v3788_v40, %s3413_s23 }
  0xab   :  { %3237 = vrot.lane.b32.xlu1 %v3231_v44, %s3415_s2  ;;  %266 = vrot.lane.b32.xlu0 %v155_v45, %s3412_s0 }
  0xaf   :  { %220 = vrot.lane.b32.xlu0 %v3788_v40, %s3414_s20  ;;  %287 = vrot.lane.b32.xlu1 %v156_v50, %s3411_s22 }
  0xb3   :  { %268 = vrot.lane.b32.xlu0 %v156_v50, %s3412_s0  ;;  %244 = vrot.lane.b32.xlu1 %v155_v45, %s3413_s23 }
  0xb7   :  { %289 = vrot.lane.b32.xlu0 %v157_v54, %s3411_s22  ;;  %3242 = vrot.lane.b32.xlu1 %v3241_v53, %s3416_s21 }
  0xbb   :  { %246 = vrot.lane.b32.xlu0 %v156_v50, %s3413_s23  ;;  %222 = vrot.lane.b32.xlu1 %v155_v45, %s3414_s20 }
  0xbf   :  { %270 = vrot.lane.b32.xlu0 %v157_v54, %s3412_s0  ;;  %3247 = vrot.lane.b32.xlu1 %v3241_v53, %s3415_s2 }
  0xc3   :  { %224 = vrot.lane.b32.xlu0 %v156_v50, %s3414_s20  ;;  %248 = vrot.lane.b32.xlu1 %v157_v54, %s3413_s23 }
  0xc7   :  { %226 = vrot.lane.b32.xlu0 %v157_v54, %s3414_s20  ;;  %199 = vrot.lane.b32.xlu1 %v155_v45, %s3416_s21 }
  0xcb   :  { %177 = vrot.lane.b32.xlu0 %v155_v45, %s3415_s2  ;;  %201 = vrot.lane.b32.xlu1 %v156_v50, %s3416_s21 }
  0xf9   :  { %v213_v63 = vpop.permute.xlu0 %212 }
  0xfd   :  { %v237_v1 = vpop.permute.xlu1 %236  ;;  %v3223_v2 = vpop.permute.xlu0 %3222 }
  0xfe   :  { %v3224_v3 = vunpack.i.l.bf16 %v3223_v2  ;;  %v326_v9 = vsel %vm325_vm11, %v213_v63, %v237_v1  ;;  %v3225_v33 = vunpack.i.h.bf16 %v3223_v2 }
 0x100   :  { %v300_v8 = vsel %vm299_vm10, 0.0, %v3224_v3  ;;  %v301_v42 = vsel %vm299_vm10, 0.0, %v3225_v33 }
 0x101   :  { %v261_v4 = vpop.permute.xlu1 %260  ;;  %v3228_v5 = vpop.permute.xlu0 %3227 }
 0x102   :  { %v3229_v7 = vunpack.i.l.bf16 %v3228_v5  ;;  %v335_v12 = vsel %vm334_vm13, %v326_v9, %v261_v4  ;;  %v3230_v18 = vunpack.i.h.bf16 %v3228_v5 }
 0x104   :  { %v308_v10 = vsel %vm307_vm12, %v300_v8, %v3229_v7  ;;  %v309_v22 = vsel %vm307_vm12, %v300_v8, %v3230_v18 }
 0x105   :  { %v282_v13 = vpop.permute.xlu1 %281  ;;  %v215_v14 = vpop.permute.xlu0 %214  ;;  %v317_v16 = vsel %vm316_vm0, %v308_v10, %v213_v63 }
 0x106   :  { %v344_v15 = vsel %vm343_vm14, %v335_v12, %v282_v13  ;;  %v318_v28 = vsel %vm316_vm0, %v309_v22, %v215_v14 }
 0x107   :  { %2849 = vmatprep.mubr.msk.f32.mxu0 %vm426_vm15, %v344_v15 }
 0x108   :  { %523 = vmatmul.mubr.f32.vlgmr.msra.gmra.mxu0 %v317_v16 }
 0x109   :  { %v239_v19 = vpop.permute.xlu1 %238  ;;  %v263_v20 = vpop.permute.xlu0 %262 }
 0x10a   :  { %v327_v21 = vsel %vm325_vm11, %v215_v14, %v239_v19 }
 0x10b   :  { %v336_v23 = vsel %vm334_vm13, %v327_v21, %v263_v20 }
 0x10d   :  { %v284_v24 = vpop.permute.xlu1 %283  ;;  %v217_v25 = vpop.permute.xlu0 %216 }
 0x10e   :  { %v345_v26 = vsel %vm343_vm14, %v336_v23, %v284_v24 }
 0x10f   :  { %2850 = vmatprep.mubr.msk.f32.mxu0 %vm426_vm15, %v345_v26 }
 0x110   :  { %529 = vmatmul.mubr.f32.gmra.mxu0 %v318_v28 }
 0x111   :  { %v241_v29 = vpop.permute.xlu1 %240  ;;  %v265_v30 = vpop.permute.xlu0 %264 }
 0x112   :  { %v328_v32 = vsel %vm325_vm11, %v217_v25, %v241_v29 }
 0x113   :  { %v337_v35 = vsel %vm334_vm13, %v328_v32, %v265_v30 }
 0x115   :  { %v3233_v36 = vpop.permute.xlu1 %3232  ;;  %v286_v38 = vpop.permute.xlu0 %285 }
 0x116   :  { %v3234_v39 = vunpack.i.l.bf16 %v3233_v36  ;;  %v346_v41 = vsel %vm343_vm14, %v337_v35, %v286_v38  ;;  %v3235_v50 = vunpack.i.h.bf16 %v3233_v36 }
 0x117   :  { %2851 = vmatprep.mubr.msk.f32.mxu0 %vm426_vm15, %v346_v41 }
 0x118   :  { %v310_v43 = vsel %vm307_vm12, %v301_v42, %v3234_v39 }
 0x119   :  { %v219_v44 = vpop.permute.xlu1 %218  ;;  %v243_v45 = vpop.permute.xlu0 %242  ;;  %v319_v46 = vsel %vm316_vm0, %v310_v43, %v217_v25 }
 0x11a   :  { %535 = vmatmul.mubr.f32.gmra.mxu0 %v319_v46  ;;  %v329_v51 = vsel %vm325_vm11, %v219_v44, %v243_v45  ;;  %v3259_v45 = vld [vmem:[%s4532_s4 + $0x40] sm:$0x3f]  }
 0x11b   :  { %v684_v46 = vsel %vm682_vm1, %v3259_v45, 0 }
 0x11d   :  { %v3238_v47 = vpop.permute.xlu1 %3237  ;;  %v267_v48 = vpop.permute.xlu0 %266 }
 0x11e   :  { %v3239_v49 = vunpack.i.l.bf16 %v3238_v47  ;;  %v338_v53 = vsel %vm334_vm13, %v329_v51, %v267_v48  ;;  %v3240_v2 = vunpack.i.h.bf16 %v3238_v47  ;;  %v3947_v47 = vld [vmem:[%s4533_s5 + $0x18] sm:$0xff]  ;;  %v3961_v48 = vld [vmem:[%s4533_s5 + $0x8] sm:$0xff]  ;;  %v417_v51 = vshrl.u32 %v51_v6, 7 }
 0x11f   :  { %3053 = vmatpush3.msra.mxu0 %v3947_v47 }
 0x120   :  { %v302_v52 = vsel %vm299_vm10, %v3750_v27, %v3239_v49  ;;  %v303_v8 = vsel %vm299_vm10, %v3760_v31, %v3240_v2  ;;  %3054 = vmatprep.subr.mxu0 %v3410_v17  ;;  %v3968_v49 = vld [vmem:[%s4533_s5] sm:$0xff] }
 0x121   :  { %v288_v54 = vpop.permute.xlu1 %287  ;;  %v221_v55 = vpop.permute.xlu0 %220  ;;  %v311_v56 = vsel %vm307_vm12, %v302_v52, %v3235_v50  ;;  %v2872_v50 = vld [vmem:[%s4534_s7 + $0x1] ss:$0 sm:$0xff] }
 0x122   :  { %v347_v57 = vsel %vm343_vm14, %v338_v53, %v288_v54  ;;  %v320_v58 = vsel %vm316_vm0, %v311_v56, %v219_v44  ;;  %862 = vrot.lane.b32.xlu1 %v2872_v50, %s3418_s28  ;;  %v422_v53 = vsub.s32 1, %v417_v51  ;;  %v418_v54 = vsub.s32 0, %v417_v51 }
 0x123   :  { %2852 = vmatprep.mubr.msk.f32.mxu0 %vm426_vm15, %v347_v57 }
 0x124   :  { %541 = vmatmul.mubr.f32.gmra.mxu0 %v320_v58 }
 0x125   :  { %v245_v59 = vpop.permute.xlu1 %244  ;;  %v269_v63 = vpop.permute.xlu0 %268 }
 0x126   :  { %v330_v1 = vsel %vm325_vm11, %v221_v55, %v245_v59 }
 0x127   :  { %v339_v27 = vsel %vm334_vm13, %v330_v1, %v269_v63 }
 0x129   :  { %v3243_v3 = vpop.permute.xlu1 %3242  ;;  %v290_v4 = vpop.permute.xlu0 %289 }
 0x12a   :  { %v3244_v5 = vunpack.i.l.bf16 %v3243_v3  ;;  %v348_v7 = vsel %vm343_vm14, %v339_v27, %v290_v4  ;;  %v3245_v20 = vunpack.i.h.bf16 %v3243_v3 }
 0x12b   :  { %2853 = vmatprep.mubr.msk.f32.mxu0 %vm426_vm15, %v348_v7 }
 0x12c   :  { %v312_v9 = vsel %vm307_vm12, %v303_v8, %v3244_v5 }
 0x12d   :  { %v223_v10 = vpop.permute.xlu1 %222  ;;  %v247_v12 = vpop.permute.xlu0 %246  ;;  %v321_v13 = vsel %vm316_vm0, %v312_v9, %v221_v55  ;;  %v414_v55 = vld [vmem:[%s4535_s3] sm:$0x3] }
 0x12e   :  { %547 = vmatmul.mubr.f32.gmra.mxu0 %v321_v13  ;;  %v331_v14 = vsel %vm325_vm11, %v223_v10, %v247_v12  ;;  %v423_v57 = vrot.slane %v414_v55, %v422_v53  ;;  %v419_v58 = vrot.slane %v414_v55, %v418_v54 }
 0x131   :  { %v3248_v15 = vpop.permute.xlu1 %3247  ;;  %v271_v16 = vpop.permute.xlu0 %270 }
 0x132   :  { %v3249_v18 = vunpack.i.l.bf16 %v3248_v15  ;;  %v340_v19 = vsel %vm334_vm13, %v331_v14, %v271_v16  ;;  %v3250_v22 = vunpack.i.h.bf16 %v3248_v15 }
 0x133   :  { %v349_v21 = vsel %vm343_vm14, %v340_v19, %v3856_v60 }
 0x134   :  { %2854 = vmatprep.mubr.msk.f32.mxu0 %vm426_vm15, %v349_v21  ;;  %v304_v31 = vsel %vm299_vm10, %v3768_v34, %v3249_v18  ;;  %v305_v34 = vsel %vm299_vm10, %v3775_v37, %v3250_v22 }
 0x135   :  { %v249_v23 = vpop.permute.xlu1 %248  ;;  %v225_v24 = vpop.permute.xlu0 %224  ;;  %v313_v25 = vsel %vm307_vm12, %v304_v31, %v3245_v20 }
 0x136   :  { %v332_v26 = vsel %vm325_vm11, %v225_v24, %v249_v23  ;;  %v322_v28 = vsel %vm316_vm0, %v313_v25, %v223_v10 }
 0x137   :  { %v341_v29 = vsel %vm334_vm13, %v332_v26, %v3858_v61  ;;  %553 = vmatmul.mubr.f32.gmra.mxu0 %v322_v28 }
 0x138   :  { %v350_v30 = vsel %vm343_vm14, %v341_v29, %v3856_v60 }
 0x139   :  { %v200_v32 = vpop.permute.xlu1 %199  ;;  %v227_v33 = vpop.permute.xlu0 %226  ;;  %2855 = vmatprep.mubr.msk.f32.mxu0 %vm426_vm15, %v350_v30 }
 0x13a   :  { %v314_v35 = vsel %vm307_vm12, %v305_v34, %v200_v32  ;;  %v333_v36 = vsel %vm325_vm11, %v227_v33, %v3860_v62 }
 0x13b   :  { %v342_v38 = vsel %vm334_vm13, %v333_v36, %v3858_v61  ;;  %v323_v39 = vsel %vm316_vm0, %v314_v35, %v225_v24  ;;  %v3256_v61 = vld [vmem:[%s4532_s4 + $0x10] sm:$0xff]  }
 0x13c   :  { %559 = vmatmul.mubr.f32.gmra.mxu0 %v323_v39  ;;  %v351_v41 = vsel %vm343_vm14, %v342_v38, %v3856_v60  ;;  %697 = vmatpush1.bf16.msra.mxu1 %v3256_v61  ;;  %v3257_v60 = vld [vmem:[%s4532_s4 + $0x8] sm:$0xff]  }
 0x13d   :  { %v202_v42 = vpop.permute.xlu1 %201  ;;  %v178_v43 = vpop.permute.xlu0 %177  ;;  %2856 = vmatprep.mubr.msk.f32.mxu0 %vm426_vm15, %v351_v41  ;;  %698 = vmatprep.subr.bf16.mxu1 %v3408_v0  ;;  %v2871_v41 = vld [vmem:[%s4534_s7] ss:$0 sm:$0xff] }
 0x13e   :  { %v306_v37 = vsel %vm299_vm10, %v3788_v40, %v178_v43  ;;  %v3258_v40 = vld [vmem:[%s4532_s4] sm:$0xff]  }
 0x13f   :  { %v315_v44 = vsel %vm307_vm12, %v306_v37, %v202_v42  ;;  %v2857_v37 = vld [vmem:[%s4536_s6] ss:$0 sm:$0xff]  ;;  %s3419_s6 = smov 64  }
 0x140   :  { %v324_v62 = vsel %vm316_vm0, %v315_v44, %v227_v33  ;;  %699 = vmatpush1.bf16.msra.mxu1 %v3257_v60 }
 0x141   :  { %565 = vmatmul.mubr.f32.gmra.mxu0 %v324_v62  ;;  %700 = vmatprep.subr.bf16.mxu1 %v3408_v0 }
 0x142   :  { %3060 = vmatprep.mubr.msk.f32.mxu0 %vm3417_vm2, %v3410_v17 }
 0x144   :  { %701 = vmatpush1.bf16.msra.mxu1 %v3258_v40 }
 0x145   :  { %716 = vmatprep.subr.bf16.mxu1 %v3408_v0  ;;  %v3954_v0 = vld [vmem:[%s4533_s5 + $0x10] sm:$0xff] }
 0x146   :  { %3055 = vmatpush3.msra.mxu0 %v3954_v0 }
 0x147   :  { %3056 = vmatprep.subr.mxu0 %v3410_v17 }
 0x148   :  { %717 = vmatpush2.bf16.msra.mxu1 %v684_v46  ;;  %3057 = vmatpush3.msra.mxu0 %v3961_v48 }
 0x149   :  { %3008 = vmatprep.subr.mxu1 %v3410_v17  ;;  %3058 = vmatprep.subr.mxu0 %v3410_v17 }
 0x14a   :  { %3059 = vmatpush3.msra.mxu0 %v3968_v49 }
 0x14b   :  { %3074 = vmatprep.subr.mxu0 %v3410_v17 }
 0x1c8   :  { %v524_v52 = vpop.f32.mrf.mxu0 }
 0x1c9   :  { %v525_v3 = vadd.f32 %v524_v52, %v419_v58  ;;  %v575_v52 = vand.u32 31, %v3717_v11 }
 0x1ca   :  { %v526_v56 = vpop.f32.mrf.mxu0 }
 0x1cb   :  { %v527_v2 = vadd.f32 %v526_v56, %v423_v57  ;;  %vm4020_vm4 = vcmp.lt.s32.totalorder %v575_v52, 16 }
 0x1d0   :  { %v530_v59 = vpop.f32.mrf.mxu0 }
 0x1d1   :  { %v531_v63 = vadd.f32 %v530_v59, %v419_v58 }
 0x1d2   :  { %v532_v1 = vpop.f32.mrf.mxu0 }
 0x1d3   :  { %v533_v27 = vadd.f32 %v532_v1, %v423_v57  ;;  %v584_v5 = vpack.c.bf16 %v531_v63, %v525_v3 }
 0x1d5   :  { %v585_v4 = vpack.c.bf16 %v533_v27, %v527_v2 }
 0x1d7   :  { %2867 = vmatprep.mubr.msk.bf16.mxu1 %vm325_vm11, %v585_v4 }
 0x1d8   :  { %719 = vmatmul.mubr.bf16.vlgmr.msra.gmra.mxu1 %v584_v5 }
 0x1d9   :  { %3009 = vmatpush3.msra.mxu1 %v3947_v47 }
 0x1da   :  { %3010 = vmatprep.subr.mxu1 %v3410_v17  ;;  %v536_v6 = vpop.f32.mrf.mxu0 }
 0x1db   :  { %3011 = vmatpush3.msra.mxu1 %v3954_v0  ;;  %v537_v14 = vadd.f32 %v536_v6, %v419_v58 }
 0x1dc   :  { %3012 = vmatprep.subr.mxu1 %v3410_v17  ;;  %v538_v7 = vpop.f32.mrf.mxu0 }
 0x1dd   :  { %3013 = vmatpush3.msra.mxu1 %v3961_v48  ;;  %v539_v12 = vadd.f32 %v538_v7, %v423_v57 }
 0x1de   :  { %3014 = vmatprep.subr.mxu1 %v3410_v17 }
 0x1df   :  { %3015 = vmatpush3.msra.mxu1 %v3968_v49 }
 0x1e0   :  { %3019 = vmatprep.subr.mxu1 %v3410_v17 }
 0x1e4   :  { %v542_v8 = vpop.f32.mrf.mxu0 }
 0x1e5   :  { %v543_v9 = vadd.f32 %v542_v8, %v419_v58 }
 0x1e6   :  { %v544_v10 = vpop.f32.mrf.mxu0 }
 0x1e7   :  { %v545_v13 = vadd.f32 %v544_v10, %v423_v57  ;;  %v586_v16 = vpack.c.bf16 %v543_v9, %v537_v14 }
 0x1e9   :  { %v587_v15 = vpack.c.bf16 %v545_v13, %v539_v12 }
 0x1eb   :  { %2868 = vmatprep.mubr.msk.bf16.mxu1 %vm325_vm11, %v587_v15 }
 0x1ec   :  { %727 = vmatmul.mubr.bf16.gmra.mxu1 %v586_v16 }
 0x1ee   :  { %v548_v18 = vpop.f32.mrf.mxu0 }
 0x1ef   :  { %v549_v24 = vadd.f32 %v548_v18, %v419_v58 }
 0x1f0   :  { %v550_v19 = vpop.f32.mrf.mxu0 }
 0x1f1   :  { %v551_v22 = vadd.f32 %v550_v19, %v423_v57 }
 0x1f7   :  { %v554_v20 = vpop.f32.mrf.mxu0 }
 0x1f8   :  { %v555_v21 = vadd.f32 %v554_v20, %v419_v58 }
 0x1f9   :  { %v556_v31 = vpop.f32.mrf.mxu0 }
 0x1fa   :  { %v557_v23 = vadd.f32 %v556_v31, %v423_v57  ;;  %v588_v28 = vpack.c.bf16 %v555_v21, %v549_v24  ;;  %v863_v24 = vpop.permute.xlu1 %862 }
 0x1fc   :  { %v589_v25 = vpack.c.bf16 %v557_v23, %v551_v22  ;;  %v560_v26 = vpop.f32.mrf.mxu0 }
 0x1fd   :  { %v561_v36 = vadd.f32 %v560_v26, %v419_v58 }
 0x1fe   :  { %v562_v29 = vpop.f32.mrf.mxu0  ;;  %2869 = vmatprep.mubr.msk.bf16.mxu1 %vm325_vm11, %v589_v25 }
 0x1ff   :  { %735 = vmatmul.mubr.bf16.gmra.mxu1 %v588_v28  ;;  %v563_v33 = vadd.f32 %v562_v29, %v423_v57 }
 0x201   :  { %v566_v30 = vpop.f32.mrf.mxu0 }
 0x202   :  { %v567_v32 = vadd.f32 %v566_v30, %v419_v58 }
 0x203   :  { %v568_v34 = vpop.f32.mrf.mxu0 }
 0x204   :  { %v569_v35 = vadd.f32 %v568_v34, %v423_v57  ;;  %v590_v39 = vpack.c.bf16 %v567_v32, %v561_v36 }
 0x206   :  { %v591_v38 = vpack.c.bf16 %v569_v35, %v563_v33 }
 0x208   :  { %2870 = vmatprep.mubr.msk.bf16.mxu1 %vm325_vm11, %v591_v38 }
 0x209   :  { %743 = vmatmul.mubr.bf16.gmra.mxu1 %v590_v39 }
 0x20a   :  { %3016 = vmatprep.mubr.msk.f32.mxu1 %vm3417_vm2, %v3410_v17 }
 0x211   :  { %3017 = vmatmul.mubr.msk.f32.vlgmr.msra.gmra.mxu1 %vm779_vm3, %v2871_v41 }
 0x212   :  { %3020 = vmatpush3.msra.mxu1 %v3947_v47  ;;  %3027 = vmatprep.mubr.msk.f32.mxu1 %vm3417_vm2, %v3410_v17 }
 0x213   :  { %3021 = vmatprep.subr.mxu1 %v3410_v17 }
 0x214   :  { %3022 = vmatpush3.msra.mxu1 %v3954_v0 }
 0x215   :  { %3023 = vmatprep.subr.mxu1 %v3410_v17 }
 0x216   :  { %3024 = vmatpush3.msra.mxu1 %v3961_v48 }
 0x217   :  { %3025 = vmatprep.subr.mxu1 %v3410_v17 }
 0x218   :  { %3026 = vmatpush3.msra.mxu1 %v3968_v49 }
 0x219   :  { %3030 = vmatprep.subr.mxu1 %v3410_v17 }
 0x298   :  { %v720_v42 = vpop.f32.mrf.mxu1 }
 0x299   :  { %v4054_v8 = vadd.f32 %v2857_v37, %v720_v42 }
 0x29a   :  { %v722_v43 = vpop.f32.mrf.mxu1 }
 0x29c   :  { %v723_v44 = vpop.f32.mrf.mxu1 }
 0x29d   :  { %v4013_v62 = vadd.f32 %v2857_v37, %v723_v44 }
 0x29e   :  { %v725_v61 = vpop.f32.mrf.mxu1 }
 0x2ac   :  { %v728_v60 = vpop.f32.mrf.mxu1 }
 0x2ad   :  { %v4015_v40 = vadd.f32 %v2857_v37, %v728_v60 }
 0x2ae   :  { %v730_v45 = vpop.f32.mrf.mxu1 }
 0x2b0   :  { %v731_v46 = vpop.f32.mrf.mxu1 }
 0x2b1   :  { %v4017_v50 = vadd.f32 %v2857_v37, %v731_v46 }
 0x2b2   :  { %v733_v51 = vpop.f32.mrf.mxu1 }
 0x2bf   :  { %v736_v53 = vpop.f32.mrf.mxu1 }
 0x2c0   :  { %v4024_v55 = vadd.f32 %v2857_v37, %v736_v53 }
 0x2c1   :  { %v738_v56 = vpop.f32.mrf.mxu1 }
 0x2c2   :  { %v1115_v57 = vsel %vm4020_vm4, %v4017_v50, %v4024_v55  ;;  %v1223_v58 = vsel %vm4020_vm4, %v4024_v55, %v4017_v50 }
 0x2c3   :  { %v739_v59 = vpop.f32.mrf.mxu1 }
 0x2c4   :  { %v4034_v11 = vadd.f32 %v2857_v37, %v739_v59 }
 0x2c5   :  { %v741_v63 = vpop.f32.mrf.mxu1 }
 0x2c6   :  { %v1005_v1 = vsel %vm4020_vm4, %v4015_v40, %v4034_v11  ;;  %v1329_v2 = vsel %vm4020_vm4, %v4034_v11, %v4015_v40 }
 0x2c9   :  { %v744_v27 = vpop.f32.mrf.mxu1 }
 0x2ca   :  { %v4044_v3 = vadd.f32 %v2857_v37, %v744_v27 }
 0x2cb   :  { %v746_v4 = vpop.f32.mrf.mxu1 }
 0x2cc   :  { %v895_v5 = vsel %vm4020_vm4, %v4013_v62, %v4044_v3  ;;  %v1435_v6 = vsel %vm4020_vm4, %v4044_v3, %v4013_v62 }
 0x2cd   :  { %v747_v7 = vpop.f32.mrf.mxu1 }
 0x2ce   :  { %v4056_v9 = vadd.f32 %v2857_v37, %v747_v7 }
 0x2cf   :  { %v749_v10 = vpop.f32.mrf.mxu1 }
 0x2d0   :  { %v778_v12 = vsel %vm4020_vm4, %v4054_v8, %v4056_v9  ;;  %v1541_v13 = vsel %vm4020_vm4, %v4056_v9, %v4054_v8  ;;  %v3260_v9 = vld [vmem:[%s4537_s8 + $0x8] sm:$0xff]  }
 0x2d1   :  { %v849_v14 = vpop.f32.mrf.mxu1 }
 0x2d2   :  { %v853_v15 = vadd.f32 %v849_v14, %v778_v12 }
 0x2d3   :  { %v3018_v16 = vpop.f32.mrf.mxu1 }
 0x2d4   :  { %3262 = vtanh.f32 %v853_v15  ;;  %v2874_v19 = vmul.f32 -1.442695, %v853_v15 }
 0x2d6   :  { %3264 = vpow2.f32 %v2874_v19 }
 0x2e1   :  { %v3263_v18 = vpop.eup %3262 }
 0x2e2   :  { %867 = vrot.lane.b32.xlu0 %v3263_v18, %s3419_s6 }
 0x2e3   :  { %v3265_v20 = vpop.eup %3264 }
 0x2e4   :  { %v857_v21 = vadd.f32 1.0, %v3265_v20 }
 0x2e6   :  { %3266 = vrcp.f32 %v857_v21 }
 0x2f3   :  { %v3267_v31 = vpop.eup %3266 }
 0x2f4   :  { %v865_v25 = vmul.f32 %v3267_v31, %v863_v24 }
 0x354   :  { %v868_v22 = vpop.permute.xlu0 %867 }
 0x355   :  { %v870_v23 = vmul.f32 %v3267_v31, %v868_v22 }
 0x357   :  { %872 = vrot.lane.b32.xlu0 %v870_v23, %s3418_s28 }
 0x3c9   :  { %v873_v26 = vpop.permute.xlu0 %872 }
 0x3ca   :  { %v875_v28 = vadd.f32 %v873_v26, %v865_v25 }
 0x3cc   :  { %3268 = vtanh.f32 %v875_v28 }
 0x3d9   :  { %v3269_v29 = vpop.eup %3268 }
 0x3da   :  { %878 = vrot.lane.b32.xlu1 %v3269_v29, %s3419_s6 }
 0x44c   :  { %v879_v30 = vpop.permute.xlu1 %878 }
 0x44d   :  { %v881_v32 = vmul.f32 %v3267_v31, %v879_v30 }
 0x44f   :  { %883 = vrot.lane.b32.xlu0 %v881_v32, %s3418_s28 }
 0x4c1   :  { %v884_v34 = vpop.permute.xlu0 %883 }
 0x4c2   :  { %887 = vst.msk [vmem:[#allocation3] sm:$0xff] %vm886_vm5, %v884_v34  ;;  %3028 = vmatmul.mubr.msk.f32.vlgmr.msra.gmra.mxu1 %vm779_vm3, %v884_v34 }
 0x4c3   :  { %890 = vst.msk [vmem:[#allocation3 + $0x38] sm:$0xff] %vm889_vm6, %v884_v34  ;;  %3031 = vmatpush3.msra.mxu1 %v3947_v47  ;;  %3038 = vmatprep.mubr.msk.f32.mxu1 %vm3417_vm2, %v3410_v17 }
 0x4c4   :  { %3032 = vmatprep.subr.mxu1 %v3410_v17 }
 0x4c5   :  { %3033 = vmatpush3.msra.mxu1 %v3954_v0 }
 0x4c6   :  { %3034 = vmatprep.subr.mxu1 %v3410_v17 }
 0x4c7   :  { %3035 = vmatpush3.msra.mxu1 %v3961_v48 }
 0x4c8   :  { %3036 = vmatprep.subr.mxu1 %v3410_v17 }
 0x4c9   :  { %3037 = vmatpush3.msra.mxu1 %v3968_v49 }
 0x4ca   :  { %3041 = vmatprep.subr.mxu1 %v3410_v17 }
 0x582   :  { %v964_v33 = vpop.f32.mrf.mxu1 }
 0x583   :  { %v968_v35 = vadd.f32 %v964_v33, %v895_v5 }
 0x584   :  { %v3029_v36 = vpop.f32.mrf.mxu1 }
 0x585   :  { %3270 = vtanh.f32 %v968_v35  ;;  %v2876_v39 = vmul.f32 -1.442695, %v968_v35 }
 0x587   :  { %3272 = vpow2.f32 %v2876_v39 }
 0x592   :  { %v3271_v38 = vpop.eup %3270 }
 0x593   :  { %978 = vrot.lane.b32.xlu1 %v3271_v38, %s3419_s6 }
 0x594   :  { %v3273_v41 = vpop.eup %3272 }
 0x595   :  { %v972_v42 = vadd.f32 1.0, %v3273_v41 }
 0x597   :  { %3274 = vrcp.f32 %v972_v42 }
 0x5a4   :  { %v3275_v43 = vpop.eup %3274 }
 0x5a5   :  { %v976_v61 = vmul.f32 %v3275_v43, %v875_v28 }
 0x605   :  { %v979_v37 = vpop.permute.xlu1 %978 }
 0x606   :  { %v981_v44 = vmul.f32 %v3275_v43, %v979_v37 }
 0x608   :  { %983 = vrot.lane.b32.xlu0 %v981_v44, %s3418_s28 }
 0x67a   :  { %v984_v60 = vpop.permute.xlu0 %983 }
 0x67b   :  { %v986_v45 = vadd.f32 %v984_v60, %v976_v61 }
 0x67d   :  { %3276 = vtanh.f32 %v986_v45 }
 0x68a   :  { %v3277_v46 = vpop.eup %3276 }
 0x68b   :  { %989 = vrot.lane.b32.xlu1 %v3277_v46, %s3419_s6 }
 0x6fd   :  { %v990_v51 = vpop.permute.xlu1 %989 }
 0x6fe   :  { %v992_v52 = vmul.f32 %v3275_v43, %v990_v51 }
 0x700   :  { %994 = vrot.lane.b32.xlu0 %v992_v52, %s3418_s28 }
 0x772   :  { %v995_v53 = vpop.permute.xlu0 %994 }
 0x773   :  { %998 = vst.msk [vmem:[#allocation3 + $0x8] sm:$0xff] %vm886_vm5, %v995_v53  ;;  %3039 = vmatmul.mubr.msk.f32.vlgmr.msra.gmra.mxu1 %vm779_vm3, %v995_v53 }
 0x774   :  { %1000 = vst.msk [vmem:[#allocation3 + $0x30] sm:$0xff] %vm889_vm6, %v995_v53  ;;  %3042 = vmatpush3.msra.mxu1 %v3947_v47  ;;  %3049 = vmatprep.mubr.msk.f32.mxu1 %vm3417_vm2, %v3410_v17 }
 0x775   :  { %3043 = vmatprep.subr.mxu1 %v3410_v17 }
 0x776   :  { %3044 = vmatpush3.msra.mxu1 %v3954_v0 }
 0x777   :  { %3045 = vmatprep.subr.mxu1 %v3410_v17 }
 0x778   :  { %3046 = vmatpush3.msra.mxu1 %v3961_v48 }
 0x779   :  { %3047 = vmatprep.subr.mxu1 %v3410_v17 }
 0x77a   :  { %3048 = vmatpush3.msra.mxu1 %v3968_v49 }
 0x77b   :  { %3063 = vmatprep.subr.mxu1 %v3410_v17 }
 0x833   :  { %v1074_v56 = vpop.f32.mrf.mxu1 }
 0x834   :  { %v1078_v59 = vadd.f32 %v1074_v56, %v1005_v1 }
 0x835   :  { %v3040_v63 = vpop.f32.mrf.mxu1 }
 0x836   :  { %3278 = vtanh.f32 %v1078_v59  ;;  %v2878_v4 = vmul.f32 -1.442695, %v1078_v59 }
 0x838   :  { %3280 = vpow2.f32 %v2878_v4 }
 0x843   :  { %v3279_v27 = vpop.eup %3278 }
 0x844   :  { %1088 = vrot.lane.b32.xlu1 %v3279_v27, %s3419_s6 }
 0x845   :  { %v3281_v5 = vpop.eup %3280 }
 0x846   :  { %v1082_v7 = vadd.f32 1.0, %v3281_v5 }
 0x848   :  { %3282 = vrcp.f32 %v1082_v7 }
 0x855   :  { %v3283_v10 = vpop.eup %3282 }
 0x856   :  { %v1086_v15 = vmul.f32 %v3283_v10, %v986_v45 }
 0x8b6   :  { %v1089_v12 = vpop.permute.xlu1 %1088 }
 0x8b7   :  { %v1091_v14 = vmul.f32 %v3283_v10, %v1089_v12 }
 0x8b9   :  { %1093 = vrot.lane.b32.xlu0 %v1091_v14, %s3418_s28 }
 0x92b   :  { %v1094_v16 = vpop.permute.xlu0 %1093 }
 0x92c   :  { %v1096_v18 = vadd.f32 %v1094_v16, %v1086_v15 }
 0x92e   :  { %3284 = vtanh.f32 %v1096_v18 }
 0x93b   :  { %v3285_v1 = vpop.eup %3284 }
 0x93c   :  { %1099 = vrot.lane.b32.xlu1 %v3285_v1, %s3419_s6 }
 0x9ae   :  { %v1100_v19 = vpop.permute.xlu1 %1099 }
 0x9af   :  { %v1102_v20 = vmul.f32 %v3283_v10, %v1100_v19 }
 0x9b1   :  { %1104 = vrot.lane.b32.xlu0 %v1102_v20, %s3418_s28 }
 0xa23   :  { %v1105_v21 = vpop.permute.xlu0 %1104 }
 0xa24   :  { %1108 = vst.msk [vmem:[#allocation3 + $0x10] sm:$0xff] %vm886_vm5, %v1105_v21  ;;  %3050 = vmatmul.mubr.msk.f32.vlgmr.msra.gmra.mxu1 %vm779_vm3, %v1105_v21 }
 0xa25   :  { %1110 = vst.msk [vmem:[#allocation3 + $0x28] sm:$0xff] %vm889_vm6, %v1105_v21  ;;  %3064 = vmatpush3.msra.mxu1 %v3947_v47  ;;  %3071 = vmatprep.mubr.msk.f32.mxu1 %vm3417_vm2, %v3410_v17 }
 0xa26   :  { %3065 = vmatprep.subr.mxu1 %v3410_v17 }
 0xa27   :  { %3066 = vmatpush3.msra.mxu1 %v3954_v0 }
 0xa28   :  { %3067 = vmatprep.subr.mxu1 %v3410_v17 }
 0xa29   :  { %3068 = vmatpush3.msra.mxu1 %v3961_v48 }
 0xa2a   :  { %3069 = vmatprep.subr.mxu1 %v3410_v17 }
 0xa2b   :  { %3070 = vmatpush3.msra.mxu1 %v3968_v49 }
 0xa2c   :  { %3085 = vmatprep.subr.mxu1 %v3410_v17 }
 0xae4   :  { %v1184_v31 = vpop.f32.mrf.mxu1 }
 0xae5   :  { %v1188_v22 = vadd.f32 %v1184_v31, %v1115_v57 }
 0xae6   :  { %v3051_v23 = vpop.f32.mrf.mxu1 }
 0xae7   :  { %3286 = vtanh.f32 %v1188_v22  ;;  %v2880_v25 = vmul.f32 -1.442695, %v1188_v22 }
 0xae9   :  { %3288 = vpow2.f32 %v2880_v25 }
 0xaf4   :  { %v3287_v24 = vpop.eup %3286 }
 0xaf5   :  { %1198 = vrot.lane.b32.xlu1 %v3287_v24, %s3419_s6 }
 0xaf6   :  { %v3289_v26 = vpop.eup %3288 }
 0xaf7   :  { %v1192_v28 = vadd.f32 1.0, %v3289_v26 }
 0xaf9   :  { %3290 = vrcp.f32 %v1192_v28 }
 0xb06   :  { %v3291_v29 = vpop.eup %3290 }
 0xb07   :  { %v1196_v34 = vmul.f32 %v3291_v29, %v1096_v18 }
 0xb67   :  { %v1199_v30 = vpop.permute.xlu1 %1198 }
 0xb68   :  { %v1201_v32 = vmul.f32 %v3291_v29, %v1199_v30 }
 0xb6a   :  { %1203 = vrot.lane.b32.xlu0 %v1201_v32, %s3418_s28 }
 0xbdc   :  { %v1204_v33 = vpop.permute.xlu0 %1203 }
 0xbdd   :  { %v1206_v35 = vadd.f32 %v1204_v33, %v1196_v34 }
 0xbdf   :  { %3292 = vtanh.f32 %v1206_v35 }
 0xbec   :  { %v3293_v57 = vpop.eup %3292 }
 0xbed   :  { %1209 = vrot.lane.b32.xlu1 %v3293_v57, %s3419_s6 }
 0xc5f   :  { %v1210_v36 = vpop.permute.xlu1 %1209 }
 0xc60   :  { %v1212_v38 = vmul.f32 %v3291_v29, %v1210_v36 }
 0xc62   :  { %1214 = vrot.lane.b32.xlu0 %v1212_v38, %s3418_s28 }
 0xcd4   :  { %v1215_v39 = vpop.permute.xlu0 %1214 }
 0xcd5   :  { %1218 = vst.msk [vmem:[#allocation3 + $0x18] sm:$0xff] %vm886_vm5, %v1215_v39  ;;  %3061 = vmatmul.mubr.msk.f32.vlgmr.msra.gmra.mxu0 %vm779_vm3, %v1215_v39 }
 0xcd6   :  { %1220 = vst.msk [vmem:[#allocation3 + $0x20] sm:$0xff] %vm889_vm6, %v1215_v39  ;;  %3075 = vmatpush3.msra.mxu0 %v3947_v47  ;;  %3082 = vmatprep.mubr.msk.f32.mxu0 %vm3417_vm2, %v3410_v17 }
 0xcd7   :  { %3076 = vmatprep.subr.mxu0 %v3410_v17 }
 0xcd8   :  { %3077 = vmatpush3.msra.mxu0 %v3954_v0 }
 0xcd9   :  { %3078 = vmatprep.subr.mxu0 %v3410_v17 }
 0xcda   :  { %3079 = vmatpush3.msra.mxu0 %v3961_v48 }
 0xcdb   :  { %3080 = vmatprep.subr.mxu0 %v3410_v17 }
 0xcdc   :  { %3081 = vmatpush3.msra.mxu0 %v3968_v49 }
 0xcdd   :  { %3096 = vmatprep.subr.bf16.mxu0 %v3260_v9 }
 0xd95   :  { %v1292_v41 = vpop.f32.mrf.mxu0 }
 0xd96   :  { %v1296_v42 = vadd.f32 %v1292_v41, %v1223_v58 }
 0xd97   :  { %v3062_v43 = vpop.f32.mrf.mxu0 }
 0xd98   :  { %3294 = vtanh.f32 %v1296_v42  ;;  %v2882_v44 = vmul.f32 -1.442695, %v1296_v42 }
 0xd9a   :  { %3296 = vpow2.f32 %v2882_v44 }
 0xda5   :  { %v3295_v37 = vpop.eup %3294 }
 0xda6   :  { %1306 = vrot.lane.b32.xlu1 %v3295_v37, %s3419_s6 }
 0xda7   :  { %v3297_v61 = vpop.eup %3296 }
 0xda8   :  { %v1300_v60 = vadd.f32 1.0, %v3297_v61 }
 0xdaa   :  { %3298 = vrcp.f32 %v1300_v60 }
 0xdb7   :  { %v3299_v45 = vpop.eup %3298 }
 0xdb8   :  { %v1304_v52 = vmul.f32 %v3299_v45, %v1206_v35 }
 0xe18   :  { %v1307_v46 = vpop.permute.xlu1 %1306 }
 0xe19   :  { %v1309_v51 = vmul.f32 %v3299_v45, %v1307_v46  ;;  %v4217_v46 = vld [vmem:[%s4538_s9 + $0x10] sm:$0xff] }
 0xe1b   :  { %1311 = vrot.lane.b32.xlu0 %v1309_v51, %s3418_s28  ;;  %v4223_v51 = vld [vmem:[%s4538_s9 + $0x8] sm:$0xff] }
 0xe8d   :  { %v1312_v53 = vpop.permute.xlu0 %1311 }
 0xe8e   :  { %v1314_v56 = vadd.f32 %v1312_v53, %v1304_v52  ;;  %v4229_v52 = vld [vmem:[%s4538_s9] sm:$0xff] }
 0xe8f   :  { %v2897_v53 = vld [vmem:[%s4539_s11 + $0x1] ss:$0 sm:$0xff] }
 0xe90   :  { %3300 = vtanh.f32 %v1314_v56 }
 0xe9d   :  { %v3301_v50 = vpop.eup %3300 }
 0xe9e   :  { %1317 = vrot.lane.b32.xlu1 %v3301_v50, %s3419_s6 }
 0xf10   :  { %v1318_v55 = vpop.permute.xlu1 %1317 }
 0xf11   :  { %v1320_v58 = vmul.f32 %v3299_v45, %v1318_v55  ;;  %v4210_v45 = vld [vmem:[%s4538_s9 + $0x18] sm:$0xff] }
 0xf13   :  { %1322 = vrot.lane.b32.xlu0 %v1320_v58, %s3418_s28 }
 0xf85   :  { %v1323_v59 = vpop.permute.xlu0 %1322 }
 0xf86   :  { %1325 = vst.msk [vmem:[#allocation3 + $0x20] sm:$0xff] %vm886_vm5, %v1323_v59  ;;  %3072 = vmatmul.mubr.msk.f32.vlgmr.msra.gmra.mxu1 %vm779_vm3, %v1323_v59 }
 0xf87   :  { %1326 = vst.msk [vmem:[#allocation3 + $0x18] sm:$0xff] %vm889_vm6, %v1323_v59  ;;  %3086 = vmatpush3.msra.mxu1 %v3947_v47  ;;  %3093 = vmatprep.mubr.msk.f32.mxu1 %vm3417_vm2, %v3410_v17 }
 0xf88   :  { %3087 = vmatprep.subr.mxu1 %v3410_v17 }
 0xf89   :  { %3088 = vmatpush3.msra.mxu1 %v3954_v0 }
 0xf8a   :  { %3089 = vmatprep.subr.mxu1 %v3410_v17 }
 0xf8b   :  { %3090 = vmatpush3.msra.mxu1 %v3961_v48 }
 0xf8c   :  { %3091 = vmatprep.subr.mxu1 %v3410_v17 }
 0xf8d   :  { %3092 = vmatpush3.msra.mxu1 %v3968_v49 }
 0xf8e   :  { %3108 = vmatprep.subr.mxu1 %v3410_v17 }
0x1046   :  { %v1398_v63 = vpop.f32.mrf.mxu1 }
0x1047   :  { %v1402_v47 = vadd.f32 %v1398_v63, %v1329_v2 }
0x1048   :  { %v3073_v27 = vpop.f32.mrf.mxu1 }
0x1049   :  { %3302 = vtanh.f32 %v1402_v47  ;;  %v2884_v4 = vmul.f32 -1.442695, %v1402_v47  ;;  %v1648_v27 = vld [vmem:[#allocation3 + $0x18] sm:$0xff] }
0x104b   :  { %3304 = vpow2.f32 %v2884_v4  ;;  %v1649_v4 = vld [vmem:[#allocation3 + $0x20] sm:$0xff] }
0x1056   :  { %v3303_v0 = vpop.eup %3302 }
0x1057   :  { %1412 = vrot.lane.b32.xlu1 %v3303_v0, %s3419_s6 }
0x1058   :  { %v3305_v48 = vpop.eup %3304 }
0x1059   :  { %v1406_v5 = vadd.f32 1.0, %v3305_v48 }
0x105b   :  { %3306 = vrcp.f32 %v1406_v5 }
0x1068   :  { %v3307_v49 = vpop.eup %3306 }
0x1069   :  { %v1410_v12 = vmul.f32 %v3307_v49, %v1314_v56  ;;  %v2896_v56 = vld [vmem:[%s4539_s11] ss:$0 sm:$0xff] }
0x10c9   :  { %v1413_v7 = vpop.permute.xlu1 %1412 }
0x10ca   :  { %v1415_v10 = vmul.f32 %v3307_v49, %v1413_v7 }
0x10cc   :  { %1417 = vrot.lane.b32.xlu0 %v1415_v10, %s3418_s28 }
0x113e   :  { %v1418_v14 = vpop.permute.xlu0 %1417 }
0x113f   :  { %v1420_v15 = vadd.f32 %v1418_v14, %v1410_v12  ;;  %v2889_v14 = vld [vmem:[%s4540_s10] ss:$0 sm:$0xff] }
0x1141   :  { %3308 = vtanh.f32 %v1420_v15 }
0x114e   :  { %v3309_v40 = vpop.eup %3308 }
0x114f   :  { %1423 = vrot.lane.b32.xlu1 %v3309_v40, %s3419_s6 }
0x11c1   :  { %v1424_v11 = vpop.permute.xlu1 %1423 }
0x11c2   :  { %v1426_v2 = vmul.f32 %v3307_v49, %v1424_v11 }
0x11c4   :  { %1428 = vrot.lane.b32.xlu0 %v1426_v2, %s3418_s28 }
0x1236   :  { %v1429_v16 = vpop.permute.xlu0 %1428 }
0x1237   :  { %1431 = vst.msk [vmem:[#allocation3 + $0x28] sm:$0xff] %vm886_vm5, %v1429_v16  ;;  %3083 = vmatmul.mubr.msk.f32.vlgmr.msra.gmra.mxu0 %vm779_vm3, %v1429_v16 }
0x1238   :  { %1432 = vst.msk [vmem:[#allocation3 + $0x10] sm:$0xff] %vm889_vm6, %v1429_v16  ;;  %3097 = vmatpush3.bf16.msra.mxu0 %v3260_v9 }
0x123e   :  { %v1650_v63 = vld [vmem:[#allocation3 + $0x28] sm:$0xff] }
0x123f   :  { %v1647_v55 = vld [vmem:[#allocation3 + $0x10] sm:$0xff]  ;;  %v1655_v48 = vpack.c.bf16 %v1650_v63, %v1649_v4 }
0x1240   :  { %v1654_v0 = vpack.c.bf16 %v1648_v27, %v1647_v55 }
0x12f7   :  { %v1504_v18 = vpop.f32.mrf.mxu0 }
0x12f8   :  { %v1508_v1 = vadd.f32 %v1504_v18, %v1435_v6 }
0x12f9   :  { %v3084_v19 = vpop.f32.mrf.mxu0 }
0x12fa   :  { %3310 = vtanh.f32 %v1508_v1  ;;  %v2886_v21 = vmul.f32 -1.442695, %v1508_v1 }
0x12fc   :  { %3312 = vpow2.f32 %v2886_v21 }
0x1307   :  { %v3311_v20 = vpop.eup %3310 }
0x1308   :  { %1518 = vrot.lane.b32.xlu1 %v3311_v20, %s3419_s6 }
0x1309   :  { %v3313_v31 = vpop.eup %3312 }
0x130a   :  { %v1512_v22 = vadd.f32 1.0, %v3313_v31 }
0x130c   :  { %3314 = vrcp.f32 %v1512_v22 }
0x1319   :  { %v3315_v23 = vpop.eup %3314 }
0x131a   :  { %v1516_v26 = vmul.f32 %v3315_v23, %v1420_v15 }
0x137a   :  { %v1519_v24 = vpop.permute.xlu1 %1518 }
0x137b   :  { %v1521_v25 = vmul.f32 %v3315_v23, %v1519_v24 }
0x137d   :  { %1523 = vrot.lane.b32.xlu0 %v1521_v25, %s3418_s28 }
0x13ef   :  { %v1524_v28 = vpop.permute.xlu0 %1523 }
0x13f0   :  { %v1526_v29 = vadd.f32 %v1524_v28, %v1516_v26 }
0x13f2   :  { %3316 = vtanh.f32 %v1526_v29 }
0x13ff   :  { %v3317_v62 = vpop.eup %3316 }
0x1400   :  { %1529 = vrot.lane.b32.xlu1 %v3317_v62, %s3419_s6 }
0x1472   :  { %v1530_v3 = vpop.permute.xlu1 %1529 }
0x1473   :  { %v1532_v6 = vmul.f32 %v3315_v23, %v1530_v3 }
0x1475   :  { %1534 = vrot.lane.b32.xlu0 %v1532_v6, %s3418_s28 }
0x14e7   :  { %v1535_v30 = vpop.permute.xlu0 %1534 }
0x14e8   :  { %1537 = vst.msk [vmem:[#allocation3 + $0x30] sm:$0xff] %vm886_vm5, %v1535_v30  ;;  %3094 = vmatmul.mubr.msk.f32.vlgmr.msra.gmra.mxu1 %vm779_vm3, %v1535_v30 }
0x14e9   :  { %1538 = vst.msk [vmem:[#allocation3 + $0x8] sm:$0xff] %vm889_vm6, %v1535_v30  ;;  %3116 = vmatprep.mubr.msk.f32.mxu1 %vm3417_vm2, %v3410_v17  ;;  %3109 = vmatpush3.msra.mxu1 %v4210_v45 }
0x14ea   :  { %3110 = vmatprep.subr.mxu1 %v3410_v17 }
0x14eb   :  { %3111 = vmatpush3.msra.mxu1 %v4217_v46 }
0x14ec   :  { %3112 = vmatprep.subr.mxu1 %v3410_v17 }
0x14ed   :  { %3113 = vmatpush3.msra.mxu1 %v4223_v51 }
0x14ee   :  { %3114 = vmatprep.subr.mxu1 %v3410_v17 }
0x14ef   :  { %3115 = vmatpush3.msra.mxu1 %v4229_v52  ;;  %v1651_v49 = vld [vmem:[#allocation3 + $0x30] sm:$0xff] }
0x14f0   :  { %3117 = vmatmul.mubr.msk.f32.vlgmr.msra.gmra.mxu1 %vm779_vm3, %v2896_v56  ;;  %3119 = vmatprep.subr.mxu1 %v3410_v17  ;;  %v1646_v59 = vld [vmem:[#allocation3 + $0x8] sm:$0xff] }
0x14f1   :  { %3120 = vmatpush3.msra.mxu1 %v4210_v45  ;;  %3127 = vmatprep.mubr.msk.f32.mxu1 %vm3417_vm2, %v3410_v17 }
0x14f2   :  { %3121 = vmatprep.subr.mxu1 %v3410_v17 }
0x14f3   :  { %3122 = vmatpush3.msra.mxu1 %v4217_v46 }
0x14f4   :  { %3123 = vmatprep.subr.mxu1 %v3410_v17 }
0x14f5   :  { %3124 = vmatpush3.msra.mxu1 %v4223_v51 }
0x14f6   :  { %3125 = vmatprep.subr.mxu1 %v3410_v17 }
0x14f7   :  { %3126 = vmatpush3.msra.mxu1 %v4229_v52 }
0x14f8   :  { %3141 = vmatprep.subr.mxu1 %v3410_v17 }
0x15a8   :  { %v1610_v32 = vpop.f32.mrf.mxu1 }
0x15a9   :  { %v1614_v34 = vadd.f32 %v1610_v32, %v1541_v13  ;;  %v3261_v13 = vld [vmem:[%s4537_s8] sm:$0xff]  }
0x15aa   :  { %v3095_v33 = vpop.f32.mrf.mxu1  ;;  %3098 = vmatprep.subr.bf16.mxu0 %v3261_v13 }
0x15ab   :  { %3318 = vtanh.f32 %v1614_v34  ;;  %v2888_v57 = vmul.f32 -1.442695, %v1614_v34  ;;  %3099 = vmatpush3.bf16.msra.mxu0 %v3261_v13 }
0x15ac   :  { %3130 = vmatprep.subr.mxu0 %v3410_v17 }
0x15ad   :  { %3320 = vpow2.f32 %v2888_v57 }
0x15b0   :  { %v1851_v10 = vpop.f32.mrf.mxu1 }
0x15b2   :  { %v3118_v12 = vpop.f32.mrf.mxu1 }
0x15b8   :  { %v3319_v35 = vpop.eup %3318 }
0x15b9   :  { %1624 = vrot.lane.b32.xlu1 %v3319_v35, %s3419_s6 }
0x15ba   :  { %v3321_v36 = vpop.eup %3320 }
0x15bb   :  { %v1618_v38 = vadd.f32 1.0, %v3321_v36 }
0x15bd   :  { %3322 = vrcp.f32 %v1618_v38 }
0x15ca   :  { %v3323_v39 = vpop.eup %3322 }
0x15cb   :  { %v1622_v43 = vmul.f32 %v3323_v39, %v1526_v29 }
0x162b   :  { %v1625_v41 = vpop.permute.xlu1 %1624 }
0x162c   :  { %v1627_v42 = vmul.f32 %v3323_v39, %v1625_v41 }
0x162e   :  { %1629 = vrot.lane.b32.xlu0 %v1627_v42, %s3418_s28 }
0x16a0   :  { %v1630_v37 = vpop.permute.xlu0 %1629 }
0x16a1   :  { %v1632_v44 = vadd.f32 %v1630_v37, %v1622_v43 }
0x16a3   :  { %3324 = vtanh.f32 %v1632_v44 }
0x16b0   :  { %v3325_v8 = vpop.eup %3324 }
0x16b1   :  { %1635 = vrot.lane.b32.xlu1 %v3325_v8, %s3419_s6 }
0x1723   :  { %v1636_v61 = vpop.permute.xlu1 %1635 }
0x1724   :  { %v1638_v60 = vmul.f32 %v3323_v39, %v1636_v61 }
0x1726   :  { %1640 = vrot.lane.b32.xlu0 %v1638_v60, %s3418_s28 }
0x172a   :  { %1864 = vrot.lane.b32.xlu0 %v2897_v53, %s3418_s28 }
0x1798   :  { %v1641_v50 = vpop.permute.xlu0 %1640 }
0x1799   :  { %1643 = vst.msk [vmem:[#allocation3 + $0x38] sm:$0xff] %vm886_vm5, %v1641_v50 }
0x179a   :  { %1644 = vst.msk [vmem:[#allocation3] sm:$0xff] %vm889_vm6, %v1641_v50 }
0x179c   :  { %v1865_v43 = vpop.permute.xlu0 %1864 }
0x17a0   :  { %v1652_v5 = vld [vmem:[#allocation3 + $0x38] sm:$0xff] }
0x17a1   :  { %v1645_v58 = vld [vmem:[#allocation3] sm:$0xff]  ;;  %v1656_v7 = vpack.c.bf16 %v1652_v5, %v1651_v49 }
0x17a2   :  { %v1653_v47 = vpack.c.bf16 %v1646_v59, %v1645_v58 }
0x17a4   :  { %3100 = vmatprep.mubr.msk.bf16.mxu0 %vm779_vm3, %v1653_v47 }
0x17a5   :  { %3101 = vmatmul.mubr.msk.bf16.vlgmr.msra.gmra.mxu0 %vm779_vm3, %v1654_v0 }
0x17a6   :  { %3104 = vmatprep.mubr.msk.bf16.mxu0 %vm779_vm3, %v1655_v48  ;;  %3131 = vmatpush3.msra.mxu0 %v4210_v45 }
0x17a7   :  { %3132 = vmatprep.subr.mxu0 %v3410_v17 }
0x17a8   :  { %3133 = vmatpush3.msra.mxu0 %v4217_v46 }
0x17a9   :  { %3134 = vmatprep.subr.mxu0 %v3410_v17 }
0x17aa   :  { %3135 = vmatpush3.msra.mxu0 %v4223_v51 }
0x17ab   :  { %3136 = vmatprep.subr.mxu0 %v3410_v17 }
0x17ac   :  { %3137 = vmatpush3.msra.mxu0 %v4229_v52 }
0x17ad   :  { %3105 = vmatmul.mubr.msk.bf16.gmra.mxu0 %vm779_vm3, %v1656_v7  ;;  %3152 = vmatprep.subr.mxu0 %v3410_v17 }
0x17ae   :  { %3138 = vmatprep.mubr.msk.f32.mxu0 %vm3417_vm2, %v3410_v17 }
0x1865   :  { %v3102_v15 = vpop.f32.mrf.mxu0 }
0x1866   :  { %v4272_v40 = vadd.f32 %v3102_v15, %v2889_v14 }
0x1867   :  { %v1726_v11 = vpop.f32.mrf.mxu0 }
0x1868   :  { %v4290_v25 = vadd.f32 %v2889_v14, %v1726_v11 }
0x1869   :  { %v3103_v2 = vpop.f32.mrf.mxu0 }
0x186a   :  { %v4274_v16 = vadd.f32 %v3103_v2, %v2889_v14 }
0x186b   :  { %v1729_v18 = vpop.f32.mrf.mxu0 }
0x186c   :  { %v4276_v1 = vadd.f32 %v2889_v14, %v1729_v18 }
0x186d   :  { %v3106_v19 = vpop.f32.mrf.mxu0 }
0x186e   :  { %v4278_v20 = vadd.f32 %v3106_v19, %v2889_v14 }
0x186f   :  { %v1742_v21 = vpop.f32.mrf.mxu0 }
0x1870   :  { %v4280_v31 = vadd.f32 %v2889_v14, %v1742_v21  ;;  %v1892_v22 = vsel %vm4020_vm4, %v4276_v1, %v4278_v20  ;;  %v2422_v23 = vsel %vm4020_vm4, %v4278_v20, %v4276_v1 }
0x1871   :  { %v3107_v24 = vpop.f32.mrf.mxu0 }
0x1872   :  { %v4292_v26 = vadd.f32 %v3107_v24, %v2889_v14  ;;  %v2104_v28 = vsel %vm4020_vm4, %v4274_v16, %v4280_v31  ;;  %v2210_v29 = vsel %vm4020_vm4, %v4280_v31, %v4274_v16 }
0x1873   :  { %v1745_v62 = vpop.f32.mrf.mxu0 }
0x1874   :  { %v1781_v3 = vsel %vm4020_vm4, %v4290_v25, %v4292_v26  ;;  %v4306_v6 = vadd.f32 %v2889_v14, %v1745_v62  ;;  %v2528_v30 = vsel %vm4020_vm4, %v4292_v26, %v4290_v25 }
0x1875   :  { %v1855_v32 = vadd.f32 %v1851_v10, %v1781_v3 }
0x1876   :  { %v1998_v34 = vsel %vm4020_vm4, %v4272_v40, %v4306_v6  ;;  %v2316_v33 = vsel %vm4020_vm4, %v4306_v6, %v4272_v40 }
0x1877   :  { %3326 = vtanh.f32 %v1855_v32  ;;  %v2899_v57 = vmul.f32 -1.442695, %v1855_v32 }
0x1879   :  { %3328 = vpow2.f32 %v2899_v57 }
0x1884   :  { %v3327_v35 = vpop.eup %3326 }
0x1885   :  { %1869 = vrot.lane.b32.xlu1 %v3327_v35, %s3419_s6 }
0x1886   :  { %v3329_v36 = vpop.eup %3328 }
0x1887   :  { %v1859_v38 = vadd.f32 1.0, %v3329_v36 }
0x1889   :  { %3330 = vrcp.f32 %v1859_v38 }
0x1896   :  { %v3331_v39 = vpop.eup %3330 }
0x1897   :  { %v1867_v37 = vmul.f32 %v3331_v39, %v1865_v43 }
0x18f7   :  { %v1870_v41 = vpop.permute.xlu1 %1869 }
0x18f8   :  { %v1872_v42 = vmul.f32 %v3331_v39, %v1870_v41 }
0x18fa   :  { %1874 = vrot.lane.b32.xlu1 %v1872_v42, %s3418_s28 }
0x196c   :  { %v1875_v44 = vpop.permute.xlu1 %1874 }
0x196d   :  { %v1877_v8 = vadd.f32 %v1875_v44, %v1867_v37 }
0x196f   :  { %3332 = vtanh.f32 %v1877_v8 }
0x197c   :  { %v3333_v9 = vpop.eup %3332 }
0x197d   :  { %1880 = vrot.lane.b32.xlu0 %v3333_v9, %s3419_s6 }
0x19ef   :  { %v1881_v13 = vpop.permute.xlu0 %1880 }
0x19f0   :  { %v1883_v61 = vmul.f32 %v3331_v39, %v1881_v13 }
0x19f2   :  { %1885 = vrot.lane.b32.xlu1 %v1883_v61, %s3418_s28 }
0x1a64   :  { %v1886_v60 = vpop.permute.xlu1 %1885 }
0x1a65   :  { %1888 = vst.msk [vmem:[#allocation3] sm:$0xff] %vm886_vm5, %v1886_v60  ;;  %3128 = vmatmul.mubr.msk.f32.vlgmr.msra.gmra.mxu1 %vm779_vm3, %v1886_v60 }
0x1a66   :  { %1889 = vst.msk [vmem:[#allocation3 + $0x38] sm:$0xff] %vm889_vm6, %v1886_v60  ;;  %3142 = vmatpush3.msra.mxu1 %v4210_v45  ;;  %3149 = vmatprep.mubr.msk.f32.mxu1 %vm3417_vm2, %v3410_v17 }
0x1a67   :  { %3143 = vmatprep.subr.mxu1 %v3410_v17 }
0x1a68   :  { %3144 = vmatpush3.msra.mxu1 %v4217_v46 }
0x1a69   :  { %3145 = vmatprep.subr.mxu1 %v3410_v17 }
0x1a6a   :  { %3146 = vmatpush3.msra.mxu1 %v4223_v51 }
0x1a6b   :  { %3147 = vmatprep.subr.mxu1 %v3410_v17 }
0x1a6c   :  { %3148 = vmatpush3.msra.mxu1 %v4229_v52 }
0x1a6d   :  { %3163 = vmatprep.subr.mxu1 %v3410_v17 }
0x1b25   :  { %v1961_v53 = vpop.f32.mrf.mxu1 }
0x1b26   :  { %v1965_v56 = vadd.f32 %v1961_v53, %v1892_v22 }
0x1b27   :  { %v3129_v50 = vpop.f32.mrf.mxu1 }
0x1b28   :  { %3334 = vtanh.f32 %v1965_v56  ;;  %v2901_v58 = vmul.f32 -1.442695, %v1965_v56 }
0x1b2a   :  { %3336 = vpow2.f32 %v2901_v58 }
0x1b35   :  { %v3335_v55 = vpop.eup %3334 }
0x1b36   :  { %1975 = vrot.lane.b32.xlu0 %v3335_v55, %s3419_s6 }
0x1b37   :  { %v3337_v59 = vpop.eup %3336 }
0x1b38   :  { %v1969_v63 = vadd.f32 1.0, %v3337_v59 }
0x1b3a   :  { %3338 = vrcp.f32 %v1969_v63 }
0x1b47   :  { %v3339_v47 = vpop.eup %3338 }
0x1b48   :  { %v1973_v4 = vmul.f32 %v3339_v47, %v1877_v8 }
0x1ba8   :  { %v1976_v27 = vpop.permute.xlu0 %1975 }
0x1ba9   :  { %v1978_v0 = vmul.f32 %v3339_v47, %v1976_v27 }
0x1bab   :  { %1980 = vrot.lane.b32.xlu1 %v1978_v0, %s3418_s28 }
0x1c1d   :  { %v1981_v48 = vpop.permute.xlu1 %1980 }
0x1c1e   :  { %v1983_v5 = vadd.f32 %v1981_v48, %v1973_v4 }
0x1c20   :  { %3340 = vtanh.f32 %v1983_v5 }
0x1c2d   :  { %v3341_v49 = vpop.eup %3340 }
0x1c2e   :  { %1986 = vrot.lane.b32.xlu0 %v3341_v49, %s3419_s6 }
0x1ca0   :  { %v1987_v7 = vpop.permute.xlu0 %1986 }
0x1ca1   :  { %v1989_v10 = vmul.f32 %v3339_v47, %v1987_v7 }
0x1ca3   :  { %1991 = vrot.lane.b32.xlu1 %v1989_v10, %s3418_s28 }
0x1d15   :  { %v1992_v12 = vpop.permute.xlu1 %1991 }
0x1d16   :  { %1994 = vst.msk [vmem:[#allocation3 + $0x8] sm:$0xff] %vm886_vm5, %v1992_v12  ;;  %3139 = vmatmul.mubr.msk.f32.vlgmr.msra.gmra.mxu0 %vm779_vm3, %v1992_v12 }
0x1d17   :  { %1995 = vst.msk [vmem:[#allocation3 + $0x30] sm:$0xff] %vm889_vm6, %v1992_v12  ;;  %3153 = vmatpush3.msra.mxu0 %v4210_v45  ;;  %3160 = vmatprep.mubr.msk.f32.mxu0 %vm3417_vm2, %v3410_v17 }
0x1d18   :  { %3154 = vmatprep.subr.mxu0 %v3410_v17 }
0x1d19   :  { %3155 = vmatpush3.msra.mxu0 %v4217_v46 }
0x1d1a   :  { %3156 = vmatprep.subr.mxu0 %v3410_v17 }
0x1d1b   :  { %3157 = vmatpush3.msra.mxu0 %v4223_v51 }
0x1d1c   :  { %3158 = vmatprep.subr.mxu0 %v3410_v17 }
0x1d1d   :  { %3159 = vmatpush3.msra.mxu0 %v4229_v52 }
0x1d1e   :  { %3174 = vmatprep.subr.mxu0 %v3410_v17 }
0x1dd6   :  { %v2067_v14 = vpop.f32.mrf.mxu0 }
0x1dd7   :  { %v2071_v15 = vadd.f32 %v2067_v14, %v1998_v34 }
0x1dd8   :  { %v3140_v11 = vpop.f32.mrf.mxu0 }
0x1dd9   :  { %3342 = vtanh.f32 %v2071_v15  ;;  %v2903_v18 = vmul.f32 -1.442695, %v2071_v15 }
0x1ddb   :  { %3344 = vpow2.f32 %v2903_v18 }
0x1de6   :  { %v3343_v2 = vpop.eup %3342 }
0x1de7   :  { %2081 = vrot.lane.b32.xlu0 %v3343_v2, %s3419_s6 }
0x1de8   :  { %v3345_v19 = vpop.eup %3344 }
0x1de9   :  { %v2075_v21 = vadd.f32 1.0, %v3345_v19 }
0x1deb   :  { %3346 = vrcp.f32 %v2075_v21 }
0x1df8   :  { %v3347_v22 = vpop.eup %3346 }
0x1df9   :  { %v2079_v3 = vmul.f32 %v3347_v22, %v1983_v5 }
0x1e59   :  { %v2082_v24 = vpop.permute.xlu0 %2081 }
0x1e5a   :  { %v2084_v62 = vmul.f32 %v3347_v22, %v2082_v24 }
0x1e5c   :  { %2086 = vrot.lane.b32.xlu1 %v2084_v62, %s3418_s28 }
0x1ece   :  { %v2087_v32 = vpop.permute.xlu1 %2086 }
0x1ecf   :  { %v2089_v35 = vadd.f32 %v2087_v32, %v2079_v3 }
0x1ed1   :  { %3348 = vtanh.f32 %v2089_v35 }
0x1ede   :  { %v3349_v34 = vpop.eup %3348 }
0x1edf   :  { %2092 = vrot.lane.b32.xlu0 %v3349_v34, %s3419_s6 }
0x1f51   :  { %v2093_v57 = vpop.permute.xlu0 %2092 }
0x1f52   :  { %v2095_v36 = vmul.f32 %v3347_v22, %v2093_v57 }
0x1f54   :  { %2097 = vrot.lane.b32.xlu1 %v2095_v36, %s3418_s28 }
0x1fc6   :  { %v2098_v38 = vpop.permute.xlu1 %2097 }
0x1fc7   :  { %2100 = vst.msk [vmem:[#allocation3 + $0x10] sm:$0xff] %vm886_vm5, %v2098_v38  ;;  %3150 = vmatmul.mubr.msk.f32.vlgmr.msra.gmra.mxu1 %vm779_vm3, %v2098_v38 }
0x1fc8   :  { %2101 = vst.msk [vmem:[#allocation3 + $0x28] sm:$0xff] %vm889_vm6, %v2098_v38  ;;  %3164 = vmatpush3.msra.mxu1 %v4210_v45  ;;  %3171 = vmatprep.mubr.msk.f32.mxu1 %vm3417_vm2, %v3410_v17 }
0x1fc9   :  { %3165 = vmatprep.subr.mxu1 %v3410_v17 }
0x1fca   :  { %3166 = vmatpush3.msra.mxu1 %v4217_v46 }
0x1fcb   :  { %3167 = vmatprep.subr.mxu1 %v3410_v17 }
0x1fcc   :  { %3168 = vmatpush3.msra.mxu1 %v4223_v51 }
0x1fcd   :  { %3169 = vmatprep.subr.mxu1 %v3410_v17 }
0x1fce   :  { %3170 = vmatpush3.msra.mxu1 %v4229_v52 }
0x1fcf   :  { %3185 = vmatprep.subr.mxu1 %v3410_v17 }
0x2087   :  { %v2173_v39 = vpop.f32.mrf.mxu1 }
0x2088   :  { %v2177_v41 = vadd.f32 %v2173_v39, %v2104_v28 }
0x2089   :  { %v3151_v42 = vpop.f32.mrf.mxu1 }
0x208a   :  { %3350 = vtanh.f32 %v2177_v41  ;;  %v2905_v37 = vmul.f32 -1.442695, %v2177_v41 }
0x208c   :  { %3352 = vpow2.f32 %v2905_v37 }
0x2097   :  { %v3351_v43 = vpop.eup %3350 }
0x2098   :  { %2187 = vrot.lane.b32.xlu0 %v3351_v43, %s3419_s6 }
0x2099   :  { %v3353_v44 = vpop.eup %3352 }
0x209a   :  { %v2181_v8 = vadd.f32 1.0, %v3353_v44 }
0x209c   :  { %3354 = vrcp.f32 %v2181_v8 }
0x20a9   :  { %v3355_v9 = vpop.eup %3354 }
0x20aa   :  { %v2185_v60 = vmul.f32 %v3355_v9, %v2089_v35 }
0x210a   :  { %v2188_v13 = vpop.permute.xlu0 %2187 }
0x210b   :  { %v2190_v61 = vmul.f32 %v3355_v9, %v2188_v13 }
0x210d   :  { %2192 = vrot.lane.b32.xlu1 %v2190_v61, %s3418_s28 }
0x217f   :  { %v2193_v53 = vpop.permute.xlu1 %2192 }
0x2180   :  { %v2195_v56 = vadd.f32 %v2193_v53, %v2185_v60 }
0x2182   :  { %3356 = vtanh.f32 %v2195_v56 }
0x218f   :  { %v3357_v28 = vpop.eup %3356 }
0x2190   :  { %2198 = vrot.lane.b32.xlu0 %v3357_v28, %s3419_s6 }
0x2202   :  { %v2199_v50 = vpop.permute.xlu0 %2198 }
0x2203   :  { %v2201_v55 = vmul.f32 %v3355_v9, %v2199_v50 }
0x2205   :  { %2203 = vrot.lane.b32.xlu1 %v2201_v55, %s3418_s28 }
0x2277   :  { %v2204_v58 = vpop.permute.xlu1 %2203 }
0x2278   :  { %2206 = vst.msk [vmem:[#allocation3 + $0x18] sm:$0xff] %vm886_vm5, %v2204_v58  ;;  %3161 = vmatmul.mubr.msk.f32.vlgmr.msra.gmra.mxu0 %vm779_vm3, %v2204_v58 }
0x2279   :  { %2207 = vst.msk [vmem:[#allocation3 + $0x20] sm:$0xff] %vm889_vm6, %v2204_v58  ;;  %3175 = vmatpush3.msra.mxu0 %v4210_v45  ;;  %3182 = vmatprep.mubr.msk.f32.mxu0 %vm3417_vm2, %v3410_v17 }
0x227a   :  { %3176 = vmatprep.subr.mxu0 %v3410_v17 }
0x227b   :  { %3177 = vmatpush3.msra.mxu0 %v4217_v46 }
0x227c   :  { %3178 = vmatprep.subr.mxu0 %v3410_v17 }
0x227d   :  { %3179 = vmatpush3.msra.mxu0 %v4223_v51 }
0x227e   :  { %3180 = vmatprep.subr.mxu0 %v3410_v17 }
0x227f   :  { %3181 = vmatpush3.msra.mxu0 %v4229_v52 }
0x2280   :  { %3196 = vmatprep.subr.mxu0 %v3410_v17 }
0x2338   :  { %v2279_v59 = vpop.f32.mrf.mxu0 }
0x2339   :  { %v2283_v63 = vadd.f32 %v2279_v59, %v2210_v29 }
0x233a   :  { %v3162_v47 = vpop.f32.mrf.mxu0 }
0x233b   :  { %3358 = vtanh.f32 %v2283_v63  ;;  %v2907_v0 = vmul.f32 -1.442695, %v2283_v63 }
0x233d   :  { %3360 = vpow2.f32 %v2907_v0 }
0x2348   :  { %v3359_v27 = vpop.eup %3358 }
0x2349   :  { %2293 = vrot.lane.b32.xlu0 %v3359_v27, %s3419_s6 }
0x234a   :  { %v3361_v4 = vpop.eup %3360 }
0x234b   :  { %v2287_v48 = vadd.f32 1.0, %v3361_v4 }
0x234d   :  { %3362 = vrcp.f32 %v2287_v48 }
0x235a   :  { %v3363_v5 = vpop.eup %3362 }
0x235b   :  { %v2291_v10 = vmul.f32 %v3363_v5, %v2195_v56 }
0x23bb   :  { %v2294_v49 = vpop.permute.xlu0 %2293 }
0x23bc   :  { %v2296_v7 = vmul.f32 %v3363_v5, %v2294_v49 }
0x23be   :  { %2298 = vrot.lane.b32.xlu1 %v2296_v7, %s3418_s28 }
0x2430   :  { %v2299_v12 = vpop.permute.xlu1 %2298 }
0x2431   :  { %v2301_v14 = vadd.f32 %v2299_v12, %v2291_v10 }
0x2433   :  { %3364 = vtanh.f32 %v2301_v14 }
0x2440   :  { %v3365_v16 = vpop.eup %3364 }
0x2441   :  { %2304 = vrot.lane.b32.xlu0 %v3365_v16, %s3419_s6 }
0x24b3   :  { %v2305_v31 = vpop.permute.xlu0 %2304 }
0x24b4   :  { %v2307_v29 = vmul.f32 %v3363_v5, %v2305_v31 }
0x24b6   :  { %2309 = vrot.lane.b32.xlu1 %v2307_v29, %s3418_s28 }
0x2528   :  { %v2310_v15 = vpop.permute.xlu1 %2309 }
0x2529   :  { %2312 = vst.msk [vmem:[#allocation3 + $0x20] sm:$0xff] %vm886_vm5, %v2310_v15  ;;  %3172 = vmatmul.mubr.msk.f32.vlgmr.msra.gmra.mxu1 %vm779_vm3, %v2310_v15 }
0x252a   :  { %2313 = vst.msk [vmem:[#allocation3 + $0x18] sm:$0xff] %vm889_vm6, %v2310_v15  ;;  %3186 = vmatpush3.msra.mxu1 %v4210_v45  ;;  %3193 = vmatprep.mubr.msk.f32.mxu1 %vm3417_vm2, %v3410_v17 }
0x252b   :  { %3187 = vmatprep.subr.mxu1 %v3410_v17 }
0x252c   :  { %3188 = vmatpush3.msra.mxu1 %v4217_v46 }
0x252d   :  { %3189 = vmatprep.subr.mxu1 %v3410_v17 }
0x252e   :  { %3190 = vmatpush3.msra.mxu1 %v4223_v51 }
0x252f   :  { %3191 = vmatprep.subr.mxu1 %v3410_v17 }
0x2530   :  { %3192 = vmatpush3.msra.mxu1 %v4229_v52  ;;  %v4472_v15 = vld [vmem:[#allocation3 + $0x20] sm:$0xff] }
0x2531   :  { %v4459_v4 = vld [vmem:[#allocation3 + $0x18] sm:$0xff] }
0x25e9   :  { %v2385_v11 = vpop.f32.mrf.mxu1 }
0x25ea   :  { %v2389_v45 = vadd.f32 %v2385_v11, %v2316_v33 }
0x25eb   :  { %v3173_v2 = vpop.f32.mrf.mxu1 }
0x25ec   :  { %3366 = vtanh.f32 %v2389_v45  ;;  %v2909_v46 = vmul.f32 -1.442695, %v2389_v45 }
0x25ee   :  { %3368 = vpow2.f32 %v2909_v46 }
0x25f9   :  { %v3367_v18 = vpop.eup %3366 }
0x25fa   :  { %2399 = vrot.lane.b32.xlu0 %v3367_v18, %s3419_s6 }
0x25fb   :  { %v3369_v19 = vpop.eup %3368 }
0x25fc   :  { %v2393_v51 = vadd.f32 1.0, %v3369_v19 }
0x25fe   :  { %3370 = vrcp.f32 %v2393_v51 }
0x260b   :  { %v3371_v21 = vpop.eup %3370 }
0x260c   :  { %v2397_v24 = vmul.f32 %v3371_v21, %v2301_v14 }
0x266c   :  { %v2400_v22 = vpop.permute.xlu0 %2399 }
0x266d   :  { %v2402_v52 = vmul.f32 %v3371_v21, %v2400_v22 }
0x266f   :  { %2404 = vrot.lane.b32.xlu1 %v2402_v52, %s3418_s28 }
0x26e1   :  { %v2405_v62 = vpop.permute.xlu1 %2404 }
0x26e2   :  { %v2407_v3 = vadd.f32 %v2405_v62, %v2397_v24 }
0x26e4   :  { %3372 = vtanh.f32 %v2407_v3 }
0x26f1   :  { %v3373_v40 = vpop.eup %3372 }
0x26f2   :  { %2410 = vrot.lane.b32.xlu0 %v3373_v40, %s3419_s6  ;;  %v2752_v40 = vld [vmem:[%s4542_s13 + $0x18] sm:$0xff] }
0x2764   :  { %v2411_v6 = vpop.permute.xlu0 %2410 }
0x2765   :  { %v2413_v33 = vmul.f32 %v3371_v21, %v2411_v6  ;;  %v2751_v6 = vld [vmem:[%s4542_s13 + $0x10] sm:$0xff] }
0x2767   :  { %2415 = vrot.lane.b32.xlu1 %v2413_v33, %s3418_s28  ;;  %v2750_v33 = vld [vmem:[%s4542_s13 + $0x8] sm:$0xff] }
0x27d9   :  { %v2416_v32 = vpop.permute.xlu1 %2415 }
0x27da   :  { %2418 = vst.msk [vmem:[#allocation3 + $0x28] sm:$0xff] %vm886_vm5, %v2416_v32  ;;  %3183 = vmatmul.mubr.msk.f32.vlgmr.msra.gmra.mxu0 %vm779_vm3, %v2416_v32 }
0x27db   :  { %2419 = vst.msk [vmem:[#allocation3 + $0x10] sm:$0xff] %vm889_vm6, %v2416_v32  ;;  %3204 = vmatprep.mubr.msk.f32.mxu0 %vm3417_vm2, %v3410_v17  ;;  %3197 = vmatpush3.msra.mxu0 %v2752_v40  ;;  %v2749_v32 = vld [vmem:[%s4542_s13] sm:$0xff] }
0x27dc   :  { %3198 = vmatprep.subr.mxu0 %v3410_v17 }
0x27dd   :  { %3199 = vmatpush3.msra.mxu0 %v2751_v6 }
0x27de   :  { %3200 = vmatprep.subr.mxu0 %v3410_v17 }
0x27df   :  { %3201 = vmatpush3.msra.mxu0 %v2750_v33 }
0x27e0   :  { %3202 = vmatprep.subr.mxu0 %v3410_v17 }
0x27e1   :  { %v4463_v49 = vld [vmem:[#allocation3 + $0x28] sm:$0xff]  ;;  %3203 = vmatpush3.msra.mxu0 %v2749_v32 }
0x27e2   :  { %v4453_v26 = vld [vmem:[#allocation3 + $0x10] sm:$0xff] }
0x289a   :  { %v2491_v35 = vpop.f32.mrf.mxu0 }
0x289b   :  { %v2495_v34 = vadd.f32 %v2491_v35, %v2422_v23 }
0x289c   :  { %v3184_v57 = vpop.f32.mrf.mxu0 }
0x289d   :  { %3374 = vtanh.f32 %v2495_v34  ;;  %v2911_v38 = vmul.f32 -1.442695, %v2495_v34 }
0x289f   :  { %3376 = vpow2.f32 %v2911_v38 }
0x28aa   :  { %v3375_v36 = vpop.eup %3374 }
0x28ab   :  { %2505 = vrot.lane.b32.xlu0 %v3375_v36, %s3419_s6 }
0x28ac   :  { %v3377_v39 = vpop.eup %3376 }
0x28ad   :  { %v2499_v41 = vadd.f32 1.0, %v3377_v39 }
0x28af   :  { %3378 = vrcp.f32 %v2499_v41 }
0x28bc   :  { %v3379_v42 = vpop.eup %3378 }
0x28bd   :  { %v2503_v44 = vmul.f32 %v3379_v42, %v2407_v3 }
0x291d   :  { %v2506_v43 = vpop.permute.xlu0 %2505 }
0x291e   :  { %v2508_v37 = vmul.f32 %v3379_v42, %v2506_v43 }
0x2920   :  { %2510 = vrot.lane.b32.xlu1 %v2508_v37, %s3418_s28 }
0x2992   :  { %v2511_v8 = vpop.permute.xlu1 %2510 }
0x2993   :  { %v2513_v9 = vadd.f32 %v2511_v8, %v2503_v44 }
0x2995   :  { %3380 = vtanh.f32 %v2513_v9 }
0x29a2   :  { %v3381_v1 = vpop.eup %3380 }
0x29a3   :  { %2516 = vrot.lane.b32.xlu0 %v3381_v1, %s3419_s6 }
0x2a15   :  { %v2517_v20 = vpop.permute.xlu0 %2516 }
0x2a16   :  { %v2519_v23 = vmul.f32 %v3379_v42, %v2517_v20 }
0x2a18   :  { %2521 = vrot.lane.b32.xlu1 %v2519_v23, %s3418_s28 }
0x2a8a   :  { %v2522_v13 = vpop.permute.xlu1 %2521 }
0x2a8b   :  { %2524 = vst.msk [vmem:[#allocation3 + $0x30] sm:$0xff] %vm886_vm5, %v2522_v13  ;;  %3194 = vmatmul.mubr.msk.f32.vlgmr.msra.gmra.mxu1 %vm779_vm3, %v2522_v13 }
0x2a8c   :  { %2525 = vst.msk [vmem:[#allocation3 + $0x8] sm:$0xff] %vm889_vm6, %v2522_v13 }
0x2a92   :  { %v4476_v2 = vld [vmem:[#allocation3 + $0x30] sm:$0xff] }
0x2a93   :  { %v4469_v31 = vld [vmem:[#allocation3 + $0x8] sm:$0xff] }
0x2b4b   :  { %v2597_v61 = vpop.f32.mrf.mxu1 }
0x2b4c   :  { %v2601_v60 = vadd.f32 %v2597_v61, %v2528_v30  ;;  %v2914_v30 = vld [vmem:[%s4541_s12] ss:$0 sm:$0xff] }
0x2b4d   :  { %v3195_v53 = vpop.f32.mrf.mxu1  ;;  %v2649_v0 = vmul.f32 %v2914_v30, %v4453_v26  ;;  %v2650_v5 = vmul.f32 %v2914_v30, %v4459_v4  ;;  %v2652_v10 = vmul.f32 %v2914_v30, %v4463_v49  ;;  %v2648_v29 = vmul.f32 %v2914_v30, %v4469_v31 }
0x2b4e   :  { %3382 = vtanh.f32 %v2601_v60  ;;  %v2913_v28 = vmul.f32 -1.442695, %v2601_v60  ;;  %v2651_v45 = vmul.f32 %v2914_v30, %v4472_v15  ;;  %v2653_v46 = vmul.f32 %v2914_v30, %v4476_v2 }
0x2b4f   :  { %v2661_v48 = vsel %vm779_vm3, %v2649_v0, 0.0  ;;  %v2664_v7 = vsel %vm779_vm3, %v2650_v5, 0.0  ;;  %v2670_v12 = vsel %vm779_vm3, %v2652_v10, 0.0  ;;  %v2658_v11 = vsel %vm779_vm3, %v2648_v29, 0.0 }
0x2b50   :  { %3384 = vpow2.f32 %v2913_v28  ;;  %v2667_v18 = vsel %vm779_vm3, %v2651_v45, 0.0  ;;  %v2673_v19 = vsel %vm779_vm3, %v2653_v46, 0.0 }
0x2b5b   :  { %v3383_v56 = vpop.eup %3382 }
0x2b5c   :  { %2611 = vrot.lane.b32.xlu0 %v3383_v56, %s3419_s6 }
0x2b5d   :  { %v3385_v50 = vpop.eup %3384 }
0x2b5e   :  { %v2605_v55 = vadd.f32 1.0, %v3385_v50 }
0x2b60   :  { %3386 = vrcp.f32 %v2605_v55 }
0x2b6d   :  { %v3387_v58 = vpop.eup %3386 }
0x2b6e   :  { %v2609_v54 = vmul.f32 %v3387_v58, %v2513_v9 }
0x2bce   :  { %v2612_v59 = vpop.permute.xlu0 %2611 }
0x2bcf   :  { %v2614_v63 = vmul.f32 %v3387_v58, %v2612_v59 }
0x2bd1   :  { %2616 = vrot.lane.b32.xlu1 %v2614_v63, %s3418_s28 }
0x2c43   :  { %v2617_v47 = vpop.permute.xlu1 %2616 }
0x2c44   :  { %v2619_v27 = vadd.f32 %v2617_v47, %v2609_v54 }
0x2c46   :  { %3388 = vtanh.f32 %v2619_v27 }
0x2c53   :  { %v3389_v25 = vpop.eup %3388 }
0x2c54   :  { %2622 = vrot.lane.b32.xlu0 %v3389_v25, %s3419_s6 }
0x2c73   :  { %2662 = vadd.xlane.f32.xlu0 %v2661_v48 }
0x2c77   :  { %2665 = vadd.xlane.f32.xlu0 %v2664_v7 }
0x2c7b   :  { %2671 = vadd.xlane.f32.xlu0 %v2670_v12 }
0x2cc6   :  { %v2623_v14 = vpop.permute.xlu0 %2622 }
0x2cc7   :  { %v2625_v16 = vmul.f32 %v3387_v58, %v2623_v14 }
0x2cc9   :  { %2627 = vrot.lane.b32.xlu1 %v2625_v16, %s3418_s28 }
0x2ced   :  { %2659 = vadd.xlane.f32.xlu1 %v2658_v11 }
0x2cf1   :  { %2668 = vadd.xlane.f32.xlu1 %v2667_v18 }
0x2cf5   :  { %2674 = vadd.xlane.f32.xlu1 %v2673_v19 }
0x2cfc   :  { %v2663_v35 = vpop.xlane.xlu0 %2662 }
0x2d00   :  { %v2666_v34 = vpop.xlane.xlu0 %2665 }
0x2d04   :  { %v2672_v36 = vpop.xlane.xlu0 %2671 }
0x2d3b   :  { %v2628_v51 = vpop.permute.xlu1 %2627 }
0x2d3c   :  { %2630 = vst.msk [vmem:[#allocation3 + $0x38] sm:$0xff] %vm886_vm5, %v2628_v51 }
0x2d3d   :  { %2631 = vst.msk [vmem:[#allocation3] sm:$0xff] %vm889_vm6, %v2628_v51 }
0x2d43   :  { %v4485_v22 = vld [vmem:[#allocation3 + $0x38] sm:$0xff] }
0x2d44   :  { %v4483_v21 = vld [vmem:[#allocation3] sm:$0xff]  ;;  %v2654_v62 = vmul.f32 %v2914_v30, %v4485_v22 }
0x2d45   :  { %v2647_v52 = vmul.f32 %v2914_v30, %v4483_v21 }
0x2d46   :  { %v2676_v3 = vsel %vm779_vm3, %v2654_v62, 0.0 }
0x2d47   :  { %v2655_v24 = vsel %vm779_vm3, %v2647_v52, 0.0 }
0x2d48   :  { %2656 = vadd.xlane.f32.xlu0 %v2655_v24 }
0x2d4c   :  { %2677 = vadd.xlane.f32.xlu0 %v2676_v3 }
0x2d76   :  { %v2660_v57 = vpop.xlane.xlu1 %2659 }
0x2d77   :  { %v2680_v37 = vmax.f32 %v2660_v57, %v2672_v36 }
0x2d7a   :  { %v2669_v38 = vpop.xlane.xlu1 %2668 }
0x2d7e   :  { %v2675_v41 = vpop.xlane.xlu1 %2674 }
0x2d7f   :  { %v2681_v44 = vmax.f32 %v2663_v35, %v2675_v41 }
0x2dd1   :  { %v2657_v39 = vpop.xlane.xlu0 %2656 }
0x2dd2   :  { %v2679_v42 = vmax.f32 %v2657_v39, %v2669_v38 }
0x2dd4   :  { %v2683_v9 = vmax.f32 %v2679_v42, %v2680_v37 }
0x2dd5   :  { %v2678_v43 = vpop.xlane.xlu0 %2677 }
0x2dd6   :  { %v2682_v8 = vmax.f32 %v2666_v34, %v2678_v43 }
0x2dd8   :  { %v2684_v1 = vmax.f32 %v2681_v44, %v2682_v8 }
0x2dda   :  { %v2685_v20 = vmax.f32 %v2683_v9, %v2684_v1 }
0x2ddc   :  { %v2686_v23 = vsub.f32 %v2657_v39, %v2685_v20  ;;  %v2687_v13 = vsub.f32 %v2660_v57, %v2685_v20  ;;  %v2688_v61 = vsub.f32 %v2663_v35, %v2685_v20  ;;  %v2689_v17 = vsub.f32 %v2666_v34, %v2685_v20 }
0x2ddd   :  { %v2690_v56 = vsub.f32 %v2669_v38, %v2685_v20  ;;  %v2691_v50 = vsub.f32 %v2672_v36, %v2685_v20  ;;  %v2692_v58 = vsub.f32 %v2675_v41, %v2685_v20  ;;  %v2693_v63 = vsub.f32 %v2678_v43, %v2685_v20 }
0x2dde   :  { %v2694_v60 = vmul.f32 1.442695, %v2686_v23  ;;  %v2696_v53 = vmul.f32 1.442695, %v2687_v13  ;;  %v2698_v28 = vmul.f32 1.442695, %v2688_v61 }
0x2ddf   :  { %v2700_v55 = vmul.f32 1.442695, %v2689_v17  ;;  %v2702_v59 = vmul.f32 1.442695, %v2690_v56  ;;  %v2704_v54 = vmul.f32 1.442695, %v2691_v50 }
0x2de0   :  { %3390 = vpow2.f32 %v2694_v60  ;;  %v2706_v47 = vmul.f32 1.442695, %v2692_v58  ;;  %v2708_v27 = vmul.f32 1.442695, %v2693_v63 }
0x2de1   :  { %3392 = vpow2.f32 %v2696_v53 }
0x2de2   :  { %3394 = vpow2.f32 %v2698_v28 }
0x2de3   :  { %3396 = vpow2.f32 %v2700_v55 }
0x2de4   :  { %3398 = vpow2.f32 %v2702_v59 }
0x2de5   :  { %3400 = vpow2.f32 %v2704_v54 }
0x2de6   :  { %3402 = vpow2.f32 %v2706_v47 }
0x2de7   :  { %3404 = vpow2.f32 %v2708_v27 }
0x2ded   :  { %v3391_v25 = vpop.eup %3390 }
0x2dee   :  { %v3393_v30 = vpop.eup %3392 }
0x2def   :  { %v2710_v0 = vadd.f32 %v3393_v30, %v3391_v25  ;;  %v3395_v48 = vpop.eup %3394 }
0x2df0   :  { %v3397_v7 = vpop.eup %3396 }
0x2df1   :  { %v2711_v5 = vadd.f32 %v3395_v48, %v2710_v0  ;;  %v3399_v12 = vpop.eup %3398 }
0x2df2   :  { %v3401_v16 = vpop.eup %3400 }
0x2df3   :  { %v2712_v10 = vadd.f32 %v3397_v7, %v2711_v5  ;;  %v3403_v11 = vpop.eup %3402 }
0x2df4   :  { %v3405_v18 = vpop.eup %3404 }
0x2df5   :  { %v2713_v14 = vadd.f32 %v3399_v12, %v2712_v10 }
0x2df7   :  { %v2714_v29 = vadd.f32 %v3401_v16, %v2713_v14 }
0x2df9   :  { %v2715_v45 = vadd.f32 %v3403_v11, %v2714_v29 }
0x2dfb   :  { %v2716_v46 = vadd.f32 %v3405_v18, %v2715_v45 }
0x2dfd   :  { %3406 = vrcp.f32 %v2716_v46 }
0x2e0a   :  { %v3407_v19 = vpop.eup %3406 }
0x2e0b   :  { %v2718_v51 = vmul.f32 %v3407_v19, %v3391_v25  ;;  %v2719_v52 = vmul.f32 %v3407_v19, %v3393_v30  ;;  %v2720_v24 = vmul.f32 %v3407_v19, %v3395_v48  ;;  %v2721_v62 = vmul.f32 %v3407_v19, %v3397_v7 }
0x2e0c   :  { %v2722_v3 = vmul.f32 %v3407_v19, %v3399_v12  ;;  %v2723_v32 = vmul.f32 %v3407_v19, %v3401_v16  ;;  %v2724_v38 = vmul.f32 %v3407_v19, %v3403_v11  ;;  %v2725_v43 = vmul.f32 %v3407_v19, %v3405_v18 }
0x2e0d   :  { %v2726_v40 = vmul.f32 %v2718_v51, %v4483_v21  ;;  %v2727_v6 = vmul.f32 %v2719_v52, %v4469_v31  ;;  %v2728_v33 = vmul.f32 %v2720_v24, %v4453_v26  ;;  %v2729_v35 = vmul.f32 %v2721_v62, %v4459_v4 }
0x2e0e   :  { %v2730_v39 = vmul.f32 %v2722_v3, %v4472_v15  ;;  %v2731_v21 = vmul.f32 %v2723_v32, %v4463_v49  ;;  %v2732_v37 = vmul.f32 %v2724_v38, %v4476_v2  ;;  %v2733_v8 = vmul.f32 %v2725_v43, %v4485_v22  ;;  %v2915_v49 = vld [vmem:[%s4543_s14] ss:$0 sm:$0xff] }
0x2e0f   :  { %v2734_v34 = vsel %vm779_vm3, %v2726_v40, 0.0  ;;  %v2735_v57 = vsel %vm779_vm3, %v2727_v6, 0.0  ;;  %v2737_v41 = vsel %vm779_vm3, %v2728_v33, 0.0  ;;  %v2739_v31 = vsel %vm779_vm3, %v2729_v35, 0.0 }
0x2e10   :  { %v2736_v36 = vadd.f32 %v2735_v57, %v2734_v34  ;;  %v2741_v4 = vsel %vm779_vm3, %v2730_v39, 0.0  ;;  %v2743_v9 = vsel %vm779_vm3, %v2731_v21, 0.0  ;;  %v2745_v15 = vsel %vm779_vm3, %v2732_v37, 0.0 }
0x2e11   :  { %v2747_v23 = vsel %vm779_vm3, %v2733_v8, 0.0 }
0x2e12   :  { %v2738_v42 = vadd.f32 %v2737_v41, %v2736_v36 }
0x2e14   :  { %v2740_v26 = vadd.f32 %v2739_v31, %v2738_v42 }
0x2e16   :  { %v2742_v44 = vadd.f32 %v2741_v4, %v2740_v26 }
0x2e18   :  { %v2744_v1 = vadd.f32 %v2743_v9, %v2742_v44 }
0x2e1a   :  { %v2746_v20 = vadd.f32 %v2745_v15, %v2744_v1 }
0x2e1c   :  { %v2748_v13 = vadd.f32 %v2747_v23, %v2746_v20 }
0x2e1e   :  { %3205 = vmatmul.mubr.msk.f32.vlgmr.msra.gmra.mxu0 %vm779_vm3, %v2748_v13 }
0x2ede   :  { %v2829_v2 = vpop.f32.mrf.mxu0 }
0x2edf   :  { %v2830_v61 = vadd.f32 %v2915_v49, %v2829_v2 }
0x2ee0   :  { %v3206_v17 = vpop.f32.mrf.mxu0 }
0x2ee1   :  { %2834 = vst.msk [vmem:[%s4544_s15] sm:$0xff] %vm2833_vm7, %v2830_v61 }

</bundles_post_ra>
